<compile_context>
chip_gen: v6e
topology: v6e:2x2x1
jax: 0.10.0
libtpu: 0.0.40
codegen_flags: <defaults>
</compile_context>

<pallas_src>
import functools
import math

import jax
import jax.numpy as jnp
from jax.experimental import pallas as pl
from jax.experimental.pallas import tpu as pltpu

# ----------------------------- model hyper-parameters -----------------------------
IMAGE_SIZE = (16, 16)      # H <= 100 so the x[:, :, :100, :] slice is a no-op here
PATCH_SIZE = (4, 4)
NUM_LAYERS = 2
NUM_HEADS = 4
HIDDEN_DIM = 32
MLP_DIM = 64
NUM_CLASSES = 1
LN_EPS = 1e-6


# ----------------------------- in-kernel math helpers -----------------------------
def _layernorm(v, g, b):
    mu = jnp.mean(v, axis=-1, keepdims=True)
    var = jnp.mean(jnp.square(v - mu), axis=-1, keepdims=True)
    return (v - mu) * jax.lax.rsqrt(var + LN_EPS) * g + b


def _erf(x):
    # Abramowitz & Stegun 7.1.26 rational approximation (|err| < 1.5e-7 ~ f32 eps),
    # built only from exp/mul/add/div so it is guaranteed to lower in Mosaic.
    # TODO(synk): switch to jax.lax.erf if/when its Mosaic lowering is guaranteed.
    p = 0.3275911
    a1, a2, a3, a4, a5 = 0.254829592, -0.284496736, 1.421413741, -1.453152027, 1.061405429
    ax = jnp.abs(x)
    t = 1.0 / (1.0 + p * ax)
    poly = ((((a5 * t + a4) * t + a3) * t + a2) * t + a1) * t
    y = 1.0 - poly * jnp.exp(-ax * ax)
    return jnp.where(x >= 0, y, -y)


def _gelu_exact(x):  # matches torch nn.GELU() (erf-based) to ~f32 precision
    return 0.5 * x * (1.0 + _erf(x * 0.7071067811865476))


# ----------------------------------- fused kernel -----------------------------------
def vit_fused_kernel(patches_ref, conv_w_ref, conv_b_ref, cls_ref,
                     pos_cls_ref, pos_patch_ref,
                     ln1w_ref, ln1b_ref, qkvw_ref, qkvb_ref, outw_ref, outb_ref,
                     ln2w_ref, ln2b_ref, w1_ref, b1_ref, w2_ref, b2_ref,
                     lnw_ref, lnb_ref, hw_ref, hb_ref,
                     o_ref, h_buf, *, B, S, D, H, L):
    N = S - 1
    T = B * S
    hd = D // H
    scale = 1.0 / math.sqrt(hd)

    # ---- patch embedding: conv(stride == kernel == patch)  ==  matmul on flattened patches
    emb = jnp.dot(patches_ref[...], conv_w_ref[...],
                  preferred_element_type=jnp.float32) + conv_b_ref[...]     # (B*N, D)

    # ---- assemble tokens [CLS, patches] per batch + positional embedding into scratch
    cls_row = cls_ref[...] + pos_cls_ref[...]                               # (1, D)
    patch_pos = pos_patch_ref[...]                                          # (N, D)
    for b in range(B):                                                      # unrolled, B small
        h_buf[b * S: b * S + 1, :] = cls_row
        h_buf[b * S + 1:(b + 1) * S, :] = emb[b * N:(b + 1) * N, :] + patch_pos
    h = h_buf[...]                                                          # (T, D) all tokens

    # ---- block-diagonal mask: token i attends to token j only if same batch element
    ri = jax.lax.broadcasted_iota(jnp.int32, (T, T), 0)
    ci = jax.lax.broadcasted_iota(jnp.int32, (T, T), 1)
    same_batch = None
    for b in range(B):
        blk = ((ri >= b * S) & (ri < (b + 1) * S)) & ((ci >= b * S) & (ci < (b + 1) * S))
        same_batch = blk if same_batch is None else (same_batch | blk)

    # ---- encoder blocks (unrolled over L layers) ----
    for l in range(L):
        # multi-head self-attention (pre-LN)
        y = _layernorm(h, ln1w_ref[l], ln1b_ref[l])
        qkv = jnp.dot(y, qkvw_ref[l], preferred_element_type=jnp.float32) + qkvb_ref[l]
        head_outs = []
        for hh in range(H):                                                 # independent heads
            qh = qkv[:, hh * hd:(hh + 1) * hd] * scale                      # (T, hd)
            kh = qkv[:, D + hh * hd:D + (hh + 1) * hd]                      # (T, hd)
            vh = qkv[:, 2 * D + hh * hd:2 * D + (hh + 1) * hd]              # (T, hd)
            # q @ k^T without materializing a transpose: contract last dims.
            s = jax.lax.dot_general(qh, kh, (((1,), (1,)), ((), ())),
                                    preferred_element_type=jnp.float32)     # (T, T)
            s = jnp.where(same_batch, s, -1e30)
            s = s - jnp.max(s, axis=-1, keepdims=True)
            e = jnp.exp(s)
            p = e * pl.reciprocal(jnp.sum(e, axis=-1, keepdims=True), approx=True)
            head_outs.append(jnp.dot(p, vh, preferred_element_type=jnp.float32))
        attn = jnp.concatenate(head_outs, axis=-1)                          # (T, D)
        attn = jnp.dot(attn, outw_ref[l], preferred_element_type=jnp.float32) + outb_ref[l]
        h = h + attn                                                        # residual 1

        # MLP (pre-LN)
        z = _layernorm(h, ln2w_ref[l], ln2b_ref[l])
        z = jnp.dot(z, w1_ref[l], preferred_element_type=jnp.float32) + b1_ref[l]
        z = _gelu_exact(z)
        z = jnp.dot(z, w2_ref[l], preferred_element_type=jnp.float32) + b2_ref[l]
        h = h + z                                                           # residual 2

    # ---- final encoder LayerNorm (all tokens, as in torch) + classification head ----
    y = _layernorm(h, lnw_ref[...], lnb_ref[...])
    logits = jnp.dot(y, hw_ref[...], preferred_element_type=jnp.float32) + hb_ref[...]
    for b in range(B):                                                      # CLS rows only
        o_ref[b:b + 1, :] = logits[b * S:b * S + 1, :]


# ----------------------------------- forward -----------------------------------
def vit_forward(x, params):
    # _process_input: row slice to <=100, patchify (layout-only); the conv_proj
    # matmul itself is fused into the Pallas kernel.
    x = x[:, :, :100, :]
    B, C, Hh, Ww = x.shape
    p0, p1 = PATCH_SIZE
    n_h, n_w = Hh // p0, Ww // p1
    patches = x.reshape(B, C, n_h, p0, n_w, p1)
    patches = patches.transpose(0, 2, 4, 1, 3, 5).reshape(B * n_h * n_w, C * p0 * p1)

    S = n_h * n_w + 1
    T = B * S
    D = HIDDEN_DIM

    pos_cls = params['pos_embedding'][0:1]        # (1, D)
    pos_patch = params['pos_embedding'][1:]       # (S-1, D)

    vmem = pl.BlockSpec(memory_space=pltpu.MemorySpace.VMEM)
    args = (patches,
            params['conv_w'], params['conv_b'],
            params['class_token'], pos_cls, pos_patch,
            params['ln1_w'], params['ln1_b'], params['qkv_w'], params['qkv_b'],
            params['out_w'], params['out_b'], params['ln2_w'], params['ln2_b'],
            params['mlp_w1'], params['mlp_b1'], params['mlp_w2'], params['mlp_b2'],
            params['ln_w'], params['ln_b'], params['head_w'], params['head_b'])

    kernel = functools.partial(vit_fused_kernel, B=B, S=S, D=D,
                               H=NUM_HEADS, L=NUM_LAYERS)
    return pl.pallas_call(
        kernel,
        out_shape=jax.ShapeDtypeStruct((B, NUM_CLASSES), jnp.float32),
        in_specs=[vmem] * len(args),
        out_specs=vmem,
        scratch_shapes=[pltpu.VMEM((T, D), jnp.float32)],
    )(*args)


# ------------------------------- parameter init -------------------------------
def init_params(key):
    std = 0.02
    D, M, L = HIDDEN_DIM, MLP_DIM, NUM_LAYERS
    S = (IMAGE_SIZE[0] // PATCH_SIZE[0]) * (IMAGE_SIZE[1] // PATCH_SIZE[1]) + 1
    P = 1 * PATCH_SIZE[0] * PATCH_SIZE[1]          # in_channels = 1
    ks = iter(jax.random.split(key, 16))

    def nrm(shape):
        return (std * jax.random.normal(next(ks), shape)).astype(jnp.float32)

    return dict(
        conv_w=nrm((P, D)), conv_b=jnp.zeros((1, D), jnp.float32),   # conv_proj as matmul
        class_token=jnp.zeros((1, D), jnp.float32),                  # torch zero init
        pos_embedding=nrm((S, D)),
        # per-layer params stacked along a leading L axis (indexed statically in-kernel)
        ln1_w=jnp.ones((L, 1, D), jnp.float32), ln1_b=jnp.zeros((L, 1, D), jnp.float32),
        qkv_w=nrm((L, D, 3 * D)), qkv_b=nrm((L, 1, 3 * D)),
        out_w=nrm((L, D, D)), out_b=nrm((L, 1, D)),
        ln2_w=jnp.ones((L, 1, D), jnp.float32), ln2_b=jnp.zeros((L, 1, D), jnp.float32),
        mlp_w1=nrm((L, D, M)), mlp_b1=nrm((L, 1, M)),
        mlp_w2=nrm((L, M, D)), mlp_b2=nrm((L, 1, D)),
        ln_w=jnp.ones((1, D), jnp.float32), ln_b=jnp.zeros((1, D), jnp.float32),
        head_w=nrm((D, NUM_CLASSES)), head_b=nrm((1, NUM_CLASSES)),
    )


if __name__ == "__main__":
    key = jax.random.PRNGKey(0)
    pkey, xkey = jax.random.split(key)
    params = init_params(pkey)
    x = jax.random.normal(xkey, (2, 1, IMAGE_SIZE[0], IMAGE_SIZE[1]), jnp.float32)

    out = jax.jit(vit_forward)(x, params)
    out = jax.block_until_ready(out)
    assert out.shape == (2, NUM_CLASSES) and out.dtype == jnp.float32
    print("KERNEL_OK")
</pallas_src>

<mosaic_0001>
module attributes {stable_mosaic.version = 11 : i64} {
  func.func @vit_fused_kernel(%arg0: memref<32x16xf32, #tpu.memory_space<vmem>>, %arg1: memref<16x32xf32, #tpu.memory_space<vmem>>, %arg2: memref<1x32xf32, #tpu.memory_space<vmem>>, %arg3: memref<1x32xf32, #tpu.memory_space<vmem>>, %arg4: memref<1x32xf32, #tpu.memory_space<vmem>>, %arg5: memref<16x32xf32, #tpu.memory_space<vmem>>, %arg6: memref<2x1x32xf32, #tpu.memory_space<vmem>>, %arg7: memref<2x1x32xf32, #tpu.memory_space<vmem>>, %arg8: memref<2x32x96xf32, #tpu.memory_space<vmem>>, %arg9: memref<2x1x96xf32, #tpu.memory_space<vmem>>, %arg10: memref<2x32x32xf32, #tpu.memory_space<vmem>>, %arg11: memref<2x1x32xf32, #tpu.memory_space<vmem>>, %arg12: memref<2x1x32xf32, #tpu.memory_space<vmem>>, %arg13: memref<2x1x32xf32, #tpu.memory_space<vmem>>, %arg14: memref<2x32x64xf32, #tpu.memory_space<vmem>>, %arg15: memref<2x1x64xf32, #tpu.memory_space<vmem>>, %arg16: memref<2x64x32xf32, #tpu.memory_space<vmem>>, %arg17: memref<2x1x32xf32, #tpu.memory_space<vmem>>, %arg18: memref<1x32xf32, #tpu.memory_space<vmem>>, %arg19: memref<1x32xf32, #tpu.memory_space<vmem>>, %arg20: memref<32x1xf32, #tpu.memory_space<vmem>>, %arg21: memref<1x1xf32, #tpu.memory_space<vmem>>, %arg22: memref<2x1xf32, #tpu.memory_space<vmem>>, %arg23: memref<34x32xf32, #tpu.memory_space<vmem>>) attributes {dimension_semantics = [], scalar_prefetch = 0 : i64, scratch_operands = 1 : i64, tpu.core_type = #tpu.core_type<tc>} {
    %c0 = arith.constant 0 : index
    %c0_0 = arith.constant 0 : index
    %0 = vector.load %arg0[%c0, %c0_0] : memref<32x16xf32, #tpu.memory_space<vmem>>, vector<32x16xf32>
    %c0_1 = arith.constant 0 : index
    %c0_2 = arith.constant 0 : index
    %1 = vector.load %arg1[%c0_1, %c0_2] : memref<16x32xf32, #tpu.memory_space<vmem>>, vector<16x32xf32>
    %cst = arith.constant dense<0.000000e+00> : vector<32x32xf32>
    %2 = tpu.matmul %0, %1, %cst {dimension_numbers = #tpu.dot_dimension_numbers<[1], [0], [0], [1], [0, 0, 1, 1], [], []>} : vector<32x16xf32>, vector<16x32xf32>, vector<32x32xf32> -> vector<32x32xf32>
    %c0_3 = arith.constant 0 : index
    %c0_4 = arith.constant 0 : index
    %3 = vector.load %arg2[%c0_3, %c0_4] : memref<1x32xf32, #tpu.memory_space<vmem>>, vector<1x32xf32>
    %4 = vector.broadcast %3 : vector<1x32xf32> to vector<32x32xf32>
    %5 = arith.addf %2, %4 : vector<32x32xf32>
    %c0_5 = arith.constant 0 : index
    %c0_6 = arith.constant 0 : index
    %6 = vector.load %arg3[%c0_5, %c0_6] : memref<1x32xf32, #tpu.memory_space<vmem>>, vector<1x32xf32>
    %c0_7 = arith.constant 0 : index
    %c0_8 = arith.constant 0 : index
    %7 = vector.load %arg4[%c0_7, %c0_8] : memref<1x32xf32, #tpu.memory_space<vmem>>, vector<1x32xf32>
    %8 = arith.addf %6, %7 : vector<1x32xf32>
    %c0_9 = arith.constant 0 : index
    %c0_10 = arith.constant 0 : index
    %9 = vector.load %arg5[%c0_9, %c0_10] : memref<16x32xf32, #tpu.memory_space<vmem>>, vector<16x32xf32>
    %c0_11 = arith.constant 0 : index
    %c0_12 = arith.constant 0 : index
    %10 = vector.load %arg23[%c0_11, %c0_12] : memref<34x32xf32, #tpu.memory_space<vmem>>, vector<1x32xf32>
    tpu.vector_store %arg23[%c0_11, %c0_12], %8 {strides = array<i32>} : memref<34x32xf32, #tpu.memory_space<vmem>>, vector<1x32xf32>,
    %11 = vector.extract_strided_slice %5 {offsets = [0, 0], sizes = [16, 32], strides = [1, 1]} : vector<32x32xf32> to vector<16x32xf32>
    %12 = arith.addf %11, %9 : vector<16x32xf32>
    %c1 = arith.constant 1 : index
    %c0_13 = arith.constant 0 : index
    %13 = vector.load %arg23[%c1, %c0_13] : memref<34x32xf32, #tpu.memory_space<vmem>>, vector<16x32xf32>
    tpu.vector_store %arg23[%c1, %c0_13], %12 {strides = array<i32>} : memref<34x32xf32, #tpu.memory_space<vmem>>, vector<16x32xf32>,
    %c17 = arith.constant 17 : index
    %c0_14 = arith.constant 0 : index
    %14 = vector.load %arg23[%c17, %c0_14] : memref<34x32xf32, #tpu.memory_space<vmem>>, vector<1x32xf32>
    tpu.vector_store %arg23[%c17, %c0_14], %8 {strides = array<i32>} : memref<34x32xf32, #tpu.memory_space<vmem>>, vector<1x32xf32>,
    %15 = vector.extract_strided_slice %5 {offsets = [16, 0], sizes = [16, 32], strides = [1, 1]} : vector<32x32xf32> to vector<16x32xf32>
    %16 = arith.addf %15, %9 : vector<16x32xf32>
    %c18 = arith.constant 18 : index
    %c0_15 = arith.constant 0 : index
    %17 = vector.load %arg23[%c18, %c0_15] : memref<34x32xf32, #tpu.memory_space<vmem>>, vector<16x32xf32>
    tpu.vector_store %arg23[%c18, %c0_15], %16 {strides = array<i32>} : memref<34x32xf32, #tpu.memory_space<vmem>>, vector<16x32xf32>,
    %c0_16 = arith.constant 0 : index
    %c0_17 = arith.constant 0 : index
    %18 = vector.load %arg23[%c0_16, %c0_17] : memref<34x32xf32, #tpu.memory_space<vmem>>, vector<34x32xf32>
    %19 = tpu.iota {dimensions = array<i32: 0>} : vector<34x34xi32>
    %20 = tpu.iota {dimensions = array<i32: 1>} : vector<34x34xi32>
    %c0_i32 = arith.constant 0 : i32
    %21 = vector.broadcast %c0_i32 : i32 to vector<34x34xi32>
    %22 = arith.cmpi sge, %19, %21 : vector<34x34xi32>
    %c17_i32 = arith.constant 17 : i32
    %23 = vector.broadcast %c17_i32 : i32 to vector<34x34xi32>
    %24 = arith.cmpi slt, %19, %23 : vector<34x34xi32>
    %25 = arith.andi %22, %24 : vector<34x34xi1>
    %c0_i32_18 = arith.constant 0 : i32
    %26 = vector.broadcast %c0_i32_18 : i32 to vector<34x34xi32>
    %27 = arith.cmpi sge, %20, %26 : vector<34x34xi32>
    %c17_i32_19 = arith.constant 17 : i32
    %28 = vector.broadcast %c17_i32_19 : i32 to vector<34x34xi32>
    %29 = arith.cmpi slt, %20, %28 : vector<34x34xi32>
    %30 = arith.andi %27, %29 : vector<34x34xi1>
    %31 = arith.andi %25, %30 : vector<34x34xi1>
    %c17_i32_20 = arith.constant 17 : i32
    %32 = vector.broadcast %c17_i32_20 : i32 to vector<34x34xi32>
    %33 = arith.cmpi sge, %19, %32 : vector<34x34xi32>
    %c34_i32 = arith.constant 34 : i32
    %34 = vector.broadcast %c34_i32 : i32 to vector<34x34xi32>
    %35 = arith.cmpi slt, %19, %34 : vector<34x34xi32>
    %36 = arith.andi %33, %35 : vector<34x34xi1>
    %c17_i32_21 = arith.constant 17 : i32
    %37 = vector.broadcast %c17_i32_21 : i32 to vector<34x34xi32>
    %38 = arith.cmpi sge, %20, %37 : vector<34x34xi32>
    %c34_i32_22 = arith.constant 34 : i32
    %39 = vector.broadcast %c34_i32_22 : i32 to vector<34x34xi32>
    %40 = arith.cmpi slt, %20, %39 : vector<34x34xi32>
    %41 = arith.andi %38, %40 : vector<34x34xi1>
    %42 = arith.andi %36, %41 : vector<34x34xi1>
    %43 = arith.ori %31, %42 : vector<34x34xi1>
    %c0_23 = arith.constant 0 : index
    %c0_24 = arith.constant 0 : index
    %c0_25 = arith.constant 0 : index
    %44 = vector.load %arg6[%c0_23, %c0_24, %c0_25] : memref<2x1x32xf32, #tpu.memory_space<vmem>>, vector<1x1x32xf32>
    %45 = vector.shape_cast %44 : vector<1x1x32xf32> to vector<1x32xf32>
    %c0_26 = arith.constant 0 : index
    %c0_27 = arith.constant 0 : index
    %c0_28 = arith.constant 0 : index
    %46 = vector.load %arg7[%c0_26, %c0_27, %c0_28] : memref<2x1x32xf32, #tpu.memory_space<vmem>>, vector<1x1x32xf32>
    %47 = vector.shape_cast %46 : vector<1x1x32xf32> to vector<1x32xf32>
    %cst_29 = arith.constant dense<0.000000e+00> : vector<34xf32>
    %48 = vector.multi_reduction <add>, %18, %cst_29 [1] : vector<34x32xf32> to vector<34xf32>
    %49 = vector.shape_cast %48 : vector<34xf32> to vector<34x1xf32>
    %cst_30 = arith.constant 3.200000e+01 : f32
    %50 = vector.broadcast %cst_30 : f32 to vector<34x1xf32>
    %51 = arith.divf %49, %50 : vector<34x1xf32>
    %52 = vector.broadcast %51 : vector<34x1xf32> to vector<34x32xf32>
    %53 = arith.subf %18, %52 : vector<34x32xf32>
    %54 = arith.mulf %53, %53 : vector<34x32xf32>
    %cst_31 = arith.constant dense<0.000000e+00> : vector<34xf32>
    %55 = vector.multi_reduction <add>, %54, %cst_31 [1] : vector<34x32xf32> to vector<34xf32>
    %56 = vector.shape_cast %55 : vector<34xf32> to vector<34x1xf32>
    %cst_32 = arith.constant 3.200000e+01 : f32
    %57 = vector.broadcast %cst_32 : f32 to vector<34x1xf32>
    %58 = arith.divf %56, %57 : vector<34x1xf32>
    %59 = vector.broadcast %51 : vector<34x1xf32> to vector<34x32xf32>
    %60 = arith.subf %18, %59 : vector<34x32xf32>
    %cst_33 = arith.constant 9.99999997E-7 : f32
    %61 = vector.broadcast %cst_33 : f32 to vector<34x1xf32>
    %62 = arith.addf %58, %61 : vector<34x1xf32>
    %63 = math.rsqrt %62 : vector<34x1xf32>
    %64 = vector.broadcast %63 : vector<34x1xf32> to vector<34x32xf32>
    %65 = arith.mulf %60, %64 : vector<34x32xf32>
    %66 = vector.broadcast %45 : vector<1x32xf32> to vector<34x32xf32>
    %67 = arith.mulf %65, %66 : vector<34x32xf32>
    %68 = vector.broadcast %47 : vector<1x32xf32> to vector<34x32xf32>
    %69 = arith.addf %67, %68 : vector<34x32xf32>
    %c0_34 = arith.constant 0 : index
    %c0_35 = arith.constant 0 : index
    %c0_36 = arith.constant 0 : index
    %70 = vector.load %arg8[%c0_34, %c0_35, %c0_36] : memref<2x32x96xf32, #tpu.memory_space<vmem>>, vector<1x32x96xf32>
    %71 = vector.shape_cast %70 : vector<1x32x96xf32> to vector<32x96xf32>
    %cst_37 = arith.constant dense<0.000000e+00> : vector<34x96xf32>
    %72 = tpu.matmul %69, %71, %cst_37 {dimension_numbers = #tpu.dot_dimension_numbers<[1], [0], [0], [1], [0, 0, 1, 1], [], []>} : vector<34x32xf32>, vector<32x96xf32>, vector<34x96xf32> -> vector<34x96xf32>
    %c0_38 = arith.constant 0 : index
    %c0_39 = arith.constant 0 : index
    %c0_40 = arith.constant 0 : index
    %73 = vector.load %arg9[%c0_38, %c0_39, %c0_40] : memref<2x1x96xf32, #tpu.memory_space<vmem>>, vector<1x1x96xf32>
    %74 = vector.shape_cast %73 : vector<1x1x96xf32> to vector<1x96xf32>
    %75 = vector.broadcast %74 : vector<1x96xf32> to vector<34x96xf32>
    %76 = arith.addf %72, %75 : vector<34x96xf32>
    %77 = vector.extract_strided_slice %76 {offsets = [0, 0], sizes = [34, 8], strides = [1, 1]} : vector<34x96xf32> to vector<34x8xf32>
    %cst_41 = arith.constant 0.353553385 : f32
    %78 = vector.broadcast %cst_41 : f32 to vector<34x8xf32>
    %79 = arith.mulf %77, %78 : vector<34x8xf32>
    %80 = vector.extract_strided_slice %76 {offsets = [0, 32], sizes = [34, 8], strides = [1, 1]} : vector<34x96xf32> to vector<34x8xf32>
    %81 = vector.extract_strided_slice %76 {offsets = [0, 64], sizes = [34, 8], strides = [1, 1]} : vector<34x96xf32> to vector<34x8xf32>
    %cst_42 = arith.constant dense<0.000000e+00> : vector<34x34xf32>
    %82 = tpu.matmul %79, %80, %cst_42 {dimension_numbers = #tpu.dot_dimension_numbers<[1], [1], [0], [0], [0, 0, 1, 0], [], []>} : vector<34x8xf32>, vector<34x8xf32>, vector<34x34xf32> -> vector<34x34xf32>
    %cst_43 = arith.constant -1.000000e+30 : f32
    %83 = vector.broadcast %cst_43 : f32 to vector<34x34xf32>
    %84 = arith.select %43, %82, %83 : vector<34x34xi1>, vector<34x34xf32>
    %cst_44 = arith.constant dense<0xFF800000> : vector<34xf32>
    %85 = vector.multi_reduction <maximumf>, %84, %cst_44 [1] : vector<34x34xf32> to vector<34xf32>
    %86 = vector.shape_cast %85 : vector<34xf32> to vector<34x1xf32>
    %87 = vector.broadcast %86 : vector<34x1xf32> to vector<34x34xf32>
    %88 = arith.subf %84, %87 : vector<34x34xf32>
    %89 = math.exp %88 : vector<34x34xf32>
    %cst_45 = arith.constant dense<0.000000e+00> : vector<34xf32>
    %90 = vector.multi_reduction <add>, %89, %cst_45 [1] : vector<34x34xf32> to vector<34xf32>
    %91 = vector.shape_cast %90 : vector<34xf32> to vector<34x1xf32>
    %92 = tpu.reciprocal %91 {approx = true} : vector<34x1xf32> -> vector<34x1xf32>
    %93 = vector.broadcast %92 : vector<34x1xf32> to vector<34x34xf32>
    %94 = arith.mulf %89, %93 : vector<34x34xf32>
    %cst_46 = arith.constant dense<0.000000e+00> : vector<34x8xf32>
    %95 = tpu.matmul %94, %81, %cst_46 {dimension_numbers = #tpu.dot_dimension_numbers<[1], [0], [0], [1], [0, 0, 1, 1], [], []>} : vector<34x34xf32>, vector<34x8xf32>, vector<34x8xf32> -> vector<34x8xf32>
    %96 = vector.extract_strided_slice %76 {offsets = [0, 8], sizes = [34, 8], strides = [1, 1]} : vector<34x96xf32> to vector<34x8xf32>
    %cst_47 = arith.constant 0.353553385 : f32
    %97 = vector.broadcast %cst_47 : f32 to vector<34x8xf32>
    %98 = arith.mulf %96, %97 : vector<34x8xf32>
    %99 = vector.extract_strided_slice %76 {offsets = [0, 40], sizes = [34, 8], strides = [1, 1]} : vector<34x96xf32> to vector<34x8xf32>
    %100 = vector.extract_strided_slice %76 {offsets = [0, 72], sizes = [34, 8], strides = [1, 1]} : vector<34x96xf32> to vector<34x8xf32>
    %cst_48 = arith.constant dense<0.000000e+00> : vector<34x34xf32>
    %101 = tpu.matmul %98, %99, %cst_48 {dimension_numbers = #tpu.dot_dimension_numbers<[1], [1], [0], [0], [0, 0, 1, 0], [], []>} : vector<34x8xf32>, vector<34x8xf32>, vector<34x34xf32> -> vector<34x34xf32>
    %cst_49 = arith.constant -1.000000e+30 : f32
    %102 = vector.broadcast %cst_49 : f32 to vector<34x34xf32>
    %103 = arith.select %43, %101, %102 : vector<34x34xi1>, vector<34x34xf32>
    %cst_50 = arith.constant dense<0xFF800000> : vector<34xf32>
    %104 = vector.multi_reduction <maximumf>, %103, %cst_50 [1] : vector<34x34xf32> to vector<34xf32>
    %105 = vector.shape_cast %104 : vector<34xf32> to vector<34x1xf32>
    %106 = vector.broadcast %105 : vector<34x1xf32> to vector<34x34xf32>
    %107 = arith.subf %103, %106 : vector<34x34xf32>
    %108 = math.exp %107 : vector<34x34xf32>
    %cst_51 = arith.constant dense<0.000000e+00> : vector<34xf32>
    %109 = vector.multi_reduction <add>, %108, %cst_51 [1] : vector<34x34xf32> to vector<34xf32>
    %110 = vector.shape_cast %109 : vector<34xf32> to vector<34x1xf32>
    %111 = tpu.reciprocal %110 {approx = true} : vector<34x1xf32> -> vector<34x1xf32>
    %112 = vector.broadcast %111 : vector<34x1xf32> to vector<34x34xf32>
    %113 = arith.mulf %108, %112 : vector<34x34xf32>
    %cst_52 = arith.constant dense<0.000000e+00> : vector<34x8xf32>
    %114 = tpu.matmul %113, %100, %cst_52 {dimension_numbers = #tpu.dot_dimension_numbers<[1], [0], [0], [1], [0, 0, 1, 1], [], []>} : vector<34x34xf32>, vector<34x8xf32>, vector<34x8xf32> -> vector<34x8xf32>
    %115 = vector.extract_strided_slice %76 {offsets = [0, 16], sizes = [34, 8], strides = [1, 1]} : vector<34x96xf32> to vector<34x8xf32>
    %cst_53 = arith.constant 0.353553385 : f32
    %116 = vector.broadcast %cst_53 : f32 to vector<34x8xf32>
    %117 = arith.mulf %115, %116 : vector<34x8xf32>
    %118 = vector.extract_strided_slice %76 {offsets = [0, 48], sizes = [34, 8], strides = [1, 1]} : vector<34x96xf32> to vector<34x8xf32>
    %119 = vector.extract_strided_slice %76 {offsets = [0, 80], sizes = [34, 8], strides = [1, 1]} : vector<34x96xf32> to vector<34x8xf32>
    %cst_54 = arith.constant dense<0.000000e+00> : vector<34x34xf32>
    %120 = tpu.matmul %117, %118, %cst_54 {dimension_numbers = #tpu.dot_dimension_numbers<[1], [1], [0], [0], [0, 0, 1, 0], [], []>} : vector<34x8xf32>, vector<34x8xf32>, vector<34x34xf32> -> vector<34x34xf32>
    %cst_55 = arith.constant -1.000000e+30 : f32
    %121 = vector.broadcast %cst_55 : f32 to vector<34x34xf32>
    %122 = arith.select %43, %120, %121 : vector<34x34xi1>, vector<34x34xf32>
    %cst_56 = arith.constant dense<0xFF800000> : vector<34xf32>
    %123 = vector.multi_reduction <maximumf>, %122, %cst_56 [1] : vector<34x34xf32> to vector<34xf32>
    %124 = vector.shape_cast %123 : vector<34xf32> to vector<34x1xf32>
    %125 = vector.broadcast %124 : vector<34x1xf32> to vector<34x34xf32>
    %126 = arith.subf %122, %125 : vector<34x34xf32>
    %127 = math.exp %126 : vector<34x34xf32>
    %cst_57 = arith.constant dense<0.000000e+00> : vector<34xf32>
    %128 = vector.multi_reduction <add>, %127, %cst_57 [1] : vector<34x34xf32> to vector<34xf32>
    %129 = vector.shape_cast %128 : vector<34xf32> to vector<34x1xf32>
    %130 = tpu.reciprocal %129 {approx = true} : vector<34x1xf32> -> vector<34x1xf32>
    %131 = vector.broadcast %130 : vector<34x1xf32> to vector<34x34xf32>
    %132 = arith.mulf %127, %131 : vector<34x34xf32>
    %cst_58 = arith.constant dense<0.000000e+00> : vector<34x8xf32>
    %133 = tpu.matmul %132, %119, %cst_58 {dimension_numbers = #tpu.dot_dimension_numbers<[1], [0], [0], [1], [0, 0, 1, 1], [], []>} : vector<34x34xf32>, vector<34x8xf32>, vector<34x8xf32> -> vector<34x8xf32>
    %134 = vector.extract_strided_slice %76 {offsets = [0, 24], sizes = [34, 8], strides = [1, 1]} : vector<34x96xf32> to vector<34x8xf32>
    %cst_59 = arith.constant 0.353553385 : f32
    %135 = vector.broadcast %cst_59 : f32 to vector<34x8xf32>
    %136 = arith.mulf %134, %135 : vector<34x8xf32>
    %137 = vector.extract_strided_slice %76 {offsets = [0, 56], sizes = [34, 8], strides = [1, 1]} : vector<34x96xf32> to vector<34x8xf32>
    %138 = vector.extract_strided_slice %76 {offsets = [0, 88], sizes = [34, 8], strides = [1, 1]} : vector<34x96xf32> to vector<34x8xf32>
    %cst_60 = arith.constant dense<0.000000e+00> : vector<34x34xf32>
    %139 = tpu.matmul %136, %137, %cst_60 {dimension_numbers = #tpu.dot_dimension_numbers<[1], [1], [0], [0], [0, 0, 1, 0], [], []>} : vector<34x8xf32>, vector<34x8xf32>, vector<34x34xf32> -> vector<34x34xf32>
    %cst_61 = arith.constant -1.000000e+30 : f32
    %140 = vector.broadcast %cst_61 : f32 to vector<34x34xf32>
    %141 = arith.select %43, %139, %140 : vector<34x34xi1>, vector<34x34xf32>
    %cst_62 = arith.constant dense<0xFF800000> : vector<34xf32>
    %142 = vector.multi_reduction <maximumf>, %141, %cst_62 [1] : vector<34x34xf32> to vector<34xf32>
    %143 = vector.shape_cast %142 : vector<34xf32> to vector<34x1xf32>
    %144 = vector.broadcast %143 : vector<34x1xf32> to vector<34x34xf32>
    %145 = arith.subf %141, %144 : vector<34x34xf32>
    %146 = math.exp %145 : vector<34x34xf32>
    %cst_63 = arith.constant dense<0.000000e+00> : vector<34xf32>
    %147 = vector.multi_reduction <add>, %146, %cst_63 [1] : vector<34x34xf32> to vector<34xf32>
    %148 = vector.shape_cast %147 : vector<34xf32> to vector<34x1xf32>
    %149 = tpu.reciprocal %148 {approx = true} : vector<34x1xf32> -> vector<34x1xf32>
    %150 = vector.broadcast %149 : vector<34x1xf32> to vector<34x34xf32>
    %151 = arith.mulf %146, %150 : vector<34x34xf32>
    %cst_64 = arith.constant dense<0.000000e+00> : vector<34x8xf32>
    %152 = tpu.matmul %151, %138, %cst_64 {dimension_numbers = #tpu.dot_dimension_numbers<[1], [0], [0], [1], [0, 0, 1, 1], [], []>} : vector<34x34xf32>, vector<34x8xf32>, vector<34x8xf32> -> vector<34x8xf32>
    %153 = tpu.concatenate %95, %114, %133, %152 in 1 : vector<34x8xf32>, vector<34x8xf32>, vector<34x8xf32>, vector<34x8xf32> -> vector<34x32xf32>
    %c0_65 = arith.constant 0 : index
    %c0_66 = arith.constant 0 : index
    %c0_67 = arith.constant 0 : index
    %154 = vector.load %arg10[%c0_65, %c0_66, %c0_67] : memref<2x32x32xf32, #tpu.memory_space<vmem>>, vector<1x32x32xf32>
    %155 = vector.shape_cast %154 : vector<1x32x32xf32> to vector<32x32xf32>
    %cst_68 = arith.constant dense<0.000000e+00> : vector<34x32xf32>
    %156 = tpu.matmul %153, %155, %cst_68 {dimension_numbers = #tpu.dot_dimension_numbers<[1], [0], [0], [1], [0, 0, 1, 1], [], []>} : vector<34x32xf32>, vector<32x32xf32>, vector<34x32xf32> -> vector<34x32xf32>
    %c0_69 = arith.constant 0 : index
    %c0_70 = arith.constant 0 : index
    %c0_71 = arith.constant 0 : index
    %157 = vector.load %arg11[%c0_69, %c0_70, %c0_71] : memref<2x1x32xf32, #tpu.memory_space<vmem>>, vector<1x1x32xf32>
    %158 = vector.shape_cast %157 : vector<1x1x32xf32> to vector<1x32xf32>
    %159 = vector.broadcast %158 : vector<1x32xf32> to vector<34x32xf32>
    %160 = arith.addf %156, %159 : vector<34x32xf32>
    %161 = arith.addf %18, %160 : vector<34x32xf32>
    %c0_72 = arith.constant 0 : index
    %c0_73 = arith.constant 0 : index
    %c0_74 = arith.constant 0 : index
    %162 = vector.load %arg12[%c0_72, %c0_73, %c0_74] : memref<2x1x32xf32, #tpu.memory_space<vmem>>, vector<1x1x32xf32>
    %163 = vector.shape_cast %162 : vector<1x1x32xf32> to vector<1x32xf32>
    %c0_75 = arith.constant 0 : index
    %c0_76 = arith.constant 0 : index
    %c0_77 = arith.constant 0 : index
    %164 = vector.load %arg13[%c0_75, %c0_76, %c0_77] : memref<2x1x32xf32, #tpu.memory_space<vmem>>, vector<1x1x32xf32>
    %165 = vector.shape_cast %164 : vector<1x1x32xf32> to vector<1x32xf32>
    %cst_78 = arith.constant dense<0.000000e+00> : vector<34xf32>
    %166 = vector.multi_reduction <add>, %161, %cst_78 [1] : vector<34x32xf32> to vector<34xf32>
    %167 = vector.shape_cast %166 : vector<34xf32> to vector<34x1xf32>
    %cst_79 = arith.constant 3.200000e+01 : f32
    %168 = vector.broadcast %cst_79 : f32 to vector<34x1xf32>
    %169 = arith.divf %167, %168 : vector<34x1xf32>
    %170 = vector.broadcast %169 : vector<34x1xf32> to vector<34x32xf32>
    %171 = arith.subf %161, %170 : vector<34x32xf32>
    %172 = arith.mulf %171, %171 : vector<34x32xf32>
    %cst_80 = arith.constant dense<0.000000e+00> : vector<34xf32>
    %173 = vector.multi_reduction <add>, %172, %cst_80 [1] : vector<34x32xf32> to vector<34xf32>
    %174 = vector.shape_cast %173 : vector<34xf32> to vector<34x1xf32>
    %cst_81 = arith.constant 3.200000e+01 : f32
    %175 = vector.broadcast %cst_81 : f32 to vector<34x1xf32>
    %176 = arith.divf %174, %175 : vector<34x1xf32>
    %177 = vector.broadcast %169 : vector<34x1xf32> to vector<34x32xf32>
    %178 = arith.subf %161, %177 : vector<34x32xf32>
    %cst_82 = arith.constant 9.99999997E-7 : f32
    %179 = vector.broadcast %cst_82 : f32 to vector<34x1xf32>
    %180 = arith.addf %176, %179 : vector<34x1xf32>
    %181 = math.rsqrt %180 : vector<34x1xf32>
    %182 = vector.broadcast %181 : vector<34x1xf32> to vector<34x32xf32>
    %183 = arith.mulf %178, %182 : vector<34x32xf32>
    %184 = vector.broadcast %163 : vector<1x32xf32> to vector<34x32xf32>
    %185 = arith.mulf %183, %184 : vector<34x32xf32>
    %186 = vector.broadcast %165 : vector<1x32xf32> to vector<34x32xf32>
    %187 = arith.addf %185, %186 : vector<34x32xf32>
    %c0_83 = arith.constant 0 : index
    %c0_84 = arith.constant 0 : index
    %c0_85 = arith.constant 0 : index
    %188 = vector.load %arg14[%c0_83, %c0_84, %c0_85] : memref<2x32x64xf32, #tpu.memory_space<vmem>>, vector<1x32x64xf32>
    %189 = vector.shape_cast %188 : vector<1x32x64xf32> to vector<32x64xf32>
    %cst_86 = arith.constant dense<0.000000e+00> : vector<34x64xf32>
    %190 = tpu.matmul %187, %189, %cst_86 {dimension_numbers = #tpu.dot_dimension_numbers<[1], [0], [0], [1], [0, 0, 1, 1], [], []>} : vector<34x32xf32>, vector<32x64xf32>, vector<34x64xf32> -> vector<34x64xf32>
    %c0_87 = arith.constant 0 : index
    %c0_88 = arith.constant 0 : index
    %c0_89 = arith.constant 0 : index
    %191 = vector.load %arg15[%c0_87, %c0_88, %c0_89] : memref<2x1x64xf32, #tpu.memory_space<vmem>>, vector<1x1x64xf32>
    %192 = vector.shape_cast %191 : vector<1x1x64xf32> to vector<1x64xf32>
    %193 = vector.broadcast %192 : vector<1x64xf32> to vector<34x64xf32>
    %194 = arith.addf %190, %193 : vector<34x64xf32>
    %cst_90 = arith.constant 5.000000e-01 : f32
    %195 = vector.broadcast %cst_90 : f32 to vector<34x64xf32>
    %196 = arith.mulf %195, %194 : vector<34x64xf32>
    %cst_91 = arith.constant 0.707106769 : f32
    %197 = vector.broadcast %cst_91 : f32 to vector<34x64xf32>
    %198 = arith.mulf %194, %197 : vector<34x64xf32>
    %199 = math.absf %198 : vector<34x64xf32>
    %cst_92 = arith.constant 0.327591091 : f32
    %200 = vector.broadcast %cst_92 : f32 to vector<34x64xf32>
    %201 = arith.mulf %200, %199 : vector<34x64xf32>
    %cst_93 = arith.constant 1.000000e+00 : f32
    %202 = vector.broadcast %cst_93 : f32 to vector<34x64xf32>
    %203 = arith.addf %202, %201 : vector<34x64xf32>
    %cst_94 = arith.constant 1.000000e+00 : f32
    %204 = vector.broadcast %cst_94 : f32 to vector<34x64xf32>
    %205 = arith.divf %204, %203 : vector<34x64xf32>
    %cst_95 = arith.constant 1.06140542 : f32
    %206 = vector.broadcast %cst_95 : f32 to vector<34x64xf32>
    %207 = arith.mulf %206, %205 : vector<34x64xf32>
    %cst_96 = arith.constant -1.45315206 : f32
    %208 = vector.broadcast %cst_96 : f32 to vector<34x64xf32>
    %209 = arith.addf %207, %208 : vector<34x64xf32>
    %210 = arith.mulf %209, %205 : vector<34x64xf32>
    %cst_97 = arith.constant 1.42141378 : f32
    %211 = vector.broadcast %cst_97 : f32 to vector<34x64xf32>
    %212 = arith.addf %210, %211 : vector<34x64xf32>
    %213 = arith.mulf %212, %205 : vector<34x64xf32>
    %cst_98 = arith.constant -0.284496725 : f32
    %214 = vector.broadcast %cst_98 : f32 to vector<34x64xf32>
    %215 = arith.addf %213, %214 : vector<34x64xf32>
    %216 = arith.mulf %215, %205 : vector<34x64xf32>
    %cst_99 = arith.constant 0.254829586 : f32
    %217 = vector.broadcast %cst_99 : f32 to vector<34x64xf32>
    %218 = arith.addf %216, %217 : vector<34x64xf32>
    %219 = arith.mulf %218, %205 : vector<34x64xf32>
    %cst_100 = arith.constant 0.000000e+00 : f32
    %220 = vector.broadcast %cst_100 : f32 to vector<34x64xf32>
    %221 = arith.subf %220, %199 : vector<34x64xf32>
    %222 = arith.mulf %221, %199 : vector<34x64xf32>
    %223 = math.exp %222 : vector<34x64xf32>
    %224 = arith.mulf %219, %223 : vector<34x64xf32>
    %cst_101 = arith.constant 1.000000e+00 : f32
    %225 = vector.broadcast %cst_101 : f32 to vector<34x64xf32>
    %226 = arith.subf %225, %224 : vector<34x64xf32>
    %cst_102 = arith.constant 0.000000e+00 : f32
    %227 = vector.broadcast %cst_102 : f32 to vector<34x64xf32>
    %228 = arith.cmpf oge, %198, %227 : vector<34x64xf32>
    %cst_103 = arith.constant 0.000000e+00 : f32
    %229 = vector.broadcast %cst_103 : f32 to vector<34x64xf32>
    %230 = arith.subf %229, %226 : vector<34x64xf32>
    %231 = arith.select %228, %226, %230 : vector<34x64xi1>, vector<34x64xf32>
    %cst_104 = arith.constant 1.000000e+00 : f32
    %232 = vector.broadcast %cst_104 : f32 to vector<34x64xf32>
    %233 = arith.addf %232, %231 : vector<34x64xf32>
    %234 = arith.mulf %196, %233 : vector<34x64xf32>
    %c0_105 = arith.constant 0 : index
    %c0_106 = arith.constant 0 : index
    %c0_107 = arith.constant 0 : index
    %235 = vector.load %arg16[%c0_105, %c0_106, %c0_107] : memref<2x64x32xf32, #tpu.memory_space<vmem>>, vector<1x64x32xf32>
    %236 = vector.shape_cast %235 : vector<1x64x32xf32> to vector<64x32xf32>
    %cst_108 = arith.constant dense<0.000000e+00> : vector<34x32xf32>
    %237 = tpu.matmul %234, %236, %cst_108 {dimension_numbers = #tpu.dot_dimension_numbers<[1], [0], [0], [1], [0, 0, 1, 1], [], []>} : vector<34x64xf32>, vector<64x32xf32>, vector<34x32xf32> -> vector<34x32xf32>
    %c0_109 = arith.constant 0 : index
    %c0_110 = arith.constant 0 : index
    %c0_111 = arith.constant 0 : index
    %238 = vector.load %arg17[%c0_109, %c0_110, %c0_111] : memref<2x1x32xf32, #tpu.memory_space<vmem>>, vector<1x1x32xf32>
    %239 = vector.shape_cast %238 : vector<1x1x32xf32> to vector<1x32xf32>
    %240 = vector.broadcast %239 : vector<1x32xf32> to vector<34x32xf32>
    %241 = arith.addf %237, %240 : vector<34x32xf32>
    %242 = arith.addf %161, %241 : vector<34x32xf32>
    %c1_112 = arith.constant 1 : index
    %c0_113 = arith.constant 0 : index
    %c0_114 = arith.constant 0 : index
    %243 = vector.load %arg6[%c1_112, %c0_113, %c0_114] : memref<2x1x32xf32, #tpu.memory_space<vmem>>, vector<1x1x32xf32>
    %244 = vector.shape_cast %243 : vector<1x1x32xf32> to vector<1x32xf32>
    %c1_115 = arith.constant 1 : index
    %c0_116 = arith.constant 0 : index
    %c0_117 = arith.constant 0 : index
    %245 = vector.load %arg7[%c1_115, %c0_116, %c0_117] : memref<2x1x32xf32, #tpu.memory_space<vmem>>, vector<1x1x32xf32>
    %246 = vector.shape_cast %245 : vector<1x1x32xf32> to vector<1x32xf32>
    %cst_118 = arith.constant dense<0.000000e+00> : vector<34xf32>
    %247 = vector.multi_reduction <add>, %242, %cst_118 [1] : vector<34x32xf32> to vector<34xf32>
    %248 = vector.shape_cast %247 : vector<34xf32> to vector<34x1xf32>
    %cst_119 = arith.constant 3.200000e+01 : f32
    %249 = vector.broadcast %cst_119 : f32 to vector<34x1xf32>
    %250 = arith.divf %248, %249 : vector<34x1xf32>
    %251 = vector.broadcast %250 : vector<34x1xf32> to vector<34x32xf32>
    %252 = arith.subf %242, %251 : vector<34x32xf32>
    %253 = arith.mulf %252, %252 : vector<34x32xf32>
    %cst_120 = arith.constant dense<0.000000e+00> : vector<34xf32>
    %254 = vector.multi_reduction <add>, %253, %cst_120 [1] : vector<34x32xf32> to vector<34xf32>
    %255 = vector.shape_cast %254 : vector<34xf32> to vector<34x1xf32>
    %cst_121 = arith.constant 3.200000e+01 : f32
    %256 = vector.broadcast %cst_121 : f32 to vector<34x1xf32>
    %257 = arith.divf %255, %256 : vector<34x1xf32>
    %258 = vector.broadcast %250 : vector<34x1xf32> to vector<34x32xf32>
    %259 = arith.subf %242, %258 : vector<34x32xf32>
    %cst_122 = arith.constant 9.99999997E-7 : f32
    %260 = vector.broadcast %cst_122 : f32 to vector<34x1xf32>
    %261 = arith.addf %257, %260 : vector<34x1xf32>
    %262 = math.rsqrt %261 : vector<34x1xf32>
    %263 = vector.broadcast %262 : vector<34x1xf32> to vector<34x32xf32>
    %264 = arith.mulf %259, %263 : vector<34x32xf32>
    %265 = vector.broadcast %244 : vector<1x32xf32> to vector<34x32xf32>
    %266 = arith.mulf %264, %265 : vector<34x32xf32>
    %267 = vector.broadcast %246 : vector<1x32xf32> to vector<34x32xf32>
    %268 = arith.addf %266, %267 : vector<34x32xf32>
    %c1_123 = arith.constant 1 : index
    %c0_124 = arith.constant 0 : index
    %c0_125 = arith.constant 0 : index
    %269 = vector.load %arg8[%c1_123, %c0_124, %c0_125] : memref<2x32x96xf32, #tpu.memory_space<vmem>>, vector<1x32x96xf32>
    %270 = vector.shape_cast %269 : vector<1x32x96xf32> to vector<32x96xf32>
    %cst_126 = arith.constant dense<0.000000e+00> : vector<34x96xf32>
    %271 = tpu.matmul %268, %270, %cst_126 {dimension_numbers = #tpu.dot_dimension_numbers<[1], [0], [0], [1], [0, 0, 1, 1], [], []>} : vector<34x32xf32>, vector<32x96xf32>, vector<34x96xf32> -> vector<34x96xf32>
    %c1_127 = arith.constant 1 : index
    %c0_128 = arith.constant 0 : index
    %c0_129 = arith.constant 0 : index
    %272 = vector.load %arg9[%c1_127, %c0_128, %c0_129] : memref<2x1x96xf32, #tpu.memory_space<vmem>>, vector<1x1x96xf32>
    %273 = vector.shape_cast %272 : vector<1x1x96xf32> to vector<1x96xf32>
    %274 = vector.broadcast %273 : vector<1x96xf32> to vector<34x96xf32>
    %275 = arith.addf %271, %274 : vector<34x96xf32>
    %276 = vector.extract_strided_slice %275 {offsets = [0, 0], sizes = [34, 8], strides = [1, 1]} : vector<34x96xf32> to vector<34x8xf32>
    %cst_130 = arith.constant 0.353553385 : f32
    %277 = vector.broadcast %cst_130 : f32 to vector<34x8xf32>
    %278 = arith.mulf %276, %277 : vector<34x8xf32>
    %279 = vector.extract_strided_slice %275 {offsets = [0, 32], sizes = [34, 8], strides = [1, 1]} : vector<34x96xf32> to vector<34x8xf32>
    %280 = vector.extract_strided_slice %275 {offsets = [0, 64], sizes = [34, 8], strides = [1, 1]} : vector<34x96xf32> to vector<34x8xf32>
    %cst_131 = arith.constant dense<0.000000e+00> : vector<34x34xf32>
    %281 = tpu.matmul %278, %279, %cst_131 {dimension_numbers = #tpu.dot_dimension_numbers<[1], [1], [0], [0], [0, 0, 1, 0], [], []>} : vector<34x8xf32>, vector<34x8xf32>, vector<34x34xf32> -> vector<34x34xf32>
    %cst_132 = arith.constant -1.000000e+30 : f32
    %282 = vector.broadcast %cst_132 : f32 to vector<34x34xf32>
    %283 = arith.select %43, %281, %282 : vector<34x34xi1>, vector<34x34xf32>
    %cst_133 = arith.constant dense<0xFF800000> : vector<34xf32>
    %284 = vector.multi_reduction <maximumf>, %283, %cst_133 [1] : vector<34x34xf32> to vector<34xf32>
    %285 = vector.shape_cast %284 : vector<34xf32> to vector<34x1xf32>
    %286 = vector.broadcast %285 : vector<34x1xf32> to vector<34x34xf32>
    %287 = arith.subf %283, %286 : vector<34x34xf32>
    %288 = math.exp %287 : vector<34x34xf32>
    %cst_134 = arith.constant dense<0.000000e+00> : vector<34xf32>
    %289 = vector.multi_reduction <add>, %288, %cst_134 [1] : vector<34x34xf32> to vector<34xf32>
    %290 = vector.shape_cast %289 : vector<34xf32> to vector<34x1xf32>
    %291 = tpu.reciprocal %290 {approx = true} : vector<34x1xf32> -> vector<34x1xf32>
    %292 = vector.broadcast %291 : vector<34x1xf32> to vector<34x34xf32>
    %293 = arith.mulf %288, %292 : vector<34x34xf32>
    %cst_135 = arith.constant dense<0.000000e+00> : vector<34x8xf32>
    %294 = tpu.matmul %293, %280, %cst_135 {dimension_numbers = #tpu.dot_dimension_numbers<[1], [0], [0], [1], [0, 0, 1, 1], [], []>} : vector<34x34xf32>, vector<34x8xf32>, vector<34x8xf32> -> vector<34x8xf32>
    %295 = vector.extract_strided_slice %275 {offsets = [0, 8], sizes = [34, 8], strides = [1, 1]} : vector<34x96xf32> to vector<34x8xf32>
    %cst_136 = arith.constant 0.353553385 : f32
    %296 = vector.broadcast %cst_136 : f32 to vector<34x8xf32>
    %297 = arith.mulf %295, %296 : vector<34x8xf32>
    %298 = vector.extract_strided_slice %275 {offsets = [0, 40], sizes = [34, 8], strides = [1, 1]} : vector<34x96xf32> to vector<34x8xf32>
    %299 = vector.extract_strided_slice %275 {offsets = [0, 72], sizes = [34, 8], strides = [1, 1]} : vector<34x96xf32> to vector<34x8xf32>
    %cst_137 = arith.constant dense<0.000000e+00> : vector<34x34xf32>
    %300 = tpu.matmul %297, %298, %cst_137 {dimension_numbers = #tpu.dot_dimension_numbers<[1], [1], [0], [0], [0, 0, 1, 0], [], []>} : vector<34x8xf32>, vector<34x8xf32>, vector<34x34xf32> -> vector<34x34xf32>
    %cst_138 = arith.constant -1.000000e+30 : f32
    %301 = vector.broadcast %cst_138 : f32 to vector<34x34xf32>
    %302 = arith.select %43, %300, %301 : vector<34x34xi1>, vector<34x34xf32>
    %cst_139 = arith.constant dense<0xFF800000> : vector<34xf32>
    %303 = vector.multi_reduction <maximumf>, %302, %cst_139 [1] : vector<34x34xf32> to vector<34xf32>
    %304 = vector.shape_cast %303 : vector<34xf32> to vector<34x1xf32>
    %305 = vector.broadcast %304 : vector<34x1xf32> to vector<34x34xf32>
    %306 = arith.subf %302, %305 : vector<34x34xf32>
    %307 = math.exp %306 : vector<34x34xf32>
    %cst_140 = arith.constant dense<0.000000e+00> : vector<34xf32>
    %308 = vector.multi_reduction <add>, %307, %cst_140 [1] : vector<34x34xf32> to vector<34xf32>
    %309 = vector.shape_cast %308 : vector<34xf32> to vector<34x1xf32>
    %310 = tpu.reciprocal %309 {approx = true} : vector<34x1xf32> -> vector<34x1xf32>
    %311 = vector.broadcast %310 : vector<34x1xf32> to vector<34x34xf32>
    %312 = arith.mulf %307, %311 : vector<34x34xf32>
    %cst_141 = arith.constant dense<0.000000e+00> : vector<34x8xf32>
    %313 = tpu.matmul %312, %299, %cst_141 {dimension_numbers = #tpu.dot_dimension_numbers<[1], [0], [0], [1], [0, 0, 1, 1], [], []>} : vector<34x34xf32>, vector<34x8xf32>, vector<34x8xf32> -> vector<34x8xf32>
    %314 = vector.extract_strided_slice %275 {offsets = [0, 16], sizes = [34, 8], strides = [1, 1]} : vector<34x96xf32> to vector<34x8xf32>
    %cst_142 = arith.constant 0.353553385 : f32
    %315 = vector.broadcast %cst_142 : f32 to vector<34x8xf32>
    %316 = arith.mulf %314, %315 : vector<34x8xf32>
    %317 = vector.extract_strided_slice %275 {offsets = [0, 48], sizes = [34, 8], strides = [1, 1]} : vector<34x96xf32> to vector<34x8xf32>
    %318 = vector.extract_strided_slice %275 {offsets = [0, 80], sizes = [34, 8], strides = [1, 1]} : vector<34x96xf32> to vector<34x8xf32>
    %cst_143 = arith.constant dense<0.000000e+00> : vector<34x34xf32>
    %319 = tpu.matmul %316, %317, %cst_143 {dimension_numbers = #tpu.dot_dimension_numbers<[1], [1], [0], [0], [0, 0, 1, 0], [], []>} : vector<34x8xf32>, vector<34x8xf32>, vector<34x34xf32> -> vector<34x34xf32>
    %cst_144 = arith.constant -1.000000e+30 : f32
    %320 = vector.broadcast %cst_144 : f32 to vector<34x34xf32>
    %321 = arith.select %43, %319, %320 : vector<34x34xi1>, vector<34x34xf32>
    %cst_145 = arith.constant dense<0xFF800000> : vector<34xf32>
    %322 = vector.multi_reduction <maximumf>, %321, %cst_145 [1] : vector<34x34xf32> to vector<34xf32>
    %323 = vector.shape_cast %322 : vector<34xf32> to vector<34x1xf32>
    %324 = vector.broadcast %323 : vector<34x1xf32> to vector<34x34xf32>
    %325 = arith.subf %321, %324 : vector<34x34xf32>
    %326 = math.exp %325 : vector<34x34xf32>
    %cst_146 = arith.constant dense<0.000000e+00> : vector<34xf32>
    %327 = vector.multi_reduction <add>, %326, %cst_146 [1] : vector<34x34xf32> to vector<34xf32>
    %328 = vector.shape_cast %327 : vector<34xf32> to vector<34x1xf32>
    %329 = tpu.reciprocal %328 {approx = true} : vector<34x1xf32> -> vector<34x1xf32>
    %330 = vector.broadcast %329 : vector<34x1xf32> to vector<34x34xf32>
    %331 = arith.mulf %326, %330 : vector<34x34xf32>
    %cst_147 = arith.constant dense<0.000000e+00> : vector<34x8xf32>
    %332 = tpu.matmul %331, %318, %cst_147 {dimension_numbers = #tpu.dot_dimension_numbers<[1], [0], [0], [1], [0, 0, 1, 1], [], []>} : vector<34x34xf32>, vector<34x8xf32>, vector<34x8xf32> -> vector<34x8xf32>
    %333 = vector.extract_strided_slice %275 {offsets = [0, 24], sizes = [34, 8], strides = [1, 1]} : vector<34x96xf32> to vector<34x8xf32>
    %cst_148 = arith.constant 0.353553385 : f32
    %334 = vector.broadcast %cst_148 : f32 to vector<34x8xf32>
    %335 = arith.mulf %333, %334 : vector<34x8xf32>
    %336 = vector.extract_strided_slice %275 {offsets = [0, 56], sizes = [34, 8], strides = [1, 1]} : vector<34x96xf32> to vector<34x8xf32>
    %337 = vector.extract_strided_slice %275 {offsets = [0, 88], sizes = [34, 8], strides = [1, 1]} : vector<34x96xf32> to vector<34x8xf32>
    %cst_149 = arith.constant dense<0.000000e+00> : vector<34x34xf32>
    %338 = tpu.matmul %335, %336, %cst_149 {dimension_numbers = #tpu.dot_dimension_numbers<[1], [1], [0], [0], [0, 0, 1, 0], [], []>} : vector<34x8xf32>, vector<34x8xf32>, vector<34x34xf32> -> vector<34x34xf32>
    %cst_150 = arith.constant -1.000000e+30 : f32
    %339 = vector.broadcast %cst_150 : f32 to vector<34x34xf32>
    %340 = arith.select %43, %338, %339 : vector<34x34xi1>, vector<34x34xf32>
    %cst_151 = arith.constant dense<0xFF800000> : vector<34xf32>
    %341 = vector.multi_reduction <maximumf>, %340, %cst_151 [1] : vector<34x34xf32> to vector<34xf32>
    %342 = vector.shape_cast %341 : vector<34xf32> to vector<34x1xf32>
    %343 = vector.broadcast %342 : vector<34x1xf32> to vector<34x34xf32>
    %344 = arith.subf %340, %343 : vector<34x34xf32>
    %345 = math.exp %344 : vector<34x34xf32>
    %cst_152 = arith.constant dense<0.000000e+00> : vector<34xf32>
    %346 = vector.multi_reduction <add>, %345, %cst_152 [1] : vector<34x34xf32> to vector<34xf32>
    %347 = vector.shape_cast %346 : vector<34xf32> to vector<34x1xf32>
    %348 = tpu.reciprocal %347 {approx = true} : vector<34x1xf32> -> vector<34x1xf32>
    %349 = vector.broadcast %348 : vector<34x1xf32> to vector<34x34xf32>
    %350 = arith.mulf %345, %349 : vector<34x34xf32>
    %cst_153 = arith.constant dense<0.000000e+00> : vector<34x8xf32>
    %351 = tpu.matmul %350, %337, %cst_153 {dimension_numbers = #tpu.dot_dimension_numbers<[1], [0], [0], [1], [0, 0, 1, 1], [], []>} : vector<34x34xf32>, vector<34x8xf32>, vector<34x8xf32> -> vector<34x8xf32>
    %352 = tpu.concatenate %294, %313, %332, %351 in 1 : vector<34x8xf32>, vector<34x8xf32>, vector<34x8xf32>, vector<34x8xf32> -> vector<34x32xf32>
    %c1_154 = arith.constant 1 : index
    %c0_155 = arith.constant 0 : index
    %c0_156 = arith.constant 0 : index
    %353 = vector.load %arg10[%c1_154, %c0_155, %c0_156] : memref<2x32x32xf32, #tpu.memory_space<vmem>>, vector<1x32x32xf32>
    %354 = vector.shape_cast %353 : vector<1x32x32xf32> to vector<32x32xf32>
    %cst_157 = arith.constant dense<0.000000e+00> : vector<34x32xf32>
    %355 = tpu.matmul %352, %354, %cst_157 {dimension_numbers = #tpu.dot_dimension_numbers<[1], [0], [0], [1], [0, 0, 1, 1], [], []>} : vector<34x32xf32>, vector<32x32xf32>, vector<34x32xf32> -> vector<34x32xf32>
    %c1_158 = arith.constant 1 : index
    %c0_159 = arith.constant 0 : index
    %c0_160 = arith.constant 0 : index
    %356 = vector.load %arg11[%c1_158, %c0_159, %c0_160] : memref<2x1x32xf32, #tpu.memory_space<vmem>>, vector<1x1x32xf32>
    %357 = vector.shape_cast %356 : vector<1x1x32xf32> to vector<1x32xf32>
    %358 = vector.broadcast %357 : vector<1x32xf32> to vector<34x32xf32>
    %359 = arith.addf %355, %358 : vector<34x32xf32>
    %360 = arith.addf %242, %359 : vector<34x32xf32>
    %c1_161 = arith.constant 1 : index
    %c0_162 = arith.constant 0 : index
    %c0_163 = arith.constant 0 : index
    %361 = vector.load %arg12[%c1_161, %c0_162, %c0_163] : memref<2x1x32xf32, #tpu.memory_space<vmem>>, vector<1x1x32xf32>
    %362 = vector.shape_cast %361 : vector<1x1x32xf32> to vector<1x32xf32>
    %c1_164 = arith.constant 1 : index
    %c0_165 = arith.constant 0 : index
    %c0_166 = arith.constant 0 : index
    %363 = vector.load %arg13[%c1_164, %c0_165, %c0_166] : memref<2x1x32xf32, #tpu.memory_space<vmem>>, vector<1x1x32xf32>
    %364 = vector.shape_cast %363 : vector<1x1x32xf32> to vector<1x32xf32>
    %cst_167 = arith.constant dense<0.000000e+00> : vector<34xf32>
    %365 = vector.multi_reduction <add>, %360, %cst_167 [1] : vector<34x32xf32> to vector<34xf32>
    %366 = vector.shape_cast %365 : vector<34xf32> to vector<34x1xf32>
    %cst_168 = arith.constant 3.200000e+01 : f32
    %367 = vector.broadcast %cst_168 : f32 to vector<34x1xf32>
    %368 = arith.divf %366, %367 : vector<34x1xf32>
    %369 = vector.broadcast %368 : vector<34x1xf32> to vector<34x32xf32>
    %370 = arith.subf %360, %369 : vector<34x32xf32>
    %371 = arith.mulf %370, %370 : vector<34x32xf32>
    %cst_169 = arith.constant dense<0.000000e+00> : vector<34xf32>
    %372 = vector.multi_reduction <add>, %371, %cst_169 [1] : vector<34x32xf32> to vector<34xf32>
    %373 = vector.shape_cast %372 : vector<34xf32> to vector<34x1xf32>
    %cst_170 = arith.constant 3.200000e+01 : f32
    %374 = vector.broadcast %cst_170 : f32 to vector<34x1xf32>
    %375 = arith.divf %373, %374 : vector<34x1xf32>
    %376 = vector.broadcast %368 : vector<34x1xf32> to vector<34x32xf32>
    %377 = arith.subf %360, %376 : vector<34x32xf32>
    %cst_171 = arith.constant 9.99999997E-7 : f32
    %378 = vector.broadcast %cst_171 : f32 to vector<34x1xf32>
    %379 = arith.addf %375, %378 : vector<34x1xf32>
    %380 = math.rsqrt %379 : vector<34x1xf32>
    %381 = vector.broadcast %380 : vector<34x1xf32> to vector<34x32xf32>
    %382 = arith.mulf %377, %381 : vector<34x32xf32>
    %383 = vector.broadcast %362 : vector<1x32xf32> to vector<34x32xf32>
    %384 = arith.mulf %382, %383 : vector<34x32xf32>
    %385 = vector.broadcast %364 : vector<1x32xf32> to vector<34x32xf32>
    %386 = arith.addf %384, %385 : vector<34x32xf32>
    %c1_172 = arith.constant 1 : index
    %c0_173 = arith.constant 0 : index
    %c0_174 = arith.constant 0 : index
    %387 = vector.load %arg14[%c1_172, %c0_173, %c0_174] : memref<2x32x64xf32, #tpu.memory_space<vmem>>, vector<1x32x64xf32>
    %388 = vector.shape_cast %387 : vector<1x32x64xf32> to vector<32x64xf32>
    %cst_175 = arith.constant dense<0.000000e+00> : vector<34x64xf32>
    %389 = tpu.matmul %386, %388, %cst_175 {dimension_numbers = #tpu.dot_dimension_numbers<[1], [0], [0], [1], [0, 0, 1, 1], [], []>} : vector<34x32xf32>, vector<32x64xf32>, vector<34x64xf32> -> vector<34x64xf32>
    %c1_176 = arith.constant 1 : index
    %c0_177 = arith.constant 0 : index
    %c0_178 = arith.constant 0 : index
    %390 = vector.load %arg15[%c1_176, %c0_177, %c0_178] : memref<2x1x64xf32, #tpu.memory_space<vmem>>, vector<1x1x64xf32>
    %391 = vector.shape_cast %390 : vector<1x1x64xf32> to vector<1x64xf32>
    %392 = vector.broadcast %391 : vector<1x64xf32> to vector<34x64xf32>
    %393 = arith.addf %389, %392 : vector<34x64xf32>
    %cst_179 = arith.constant 5.000000e-01 : f32
    %394 = vector.broadcast %cst_179 : f32 to vector<34x64xf32>
    %395 = arith.mulf %394, %393 : vector<34x64xf32>
    %cst_180 = arith.constant 0.707106769 : f32
    %396 = vector.broadcast %cst_180 : f32 to vector<34x64xf32>
    %397 = arith.mulf %393, %396 : vector<34x64xf32>
    %398 = math.absf %397 : vector<34x64xf32>
    %cst_181 = arith.constant 0.327591091 : f32
    %399 = vector.broadcast %cst_181 : f32 to vector<34x64xf32>
    %400 = arith.mulf %399, %398 : vector<34x64xf32>
    %cst_182 = arith.constant 1.000000e+00 : f32
    %401 = vector.broadcast %cst_182 : f32 to vector<34x64xf32>
    %402 = arith.addf %401, %400 : vector<34x64xf32>
    %cst_183 = arith.constant 1.000000e+00 : f32
    %403 = vector.broadcast %cst_183 : f32 to vector<34x64xf32>
    %404 = arith.divf %403, %402 : vector<34x64xf32>
    %cst_184 = arith.constant 1.06140542 : f32
    %405 = vector.broadcast %cst_184 : f32 to vector<34x64xf32>
    %406 = arith.mulf %405, %404 : vector<34x64xf32>
    %cst_185 = arith.constant -1.45315206 : f32
    %407 = vector.broadcast %cst_185 : f32 to vector<34x64xf32>
    %408 = arith.addf %406, %407 : vector<34x64xf32>
    %409 = arith.mulf %408, %404 : vector<34x64xf32>
    %cst_186 = arith.constant 1.42141378 : f32
    %410 = vector.broadcast %cst_186 : f32 to vector<34x64xf32>
    %411 = arith.addf %409, %410 : vector<34x64xf32>
    %412 = arith.mulf %411, %404 : vector<34x64xf32>
    %cst_187 = arith.constant -0.284496725 : f32
    %413 = vector.broadcast %cst_187 : f32 to vector<34x64xf32>
    %414 = arith.addf %412, %413 : vector<34x64xf32>
    %415 = arith.mulf %414, %404 : vector<34x64xf32>
    %cst_188 = arith.constant 0.254829586 : f32
    %416 = vector.broadcast %cst_188 : f32 to vector<34x64xf32>
    %417 = arith.addf %415, %416 : vector<34x64xf32>
    %418 = arith.mulf %417, %404 : vector<34x64xf32>
    %cst_189 = arith.constant 0.000000e+00 : f32
    %419 = vector.broadcast %cst_189 : f32 to vector<34x64xf32>
    %420 = arith.subf %419, %398 : vector<34x64xf32>
    %421 = arith.mulf %420, %398 : vector<34x64xf32>
    %422 = math.exp %421 : vector<34x64xf32>
    %423 = arith.mulf %418, %422 : vector<34x64xf32>
    %cst_190 = arith.constant 1.000000e+00 : f32
    %424 = vector.broadcast %cst_190 : f32 to vector<34x64xf32>
    %425 = arith.subf %424, %423 : vector<34x64xf32>
    %cst_191 = arith.constant 0.000000e+00 : f32
    %426 = vector.broadcast %cst_191 : f32 to vector<34x64xf32>
    %427 = arith.cmpf oge, %397, %426 : vector<34x64xf32>
    %cst_192 = arith.constant 0.000000e+00 : f32
    %428 = vector.broadcast %cst_192 : f32 to vector<34x64xf32>
    %429 = arith.subf %428, %425 : vector<34x64xf32>
    %430 = arith.select %427, %425, %429 : vector<34x64xi1>, vector<34x64xf32>
    %cst_193 = arith.constant 1.000000e+00 : f32
    %431 = vector.broadcast %cst_193 : f32 to vector<34x64xf32>
    %432 = arith.addf %431, %430 : vector<34x64xf32>
    %433 = arith.mulf %395, %432 : vector<34x64xf32>
    %c1_194 = arith.constant 1 : index
    %c0_195 = arith.constant 0 : index
    %c0_196 = arith.constant 0 : index
    %434 = vector.load %arg16[%c1_194, %c0_195, %c0_196] : memref<2x64x32xf32, #tpu.memory_space<vmem>>, vector<1x64x32xf32>
    %435 = vector.shape_cast %434 : vector<1x64x32xf32> to vector<64x32xf32>
    %cst_197 = arith.constant dense<0.000000e+00> : vector<34x32xf32>
    %436 = tpu.matmul %433, %435, %cst_197 {dimension_numbers = #tpu.dot_dimension_numbers<[1], [0], [0], [1], [0, 0, 1, 1], [], []>} : vector<34x64xf32>, vector<64x32xf32>, vector<34x32xf32> -> vector<34x32xf32>
    %c1_198 = arith.constant 1 : index
    %c0_199 = arith.constant 0 : index
    %c0_200 = arith.constant 0 : index
    %437 = vector.load %arg17[%c1_198, %c0_199, %c0_200] : memref<2x1x32xf32, #tpu.memory_space<vmem>>, vector<1x1x32xf32>
    %438 = vector.shape_cast %437 : vector<1x1x32xf32> to vector<1x32xf32>
    %439 = vector.broadcast %438 : vector<1x32xf32> to vector<34x32xf32>
    %440 = arith.addf %436, %439 : vector<34x32xf32>
    %441 = arith.addf %360, %440 : vector<34x32xf32>
    %c0_201 = arith.constant 0 : index
    %c0_202 = arith.constant 0 : index
    %442 = vector.load %arg18[%c0_201, %c0_202] : memref<1x32xf32, #tpu.memory_space<vmem>>, vector<1x32xf32>
    %c0_203 = arith.constant 0 : index
    %c0_204 = arith.constant 0 : index
    %443 = vector.load %arg19[%c0_203, %c0_204] : memref<1x32xf32, #tpu.memory_space<vmem>>, vector<1x32xf32>
    %cst_205 = arith.constant dense<0.000000e+00> : vector<34xf32>
    %444 = vector.multi_reduction <add>, %441, %cst_205 [1] : vector<34x32xf32> to vector<34xf32>
    %445 = vector.shape_cast %444 : vector<34xf32> to vector<34x1xf32>
    %cst_206 = arith.constant 3.200000e+01 : f32
    %446 = vector.broadcast %cst_206 : f32 to vector<34x1xf32>
    %447 = arith.divf %445, %446 : vector<34x1xf32>
    %448 = vector.broadcast %447 : vector<34x1xf32> to vector<34x32xf32>
    %449 = arith.subf %441, %448 : vector<34x32xf32>
    %450 = arith.mulf %449, %449 : vector<34x32xf32>
    %cst_207 = arith.constant dense<0.000000e+00> : vector<34xf32>
    %451 = vector.multi_reduction <add>, %450, %cst_207 [1] : vector<34x32xf32> to vector<34xf32>
    %452 = vector.shape_cast %451 : vector<34xf32> to vector<34x1xf32>
    %cst_208 = arith.constant 3.200000e+01 : f32
    %453 = vector.broadcast %cst_208 : f32 to vector<34x1xf32>
    %454 = arith.divf %452, %453 : vector<34x1xf32>
    %455 = vector.broadcast %447 : vector<34x1xf32> to vector<34x32xf32>
    %456 = arith.subf %441, %455 : vector<34x32xf32>
    %cst_209 = arith.constant 9.99999997E-7 : f32
    %457 = vector.broadcast %cst_209 : f32 to vector<34x1xf32>
    %458 = arith.addf %454, %457 : vector<34x1xf32>
    %459 = math.rsqrt %458 : vector<34x1xf32>
    %460 = vector.broadcast %459 : vector<34x1xf32> to vector<34x32xf32>
    %461 = arith.mulf %456, %460 : vector<34x32xf32>
    %462 = vector.broadcast %442 : vector<1x32xf32> to vector<34x32xf32>
    %463 = arith.mulf %461, %462 : vector<34x32xf32>
    %464 = vector.broadcast %443 : vector<1x32xf32> to vector<34x32xf32>
    %465 = arith.addf %463, %464 : vector<34x32xf32>
    %c0_210 = arith.constant 0 : index
    %c0_211 = arith.constant 0 : index
    %466 = vector.load %arg20[%c0_210, %c0_211] : memref<32x1xf32, #tpu.memory_space<vmem>>, vector<32x1xf32>
    %cst_212 = arith.constant dense<0.000000e+00> : vector<34x1xf32>
    %467 = tpu.matmul %465, %466, %cst_212 {dimension_numbers = #tpu.dot_dimension_numbers<[1], [0], [0], [1], [0, 0, 1, 1], [], []>} : vector<34x32xf32>, vector<32x1xf32>, vector<34x1xf32> -> vector<34x1xf32>
    %c0_213 = arith.constant 0 : index
    %c0_214 = arith.constant 0 : index
    %468 = vector.load %arg21[%c0_213, %c0_214] : memref<1x1xf32, #tpu.memory_space<vmem>>, vector<1x1xf32>
    %469 = vector.broadcast %468 : vector<1x1xf32> to vector<34x1xf32>
    %470 = arith.addf %467, %469 : vector<34x1xf32>
    %471 = vector.extract_strided_slice %470 {offsets = [0, 0], sizes = [1, 1], strides = [1, 1]} : vector<34x1xf32> to vector<1x1xf32>
    %c0_215 = arith.constant 0 : index
    %c0_216 = arith.constant 0 : index
    %472 = vector.load %arg22[%c0_215, %c0_216] : memref<2x1xf32, #tpu.memory_space<vmem>>, vector<1x1xf32>
    tpu.vector_store %arg22[%c0_215, %c0_216], %471 {strides = array<i32>} : memref<2x1xf32, #tpu.memory_space<vmem>>, vector<1x1xf32>,
    %473 = vector.extract_strided_slice %470 {offsets = [17, 0], sizes = [1, 1], strides = [1, 1]} : vector<34x1xf32> to vector<1x1xf32>
    %c1_217 = arith.constant 1 : index
    %c0_218 = arith.constant 0 : index
    %474 = vector.load %arg22[%c1_217, %c0_218] : memref<2x1xf32, #tpu.memory_space<vmem>>, vector<1x1xf32>
    tpu.vector_store %arg22[%c1_217, %c0_218], %473 {strides = array<i32>} : memref<2x1xf32, #tpu.memory_space<vmem>>, vector<1x1xf32>,
    return
  }
}

</mosaic_0001>

<bundles_post_ra>
// kernel: vit_forward.1
= control target key start
LH: loop header
LB: loop body
LE: loop exit
PB: predicated region body
PF: predicated region fallthrough
CT: control target
= control target key end

     0   :  { %vm86_vm0 = vcmask 130048   ;;  %vm189_vm1 = vcmask 253952   ;;  %vm193_vm2 = vcmask 261120   ;;  %vm279_vm3 = vcmask 254976   ;;  %s6112_s27 = smov 88   ;;  %s6115_s30 = smov 112   ;;  %s8257_s1 = inlined_call_operand.vmem [shape: f32[16,32], index: 1, kind: input, shape index: {}]   ;;  %s8258_s0 = inlined_call_operand.vmem [shape: f32[32,16], index: 0, kind: input, shape index: {}]   ;;  %s8259_s3 = inlined_call_operand.vmem [shape: f32[1,32], index: 3, kind: input, shape index: {}]   ;;  %s8260_s4 = inlined_call_operand.vmem [shape: f32[1,32], index: 4, kind: input, shape index: {}]   ;;  %s8261_s2 = inlined_call_operand.vmem [shape: f32[1,32], index: 2, kind: input, shape index: {}]   ;;  %s8262_s5 = inlined_call_operand.vmem [shape: f32[16,32], index: 5, kind: input, shape index: {}]   ;;  %s8263_s8 = inlined_call_operand.vmem [shape: f32[2,32,96], index: 8, kind: input, shape index: {}]   ;;  %s8264_s6 = inlined_call_operand.vmem [shape: f32[2,1,32], index: 6, kind: input, shape index: {}]   ;;  %s8265_s7 = inlined_call_operand.vmem [shape: f32[2,1,32], index: 7, kind: input, shape index: {}]   ;;  %s8266_s9 = inlined_call_operand.vmem [shape: f32[2,1,96], index: 9, kind: input, shape index: {}]   ;;  %s8267_s10 = inlined_call_operand.vmem [shape: f32[2,32,32], index: 10, kind: input, shape index: {}]   ;;  %s8268_s11 = inlined_call_operand.vmem [shape: f32[2,1,32], index: 11, kind: input, shape index: {}]   ;;  %s8269_s14 = inlined_call_operand.vmem [shape: f32[2,32,64], index: 14, kind: input, shape index: {}]   ;;  %s8270_s12 = inlined_call_operand.vmem [shape: f32[2,1,32], index: 12, kind: input, shape index: {}]   ;;  %s8271_s13 = inlined_call_operand.vmem [shape: f32[2,1,32], index: 13, kind: input, shape index: {}]   ;;  %s8272_s16 = inlined_call_operand.vmem [shape: f32[2,64,32], index: 16, kind: input, shape index: {}]   ;;  %s8273_s15 = inlined_call_operand.vmem [shape: f32[2,1,64], index: 15, kind: input, shape index: {}]   ;;  %s8274_s17 = inlined_call_operand.vmem [shape: f32[2,1,32], index: 17, kind: input, shape index: {}]   ;;  %s8275_s20 = inlined_call_operand.vmem [shape: f32[32,1], index: 20, kind: input, shape index: {}]   ;;  %s8276_s21 = inlined_call_operand.<no memory space> [shape: f32[1,1], index: 21, kind: input, shape index: {}]   ;;  %s8277_s18 = inlined_call_operand.vmem [shape: f32[1,32], index: 18, kind: input, shape index: {}]   ;;  %s8278_s19 = inlined_call_operand.vmem [shape: f32[1,32], index: 19, kind: input, shape index: {}]   ;;  %s8279_s22 = inlined_call_operand.vmem [shape: f32[2,1], index: 22, kind: output, shape index: {}]  }
   0x1   :  { %8300 = sst [smem:[#allocation4_spill]] %s8257_s1  ;;  %v6109_v59 = vmov 0.0   ;;  %vm6110_vm4 = vmmov 0   ;;  %s8292_s1 = smov 104   ;;  %vm492_vm5 = vcmask 64512   ;;  %vm699_vm6 = vcmask 1041408  }
   0x2   :  { %8301 = sst [smem:[#allocation5_spill]] %s8258_s0  ;;  %5215 = vmatprep.subr.mxu1 %v6109_v59  ;;  %5223 = vmatprep.mubr.msk.f32.mxu1 %vm6110_vm4, %v6109_v59  ;;  %s8290_s23 = smov 64   ;;  %vm613_vm10 = vcmask 277504  }
   0x3   :  { %8302 = sst [smem:[#allocation6_spill]] %s8259_s3  ;;  %s6111_s3 = smov 96  }
   0x4   :  { %8303 = sst [smem:[#allocation7_spill]] %s8260_s4  ;;  %s8284_s24 = smov 40  }
   0x5   :  { %8304 = sst [smem:[#allocation8_spill]] %s8261_s2 }
   0x6   :  { %8305 = sst [smem:[#allocation9_spill]] %s8262_s5 }
   0x7   :  { %8306 = sst [smem:[#allocation10_spill]] %s8263_s8 }
   0x8   :  { %s8307_s29 = sld [smem:[#allocation4_spill]] }
   0x9   :  { %s8308_s0 = sld [smem:[#allocation5_spill]] }
   0xa   :  { %s8309_s28 = sld [smem:[#allocation6_spill]] }
   0xb   :  { %s8310_s2 = sld [smem:[#allocation7_spill]] }
   0xc   :  { %s8311_s5 = sld [smem:[#allocation8_spill]] }
   0xd   :  { %s8312_s8 = sld [smem:[#allocation9_spill]] }
   0xe   :  { %v78_v0 = vld [vmem:[%s8307_s29 + $0x8] sm:$0xff]  ;;  %v77_v1 = vld [vmem:[%s8307_s29] sm:$0xff]  ;;  %s8313_s4 = sld [smem:[#allocation10_spill]]  ;;  %s6114_s29 = smov 80  }
   0xf   :  { %v73_v2 = vld [vmem:[%s8308_s0] sm:$0xff]  ;;  %5205 = vmatprep.subr.mxu0 %v78_v0  ;;  %v74_v3 = vld [vmem:[%s8308_s0 + $0x8] sm:$0xff]  ;;  %v75_v4 = vld [vmem:[%s8308_s0 + $0x10] sm:$0xff] }
  0x10   :  { %5209 = vmatprep.mubr.msk.f32.mxu0 %vm86_vm0, %v73_v2  ;;  %5206 = vmatpush3.msra.mxu0 %v78_v0  ;;  %v76_v5 = vld [vmem:[%s8308_s0 + $0x18] sm:$0xff]  ;;  %v184_v6 = vld [vmem:[%s8309_s28] sm:$0x1]  ;;  %s6113_s28 = smov 120   ;;  %s8286_s0 = smov 48  }
  0x11   :  { %5207 = vmatprep.subr.mxu0 %v77_v1  ;;  %v185_v7 = vld [vmem:[%s8310_s2] sm:$0x1]  ;;  %s6116_s2 = smov 72  }
  0x12   :  { %5208 = vmatpush3.msra.mxu0 %v77_v1  ;;  %v186_v8 = vadd.f32 %v185_v7, %v184_v6  ;;  %v4725_v9 = vld [vmem:[%s8311_s5] ss:$0 sm:$0xff]  ;;  %s8288_s5 = smov 56  }
  0x13   :  { %5210 = vmatmul.mubr.msk.f32.vlgmr.msra.gmra.mxu0 %vm86_vm0, %v74_v3  ;;  %v188_v11 = vld [vmem:[%s8312_s8 + $0x8] sm:$0xff]  ;;  %v187_v14 = vld [vmem:[%s8312_s8] sm:$0xff]  ;;  %5238 = vmatprep.subr.mxu0 %v6109_v59  ;;  %s8298_s8 = smov 8  }
  0x14   :  { %5212 = vmatprep.mubr.msk.f32.mxu0 %vm86_vm0, %v75_v4  ;;  %190 = vst.msk [vmem:[#allocation2] sm:$0x1] %vm189_vm1, %v186_v8  ;;  %196 = vst.msk [vmem:[#allocation2 + $0x11] sm:$0x1] %vm189_vm1, %v186_v8  ;;  %v359_v60 = vld [vmem:[%s8313_s4 + $0x18] sm:$0xff]  ;;  %v358_v61 = vld [vmem:[%s8313_s4 + $0x10] sm:$0xff] }
  0x15   :  { %5216 = vmatpush3.msra.mxu1 %v359_v60  ;;  %v357_v62 = vld [vmem:[%s8313_s4 + $0x8] sm:$0xff]  ;;  %v356_v63 = vld [vmem:[%s8313_s4] sm:$0xff] }
  0x16   :  { %5217 = vmatprep.subr.mxu1 %v6109_v59 }
  0x17   :  { %5213 = vmatmul.mubr.msk.f32.gmra.mxu0 %vm86_vm0, %v76_v5  ;;  %5218 = vmatpush3.msra.mxu1 %v358_v61 }
  0x18   :  { %5248 = vmatprep.mubr.msk.f32.mxu0 %vm6110_vm4, %v6109_v59  ;;  %5219 = vmatprep.subr.mxu1 %v6109_v59 }
  0x19   :  { %5220 = vmatpush3.msra.mxu1 %v357_v62 }
  0x1a   :  { %5221 = vmatprep.subr.mxu1 %v6109_v59 }
  0x1b   :  { %5222 = vmatpush3.msra.mxu1 %v356_v63 }
  0x1c   :  { %5263 = vmatprep.subr.mxu1 %v6109_v59 }
  0xd3   :  { %v5211_v10 = vpop.f32.mrf.mxu0 }
  0xd4   :  { %v171_v12 = vadd.f32 %v5211_v10, %v4725_v9 }
  0xd5   :  { %v165_v13 = vpop.f32.mrf.mxu0 }
  0xd6   :  { %v192_v15 = vadd.f32 %v188_v11, %v171_v12  ;;  %v166_v16 = vadd.f32 %v4725_v9, %v165_v13 }
  0xd7   :  { %v5214_v17 = vpop.f32.mrf.mxu0 }
  0xd8   :  { %195 = vst.msk [vmem:[#allocation2 + $0x9] sm:$0xff] %vm193_vm2, %v192_v15  ;;  %v191_v18 = vadd.f32 %v187_v14, %v166_v16  ;;  %v181_v19 = vadd.f32 %v5214_v17, %v4725_v9  ;;  %v4730_v16 = vld [vmem:[%s8264_s6] ss:$0 sm:$0xff] }
  0xd9   :  { %v175_v20 = vpop.f32.mrf.mxu0 }
  0xda   :  { %194 = vst.msk [vmem:[#allocation2 + $0x1] sm:$0xff] %vm193_vm2, %v191_v18  ;;  %v198_v21 = vadd.f32 %v188_v11, %v181_v19  ;;  %v176_v22 = vadd.f32 %v4725_v9, %v175_v20  ;;  %v4731_v18 = vld [vmem:[%s8265_s7] ss:$0 sm:$0xff] }
  0xdc   :  { %200 = vst.msk [vmem:[#allocation2 + $0x1a] sm:$0xff] %vm193_vm2, %v198_v21  ;;  %v197_v23 = vadd.f32 %v187_v14, %v176_v22 }
  0xde   :  { %199 = vst.msk [vmem:[#allocation2 + $0x12] sm:$0xff] %vm193_vm2, %v197_v23 }
  0xe1   :  { %v201_v24 = vld [vmem:[#allocation2] sm:$0xff]  ;;  %v202_v26 = vld [vmem:[#allocation2 + $0x8] sm:$0xff] }
  0xe2   :  { %v267_v25 = vsel %vm193_vm2, %v201_v24, 0.0  ;;  %v270_v29 = vsel %vm193_vm2, %v202_v26, 0.0 }
  0xe3   :  { %268 = vadd.xlane.f32.xlu0 %v267_v25  ;;  %v205_v31 = vld [vmem:[#allocation2 + $0x20] sm:$0x3] }
  0xe4   :  { %v280_v33 = vsel %vm279_vm3, %v205_v31, 0.0 }
  0xe5   :  { %v203_v27 = vld [vmem:[#allocation2 + $0x10] sm:$0xff]  ;;  %v204_v30 = vld [vmem:[#allocation2 + $0x18] sm:$0xff] }
  0xe6   :  { %v273_v28 = vsel %vm193_vm2, %v203_v27, 0.0  ;;  %v276_v32 = vsel %vm193_vm2, %v204_v30, 0.0 }
  0xe7   :  { %274 = vadd.xlane.f32.xlu1 %v273_v28  ;;  %271 = vadd.xlane.f32.xlu0 %v270_v29 }
  0xeb   :  { %277 = vadd.xlane.f32.xlu1 %v276_v32  ;;  %281 = vadd.xlane.f32.xlu0 %v280_v33 }
 0x16c   :  { %v269_v34 = vpop.xlane.xlu0 %268 }
 0x16d   :  { %v284_v35 = vmul.f32 0.03125, %v269_v34 }
 0x16f   :  { %v6286_v36 = vsub.f32 %v201_v24, %v284_v35 }
 0x170   :  { %v275_v37 = vpop.xlane.xlu1 %274  ;;  %v272_v38 = vpop.xlane.xlu0 %271 }
 0x171   :  { %v286_v39 = vmul.f32 0.03125, %v275_v37  ;;  %v285_v40 = vmul.f32 0.03125, %v272_v38  ;;  %v294_v41 = vmul.f32 %v6286_v36, %v6286_v36 }
 0x173   :  { %v6290_v42 = vsub.f32 %v203_v27, %v286_v39  ;;  %v6292_v43 = vsub.f32 %v202_v26, %v285_v40  ;;  %v299_v44 = vsel %vm193_vm2, %v294_v41, 0.0 }
 0x174   :  { %v278_v45 = vpop.xlane.xlu1 %277  ;;  %300 = vadd.xlane.f32.xlu1 %v299_v44  ;;  %v282_v46 = vpop.xlane.xlu0 %281 }
 0x175   :  { %v287_v47 = vmul.f32 0.03125, %v278_v45  ;;  %v288_v48 = vmul.f32 0.03125, %v282_v46  ;;  %v296_v49 = vmul.f32 %v6290_v42, %v6290_v42  ;;  %v295_v50 = vmul.f32 %v6292_v43, %v6292_v43 }
 0x177   :  { %v6299_v51 = vsub.f32 %v204_v30, %v287_v47  ;;  %v6301_v52 = vsub.f32 %v205_v31, %v288_v48  ;;  %v305_v53 = vsel %vm193_vm2, %v296_v49, 0.0  ;;  %v302_v54 = vsel %vm193_vm2, %v295_v50, 0.0 }
 0x178   :  { %306 = vadd.xlane.f32.xlu1 %v305_v53  ;;  %303 = vadd.xlane.f32.xlu0 %v302_v54 }
 0x179   :  { %v297_v55 = vmul.f32 %v6299_v51, %v6299_v51  ;;  %v298_v56 = vmul.f32 %v6301_v52, %v6301_v52 }
 0x17b   :  { %v308_v57 = vsel %vm193_vm2, %v297_v55, 0.0  ;;  %v311_v58 = vsel %vm279_vm3, %v298_v56, 0.0 }
 0x17c   :  { %309 = vadd.xlane.f32.xlu0 %v308_v57  ;;  %312 = vadd.xlane.f32.xlu1 %v311_v58 }
 0x1fd   :  { %v301_v0 = vpop.xlane.xlu1 %300 }
 0x1fe   :  { %v314_v1 = vmul.f32 0.03125, %v301_v0 }
 0x200   :  { %v319_v2 = vadd.f32 1e-06, %v314_v1 }
 0x201   :  { %v307_v3 = vpop.xlane.xlu1 %306  ;;  %v304_v4 = vpop.xlane.xlu0 %303 }
 0x202   :  { %5854 = vrsqrt.f32 %v319_v2  ;;  %v316_v5 = vmul.f32 0.03125, %v307_v3  ;;  %v315_v6 = vmul.f32 0.03125, %v304_v4 }
 0x204   :  { %v321_v7 = vadd.f32 1e-06, %v316_v5  ;;  %v320_v8 = vadd.f32 1e-06, %v315_v6 }
 0x205   :  { %v313_v9 = vpop.xlane.xlu1 %312  ;;  %v310_v10 = vpop.xlane.xlu0 %309 }
 0x206   :  { %5856 = vrsqrt.f32 %v321_v7  ;;  %v318_v11 = vmul.f32 0.03125, %v313_v9  ;;  %v317_v12 = vmul.f32 0.03125, %v310_v10 }
 0x207   :  { %5858 = vrsqrt.f32 %v320_v8 }
 0x208   :  { %v322_v13 = vadd.f32 1e-06, %v317_v12  ;;  %v323_v14 = vadd.f32 1e-06, %v318_v11 }
 0x20a   :  { %5860 = vrsqrt.f32 %v322_v13 }
 0x20b   :  { %5862 = vrsqrt.f32 %v323_v14 }
 0x20f   :  { %v5855_v15 = vpop.eup %5854 }
 0x210   :  { %v329_v17 = vmul.f32 %v5855_v15, %v6286_v36 }
 0x212   :  { %v340_v19 = vmul.f32 %v4730_v16, %v329_v17 }
 0x213   :  { %v5857_v20 = vpop.eup %5856 }
 0x214   :  { %v5859_v21 = vpop.eup %5858  ;;  %v351_v22 = vadd.f32 %v4731_v18, %v340_v19  ;;  %v331_v24 = vmul.f32 %v5857_v20, %v6290_v42 }
 0x215   :  { %v330_v23 = vmul.f32 %v5859_v21, %v6292_v43  ;;  %v4732_v43 = vld [vmem:[%s8266_s9] ss:$0 sm:$0xff] }
 0x216   :  { %5224 = vmatmul.mubr.msk.f32.vlgmr.msra.gmra.mxu1 %vm193_vm2, %v351_v22  ;;  %v342_v28 = vmul.f32 %v4730_v16, %v331_v24 }
 0x217   :  { %5226 = vmatprep.mubr.msk.f32.mxu1 %vm6110_vm4, %v6109_v59  ;;  %v341_v25 = vmul.f32 %v4730_v16, %v330_v23  ;;  %v5861_v26 = vpop.eup %5860 }
 0x218   :  { %v332_v29 = vmul.f32 %v5861_v26, %v6299_v51  ;;  %v5863_v30 = vpop.eup %5862  ;;  %v353_v31 = vadd.f32 %v4731_v18, %v342_v28 }
 0x219   :  { %v352_v27 = vadd.f32 %v4731_v18, %v341_v25  ;;  %v333_v33 = vmul.f32 %v5863_v30, %v6301_v52 }
 0x21a   :  { %v343_v32 = vmul.f32 %v4730_v16, %v332_v29 }
 0x21b   :  { %5227 = vmatmul.mubr.msk.f32.gmra.mxu1 %vm193_vm2, %v352_v27  ;;  %v344_v35 = vmul.f32 %v4730_v16, %v333_v33 }
 0x21c   :  { %5229 = vmatprep.mubr.msk.f32.mxu1 %vm6110_vm4, %v6109_v59  ;;  %v354_v34 = vadd.f32 %v4731_v18, %v343_v32 }
 0x21d   :  { %v355_v36 = vadd.f32 %v4731_v18, %v344_v35  ;;  %v206_v35 = vlaneseq }
 0x21f   :  { %5230 = vmatmul.mubr.msk.f32.gmra.mxu1 %vm193_vm2, %v353_v31 }
 0x220   :  { %5232 = vmatprep.mubr.msk.f32.mxu1 %vm6110_vm4, %v6109_v59 }
 0x223   :  { %5233 = vmatmul.mubr.msk.f32.gmra.mxu1 %vm193_vm2, %v354_v34 }
 0x224   :  { %5235 = vmatprep.mubr.msk.f32.mxu1 %vm6110_vm4, %v6109_v59 }
 0x227   :  { %5236 = vmatmul.mubr.msk.f32.gmra.mxu1 %vm193_vm2, %v355_v36  ;;  %v207_v36 = vshrl.u32 %v206_v35, 7 }
 0x228   :  { %5273 = vmatprep.mubr.msk.f32.mxu1 %vm6110_vm4, %v6109_v59 }
 0x2d6   :  { %v448_v37 = vpop.f32.mrf.mxu1 }
 0x2d7   :  { %v6374_v51 = vadd.f32 %v4732_v43, %v448_v37  ;;  %v6596_v37 = vand.u32 127, %v206_v35 }
 0x2d8   :  { %v5225_v38 = vpop.f32.mrf.mxu1 }
 0x2d9   :  { %v6391_v53 = vmul.f32 0.35355338, %v6374_v51  ;;  %v209_v38 = vadd.s32 16, %v207_v36  ;;  %vm252_vm7 = vcmp.ge.s32.totalorder %v6596_v37, 17  ;;  %vm253_vm8 = vcmp.lt.s32.totalorder %v6596_v37, 34 }
 0x2da   :  { %vm230_vm9 = vcmp.lt.s32.totalorder %v6596_v37, 17  ;;  %vm6601_vm13 = vmand %vm252_vm7, %vm253_vm8 }
 0x2db   :  { %v453_v39 = vpop.f32.mrf.mxu1  ;;  %vm221_vm11 = vcmp.lt.s32.totalorder %v209_v38, 17  ;;  %vm239_vm12 = vcmp.ge.s32.totalorder %v209_v38, 17 }
 0x2dc   :  { %v6376_v52 = vadd.f32 %v4732_v43, %v453_v39  ;;  %vm234_vm14 = vmand %vm221_vm11, %vm230_vm9  ;;  %vm626_vm11 = vcmask 271360  }
 0x2dd   :  { %v5228_v40 = vpop.f32.mrf.mxu1  ;;  %vm257_vm15 = vmand %vm239_vm12, %vm6601_vm13  ;;  %vm1795_vm12 = vcmask 195584  }
 0x2de   :  { %v6398_v54 = vmul.f32 0.35355338, %v6376_v52  ;;  %vm6621_vm1 = vmor %vm234_vm14, %vm257_vm15  ;;  %vm2277_vm15 = vcmask 523264  }
 0x2df   :  { %v458_v41 = vpop.f32.mrf.mxu1 }
 0x2e0   :  { %v6366_v48 = vadd.f32 %v4732_v43, %v458_v41 }
 0x2e1   :  { %v5231_v42 = vpop.f32.mrf.mxu1 }
 0x2e2   :  { %v6405_v55 = vmul.f32 0.35355338, %v6366_v48 }
 0x2e3   :  { %v463_v44 = vpop.f32.mrf.mxu1 }
 0x2e4   :  { %v6362_v45 = vadd.f32 %v4732_v43, %v463_v44 }
 0x2e5   :  { %v5234_v46 = vpop.f32.mrf.mxu1 }
 0x2e6   :  { %488 = vrot.lane.b32.xlu1 %v6362_v45, %s6111_s3  ;;  %v6412_v56 = vmul.f32 0.35355338, %v6362_v45 }
 0x2e7   :  { %v468_v47 = vpop.f32.mrf.mxu1 }
 0x2e8   :  { %v6368_v49 = vadd.f32 %v4732_v43, %v468_v47 }
 0x2e9   :  { %v5237_v50 = vpop.f32.mrf.mxu1 }
 0x2ea   :  { %486 = vrot.lane.b32.xlu1 %v6366_v48, %s6111_s3  ;;  %490 = vrot.lane.b32.xlu0 %v6368_v49, %s6111_s3  ;;  %v6419_v57 = vmul.f32 0.35355338, %v6368_v49 }
 0x2ee   :  { %484 = vrot.lane.b32.xlu1 %v6376_v52, %s6111_s3  ;;  %482 = vrot.lane.b32.xlu0 %v6374_v51, %s6111_s3 }
 0x2f2   :  { %810 = vrot.lane.b32.xlu1 %v6368_v49, %s6112_s27  ;;  %808 = vrot.lane.b32.xlu0 %v6362_v45, %s6112_s27 }
 0x2f6   :  { %806 = vrot.lane.b32.xlu1 %v6366_v48, %s6112_s27  ;;  %804 = vrot.lane.b32.xlu0 %v6376_v52, %s6112_s27 }
 0x2fa   :  { %802 = vrot.lane.b32.xlu1 %v6374_v51, %s6112_s27  ;;  %792 = vrot.lane.b32.xlu0 %v6391_v53, %s6113_s28 }
 0x2fe   :  { %1121 = vrot.lane.b32.xlu1 %v6368_v49, %s6114_s29  ;;  %794 = vrot.lane.b32.xlu0 %v6398_v54, %s6113_s28 }
 0x302   :  { %1119 = vrot.lane.b32.xlu1 %v6362_v45, %s6114_s29  ;;  %796 = vrot.lane.b32.xlu0 %v6405_v55, %s6113_s28 }
 0x306   :  { %1117 = vrot.lane.b32.xlu1 %v6366_v48, %s6114_s29  ;;  %798 = vrot.lane.b32.xlu0 %v6412_v56, %s6113_s28 }
 0x30a   :  { %1115 = vrot.lane.b32.xlu1 %v6376_v52, %s6114_s29  ;;  %800 = vrot.lane.b32.xlu0 %v6419_v57, %s6113_s28 }
 0x30e   :  { %1113 = vrot.lane.b32.xlu1 %v6374_v51, %s6114_s29  ;;  %1103 = vrot.lane.b32.xlu0 %v6391_v53, %s6115_s30 }
 0x312   :  { %1432 = vrot.lane.b32.xlu1 %v6368_v49, %s6116_s2  ;;  %1105 = vrot.lane.b32.xlu0 %v6398_v54, %s6115_s30 }
 0x316   :  { %1430 = vrot.lane.b32.xlu1 %v6362_v45, %s6116_s2  ;;  %1107 = vrot.lane.b32.xlu0 %v6405_v55, %s6115_s30 }
 0x31a   :  { %1428 = vrot.lane.b32.xlu1 %v6366_v48, %s6116_s2  ;;  %1109 = vrot.lane.b32.xlu0 %v6412_v56, %s6115_s30 }
 0x31e   :  { %1426 = vrot.lane.b32.xlu1 %v6376_v52, %s6116_s2  ;;  %1111 = vrot.lane.b32.xlu0 %v6419_v57, %s6115_s30 }
 0x322   :  { %1424 = vrot.lane.b32.xlu1 %v6374_v51, %s6116_s2  ;;  %1414 = vrot.lane.b32.xlu0 %v6391_v53, %s8292_s1 }
 0x326   :  { %1416 = vrot.lane.b32.xlu1 %v6398_v54, %s8292_s1  ;;  %1418 = vrot.lane.b32.xlu0 %v6405_v55, %s8292_s1 }
 0x32a   :  { %1420 = vrot.lane.b32.xlu1 %v6412_v56, %s8292_s1  ;;  %1422 = vrot.lane.b32.xlu0 %v6419_v57, %s8292_s1  ;;  %s8296_s1 = smov 16  }
 0x32e   :  { %676 = vrot.lane.b32.xlu1 %v6362_v45, %s8290_s23  ;;  %678 = vrot.lane.b32.xlu0 %v6368_v49, %s8290_s23 }
 0x332   :  { %674 = vrot.lane.b32.xlu1 %v6366_v48, %s8290_s23  ;;  %990 = vrot.lane.b32.xlu0 %v6368_v49, %s8288_s5 }
 0x336   :  { %672 = vrot.lane.b32.xlu1 %v6376_v52, %s8290_s23  ;;  %986 = vrot.lane.b32.xlu0 %v6366_v48, %s8288_s5 }
 0x33a   :  { %670 = vrot.lane.b32.xlu1 %v6374_v51, %s8290_s23  ;;  %1301 = vrot.lane.b32.xlu0 %v6368_v49, %s8286_s0  ;;  %s8294_s23 = smov 24  }
 0x33e   :  { %988 = vrot.lane.b32.xlu1 %v6362_v45, %s8288_s5  ;;  %1297 = vrot.lane.b32.xlu0 %v6366_v48, %s8286_s0 }
 0x342   :  { %984 = vrot.lane.b32.xlu1 %v6376_v52, %s8288_s5 }
 0x346   :  { %982 = vrot.lane.b32.xlu1 %v6374_v51, %s8288_s5 }
 0x34a   :  { %1299 = vrot.lane.b32.xlu1 %v6362_v45, %s8286_s0 }
 0x34e   :  { %1295 = vrot.lane.b32.xlu1 %v6376_v52, %s8286_s0 }
 0x358   :  { %v489_v58 = vpop.permute.xlu1 %488 }
 0x35c   :  { %v487_v60 = vpop.permute.xlu1 %486  ;;  %v491_v61 = vpop.permute.xlu0 %490 }
 0x35d   :  { %5239 = vmatpush3.xpose.msk.msra.mxu0 %vm492_vm5, %v491_v61 }
 0x35e   :  { %5240 = vmatprep.subr.mxu0 %v6109_v59 }
 0x360   :  { %v485_v62 = vpop.permute.xlu1 %484  ;;  %v483_v63 = vpop.permute.xlu0 %482 }
 0x361   :  { %5241 = vmatpush3.xpose.msk.msra.mxu0 %vm492_vm5, %v489_v58 }
 0x362   :  { %5242 = vmatprep.subr.mxu0 %v6109_v59 }
 0x364   :  { %v811_v0 = vpop.permute.xlu1 %810  ;;  %v809_v1 = vpop.permute.xlu0 %808 }
 0x365   :  { %5243 = vmatpush3.xpose.msk.msra.mxu0 %vm492_vm5, %v487_v60 }
 0x366   :  { %5244 = vmatprep.subr.mxu0 %v6109_v59 }
 0x368   :  { %v807_v2 = vpop.permute.xlu1 %806  ;;  %v805_v3 = vpop.permute.xlu0 %804 }
 0x369   :  { %5245 = vmatpush3.xpose.msk.msra.mxu0 %vm492_vm5, %v485_v62 }
 0x36a   :  { %5246 = vmatprep.subr.mxu0 %v6109_v59 }
 0x36c   :  { %v803_v4 = vpop.permute.xlu1 %802  ;;  %v793_v5 = vpop.permute.xlu0 %792 }
 0x36d   :  { %5247 = vmatpush3.xpose.msk.msra.mxu0 %vm492_vm5, %v483_v63 }
 0x36e   :  { %5288 = vmatprep.subr.mxu0 %v6109_v59 }
 0x370   :  { %v1122_v6 = vpop.permute.xlu1 %1121  ;;  %5249 = vmatmul.mubr.msk.f32.vlgmr.msra.gmra.mxu0 %vm492_vm5, %v6391_v53  ;;  %v795_v7 = vpop.permute.xlu0 %794 }
 0x371   :  { %5289 = vmatpush3.xpose.msk.msra.mxu0 %vm492_vm5, %v811_v0  ;;  %5251 = vmatprep.mubr.msk.f32.mxu0 %vm6110_vm4, %v6109_v59 }
 0x372   :  { %5290 = vmatprep.subr.mxu0 %v6109_v59 }
 0x374   :  { %v1120_v8 = vpop.permute.xlu1 %1119  ;;  %5252 = vmatmul.mubr.msk.f32.gmra.mxu0 %vm492_vm5, %v6398_v54  ;;  %v797_v9 = vpop.permute.xlu0 %796  ;;  %v211_v54 = vadd.s32 32, %v207_v36 }
 0x375   :  { %5291 = vmatpush3.xpose.msk.msra.mxu0 %vm492_vm5, %v809_v1  ;;  %5254 = vmatprep.mubr.msk.f32.mxu0 %vm6110_vm4, %v6109_v59 }
 0x376   :  { %5292 = vmatprep.subr.mxu0 %v6109_v59  ;;  %vm246_vm7 = vcmp.lt.s32.totalorder %v211_v54, 34 }
 0x377   :  { %vm6639_vm8 = vmand %vm246_vm7, %vm6601_vm13 }
 0x378   :  { %v1118_v10 = vpop.permute.xlu1 %1117  ;;  %5255 = vmatmul.mubr.msk.f32.gmra.mxu0 %vm492_vm5, %v6405_v55  ;;  %v799_v11 = vpop.permute.xlu0 %798 }
 0x379   :  { %5293 = vmatpush3.xpose.msk.msra.mxu0 %vm492_vm5, %v807_v2  ;;  %5257 = vmatprep.mubr.msk.f32.mxu0 %vm6110_vm4, %v6109_v59 }
 0x37a   :  { %5294 = vmatprep.subr.mxu0 %v6109_v59 }
 0x37c   :  { %v1116_v12 = vpop.permute.xlu1 %1115  ;;  %5258 = vmatmul.mubr.msk.f32.gmra.mxu0 %vm492_vm5, %v6412_v56  ;;  %v801_v13 = vpop.permute.xlu0 %800 }
 0x37d   :  { %5295 = vmatpush3.xpose.msk.msra.mxu0 %vm492_vm5, %v805_v3  ;;  %5260 = vmatprep.mubr.msk.f32.mxu0 %vm6110_vm4, %v6109_v59 }
 0x37e   :  { %5296 = vmatprep.subr.mxu0 %v6109_v59 }
 0x380   :  { %v1114_v14 = vpop.permute.xlu1 %1113  ;;  %v1104_v15 = vpop.permute.xlu0 %1103  ;;  %5261 = vmatmul.mubr.msk.f32.gmra.mxu0 %vm492_vm5, %v6419_v57 }
 0x381   :  { %5297 = vmatpush3.xpose.msk.msra.mxu0 %vm492_vm5, %v803_v4  ;;  %5298 = vmatprep.mubr.msk.f32.mxu0 %vm6110_vm4, %v6109_v59 }
 0x382   :  { %5338 = vmatprep.subr.mxu0 %v6109_v59 }
 0x384   :  { %v1433_v16 = vpop.permute.xlu1 %1432  ;;  %v1106_v17 = vpop.permute.xlu0 %1105  ;;  %5299 = vmatmul.mubr.msk.f32.vlgmr.msra.gmra.mxu0 %vm492_vm5, %v793_v5 }
 0x385   :  { %5339 = vmatpush3.xpose.msk.msra.mxu0 %vm492_vm5, %v1122_v6  ;;  %5301 = vmatprep.mubr.msk.f32.mxu0 %vm6110_vm4, %v6109_v59 }
 0x386   :  { %5340 = vmatprep.subr.mxu0 %v6109_v59 }
 0x388   :  { %v1431_v18 = vpop.permute.xlu1 %1430  ;;  %v1108_v19 = vpop.permute.xlu0 %1107  ;;  %5302 = vmatmul.mubr.msk.f32.gmra.mxu0 %vm492_vm5, %v795_v7 }
 0x389   :  { %5341 = vmatpush3.xpose.msk.msra.mxu0 %vm492_vm5, %v1120_v8  ;;  %5304 = vmatprep.mubr.msk.f32.mxu0 %vm6110_vm4, %v6109_v59 }
 0x38a   :  { %5342 = vmatprep.subr.mxu0 %v6109_v59 }
 0x38c   :  { %v1429_v20 = vpop.permute.xlu1 %1428  ;;  %v1110_v21 = vpop.permute.xlu0 %1109  ;;  %5305 = vmatmul.mubr.msk.f32.gmra.mxu0 %vm492_vm5, %v797_v9 }
 0x38d   :  { %5343 = vmatpush3.xpose.msk.msra.mxu0 %vm492_vm5, %v1118_v10  ;;  %5307 = vmatprep.mubr.msk.f32.mxu0 %vm6110_vm4, %v6109_v59 }
 0x38e   :  { %5344 = vmatprep.subr.mxu0 %v6109_v59 }
 0x390   :  { %v1427_v22 = vpop.permute.xlu1 %1426  ;;  %v1112_v23 = vpop.permute.xlu0 %1111  ;;  %5308 = vmatmul.mubr.msk.f32.gmra.mxu0 %vm492_vm5, %v799_v11 }
 0x391   :  { %5345 = vmatpush3.xpose.msk.msra.mxu0 %vm492_vm5, %v1116_v12  ;;  %5310 = vmatprep.mubr.msk.f32.mxu0 %vm6110_vm4, %v6109_v59 }
 0x392   :  { %5346 = vmatprep.subr.mxu0 %v6109_v59 }
 0x394   :  { %v1425_v24 = vpop.permute.xlu1 %1424  ;;  %v1415_v25 = vpop.permute.xlu0 %1414  ;;  %5311 = vmatmul.mubr.msk.f32.gmra.mxu0 %vm492_vm5, %v801_v13 }
 0x395   :  { %5347 = vmatpush3.xpose.msk.msra.mxu0 %vm492_vm5, %v1114_v14  ;;  %5348 = vmatprep.mubr.msk.f32.mxu0 %vm6110_vm4, %v6109_v59 }
 0x396   :  { %5388 = vmatprep.subr.mxu0 %v6109_v59 }
 0x398   :  { %v1417_v26 = vpop.permute.xlu1 %1416  ;;  %v1419_v27 = vpop.permute.xlu0 %1418  ;;  %5349 = vmatmul.mubr.msk.f32.vlgmr.msra.gmra.mxu0 %vm492_vm5, %v1104_v15 }
 0x399   :  { %5389 = vmatpush3.xpose.msk.msra.mxu0 %vm492_vm5, %v1433_v16  ;;  %5351 = vmatprep.mubr.msk.f32.mxu0 %vm6110_vm4, %v6109_v59 }
 0x39a   :  { %5390 = vmatprep.subr.mxu0 %v6109_v59 }
 0x39c   :  { %v1421_v28 = vpop.permute.xlu1 %1420  ;;  %v1423_v29 = vpop.permute.xlu0 %1422  ;;  %5352 = vmatmul.mubr.msk.f32.gmra.mxu0 %vm492_vm5, %v1106_v17 }
 0x39d   :  { %5391 = vmatpush3.xpose.msk.msra.mxu0 %vm492_vm5, %v1431_v18  ;;  %5354 = vmatprep.mubr.msk.f32.mxu0 %vm6110_vm4, %v6109_v59 }
 0x39e   :  { %5392 = vmatprep.subr.mxu0 %v6109_v59 }
 0x3a0   :  { %v677_v30 = vpop.permute.xlu1 %676  ;;  %v679_v31 = vpop.permute.xlu0 %678  ;;  %5355 = vmatmul.mubr.msk.f32.gmra.mxu0 %vm492_vm5, %v1108_v19 }
 0x3a1   :  { %5264 = vmatpush3.msk.msra.mxu1 %vm699_vm6, %v679_v31  ;;  %5393 = vmatpush3.xpose.msk.msra.mxu0 %vm492_vm5, %v1429_v20 }
 0x3a2   :  { %5265 = vmatprep.subr.mxu1 %v6109_v59  ;;  %5357 = vmatprep.mubr.msk.f32.mxu0 %vm6110_vm4, %v6109_v59 }
 0x3a3   :  { %5266 = vmatpush3.msra.mxu1 %v677_v30  ;;  %5394 = vmatprep.subr.mxu0 %v6109_v59 }
 0x3a4   :  { %v675_v32 = vpop.permute.xlu1 %674  ;;  %5267 = vmatprep.subr.mxu1 %v6109_v59  ;;  %5358 = vmatmul.mubr.msk.f32.gmra.mxu0 %vm492_vm5, %v1110_v21 }
 0x3a5   :  { %5268 = vmatpush3.msra.mxu1 %v675_v32  ;;  %5395 = vmatpush3.xpose.msk.msra.mxu0 %vm492_vm5, %v1427_v22 }
 0x3a6   :  { %5360 = vmatprep.mubr.msk.f32.mxu0 %vm6110_vm4, %v6109_v59  ;;  %5269 = vmatprep.subr.mxu1 %v6109_v59 }
 0x3a7   :  { %5396 = vmatprep.subr.mxu0 %v6109_v59 }
 0x3a8   :  { %v673_v33 = vpop.permute.xlu1 %672  ;;  %5361 = vmatmul.mubr.msk.f32.gmra.mxu0 %vm492_vm5, %v1112_v23 }
 0x3a9   :  { %5270 = vmatpush3.msra.mxu1 %v673_v33  ;;  %5397 = vmatpush3.xpose.msk.msra.mxu0 %vm492_vm5, %v1425_v24 }
 0x3aa   :  { %5398 = vmatprep.mubr.msk.f32.mxu0 %vm6110_vm4, %v6109_v59  ;;  %5271 = vmatprep.subr.mxu1 %v6109_v59 }
 0x3ab   :  { %5438 = vmatprep.subr.mxu0 %v6109_v59 }
 0x3ac   :  { %v671_v34 = vpop.permute.xlu1 %670  ;;  %5399 = vmatmul.mubr.msk.f32.vlgmr.msra.gmra.mxu0 %vm492_vm5, %v1415_v25 }
 0x3ad   :  { %5272 = vmatpush3.msra.mxu1 %v671_v34  ;;  %5401 = vmatprep.mubr.msk.f32.mxu0 %vm6110_vm4, %v6109_v59 }
 0x3ae   :  { %5313 = vmatprep.subr.mxu1 %v6109_v59 }
 0x3b0   :  { %5402 = vmatmul.mubr.msk.f32.gmra.mxu0 %vm492_vm5, %v1417_v26 }
 0x3b1   :  { %5404 = vmatprep.mubr.msk.f32.mxu0 %vm6110_vm4, %v6109_v59 }
 0x3b4   :  { %5405 = vmatmul.mubr.msk.f32.gmra.mxu0 %vm492_vm5, %v1419_v27 }
 0x3b5   :  { %5407 = vmatprep.mubr.msk.f32.mxu0 %vm6110_vm4, %v6109_v59 }
 0x3b8   :  { %5408 = vmatmul.mubr.msk.f32.gmra.mxu0 %vm492_vm5, %v1421_v28 }
 0x3b9   :  { %5410 = vmatprep.mubr.msk.f32.mxu0 %vm6110_vm4, %v6109_v59 }
 0x3bc   :  { %5411 = vmatmul.mubr.msk.f32.gmra.mxu0 %vm492_vm5, %v1423_v29 }
 0x3bd   :  { %5446 = vmatprep.mubr.msk.f32.mxu0 %vm6110_vm4, %v6109_v59 }
 0x430   :  { %v584_v39 = vpop.f32.mrf.mxu0 }
 0x431   :  { %v6607_v41 = vsel %vm230_vm9, %v584_v39, -1e+30 }
 0x432   :  { %v5250_v42 = vpop.f32.mrf.mxu0  ;;  %v614_v43 = vsel %vm613_vm10, %v6607_v41, -inf }
 0x433   :  { %615 = vmax.xlane.f32.xlu1 %v614_v43 }
 0x434   :  { %v589_v44 = vpop.f32.mrf.mxu0 }
 0x435   :  { %v6617_v46 = vsel %vm230_vm9, %v589_v44, -1e+30 }
 0x436   :  { %v5253_v47 = vpop.f32.mrf.mxu0  ;;  %v617_v50 = vsel %vm613_vm10, %v6617_v46, -inf }
 0x437   :  { %618 = vmax.xlane.f32.xlu0 %v617_v50 }
 0x438   :  { %v594_v55 = vpop.f32.mrf.mxu0 }
 0x439   :  { %v6627_v56 = vsel %vm6621_vm1, %v594_v55, -1e+30 }
 0x43a   :  { %v5256_v57 = vpop.f32.mrf.mxu0  ;;  %v620_v58 = vsel %vm613_vm10, %v6627_v56, -inf }
 0x43b   :  { %621 = vmax.xlane.f32.xlu0 %v620_v58 }
 0x43c   :  { %v599_v60 = vpop.f32.mrf.mxu0 }
 0x43d   :  { %v6633_v61 = vsel %vm6601_vm13, %v599_v60, -1e+30 }
 0x43e   :  { %v5259_v62 = vpop.f32.mrf.mxu0  ;;  %v623_v63 = vsel %vm613_vm10, %v6633_v61, -inf }
 0x43f   :  { %624 = vmax.xlane.f32.xlu0 %v623_v63 }
 0x440   :  { %v604_v1 = vpop.f32.mrf.mxu0 }
 0x441   :  { %v6645_v2 = vsel %vm6639_vm8, %v604_v1, -1e+30 }
 0x442   :  { %v5262_v3 = vpop.f32.mrf.mxu0  ;;  %v627_v4 = vsel %vm626_vm11, %v6645_v2, -inf }
 0x443   :  { %628 = vmax.xlane.f32.xlu1 %v627_v4 }
 0x444   :  { %v898_v5 = vpop.f32.mrf.mxu0 }
 0x445   :  { %v6651_v6 = vsel %vm230_vm9, %v898_v5, -1e+30 }
 0x446   :  { %v5300_v7 = vpop.f32.mrf.mxu0  ;;  %v927_v8 = vsel %vm613_vm10, %v6651_v6, -inf }
 0x447   :  { %928 = vmax.xlane.f32.xlu0 %v927_v8 }
 0x448   :  { %v903_v9 = vpop.f32.mrf.mxu0 }
 0x449   :  { %v6657_v10 = vsel %vm230_vm9, %v903_v9, -1e+30 }
 0x44a   :  { %v5303_v11 = vpop.f32.mrf.mxu0  ;;  %v930_v12 = vsel %vm613_vm10, %v6657_v10, -inf }
 0x44b   :  { %931 = vmax.xlane.f32.xlu1 %v930_v12 }
 0x44c   :  { %v908_v13 = vpop.f32.mrf.mxu0 }
 0x44d   :  { %v6663_v14 = vsel %vm6621_vm1, %v908_v13, -1e+30 }
 0x44e   :  { %v5306_v15 = vpop.f32.mrf.mxu0  ;;  %v933_v16 = vsel %vm613_vm10, %v6663_v14, -inf }
 0x44f   :  { %934 = vmax.xlane.f32.xlu0 %v933_v16 }
 0x450   :  { %v913_v17 = vpop.f32.mrf.mxu0 }
 0x451   :  { %v6669_v18 = vsel %vm6601_vm13, %v913_v17, -1e+30 }
 0x452   :  { %v5309_v19 = vpop.f32.mrf.mxu0  ;;  %v936_v20 = vsel %vm613_vm10, %v6669_v18, -inf }
 0x453   :  { %937 = vmax.xlane.f32.xlu1 %v936_v20  ;;  %v6743_v19 = vpop.permute.xlu1 %988 }
 0x454   :  { %v918_v21 = vpop.f32.mrf.mxu0 }
 0x455   :  { %v6679_v50 = vsel %vm6639_vm8, %v918_v21, -1e+30  ;;  %v6747_v21 = vpop.permute.xlu0 %990 }
 0x456   :  { %v5312_v22 = vpop.f32.mrf.mxu0 }
 0x457   :  { %v6745_v20 = vpop.permute.xlu1 %984 }
 0x458   :  { %v1209_v23 = vpop.f32.mrf.mxu0 }
 0x459   :  { %v6685_v54 = vsel %vm230_vm9, %v1209_v23, -1e+30  ;;  %v6751_v23 = vpop.permute.xlu0 %986 }
 0x45a   :  { %v5350_v24 = vpop.f32.mrf.mxu0  ;;  %v1238_v57 = vsel %vm613_vm10, %v6685_v54, -inf }
 0x45b   :  { %v6749_v22 = vpop.permute.xlu1 %982 }
 0x45c   :  { %v1214_v25 = vpop.f32.mrf.mxu0 }
 0x45d   :  { %v6689_v55 = vsel %vm230_vm9, %v1214_v25, -1e+30  ;;  %v6755_v25 = vpop.permute.xlu0 %1301 }
 0x45e   :  { %v5353_v26 = vpop.f32.mrf.mxu0  ;;  %v1241_v58 = vsel %vm613_vm10, %v6689_v55, -inf }
 0x45f   :  { %v6753_v24 = vpop.permute.xlu1 %1299 }
 0x460   :  { %v1219_v27 = vpop.f32.mrf.mxu0 }
 0x461   :  { %v6697_v60 = vsel %vm6621_vm1, %v1219_v27, -1e+30  ;;  %v6759_v27 = vpop.permute.xlu0 %1297 }
 0x462   :  { %v5356_v28 = vpop.f32.mrf.mxu0  ;;  %v1244_v63 = vsel %vm613_vm10, %v6697_v60, -inf }
 0x463   :  { %v6757_v26 = vpop.permute.xlu1 %1295 }
 0x464   :  { %1293 = vrot.lane.b32.xlu1 %v6374_v51, %s8286_s0  ;;  %v1224_v29 = vpop.f32.mrf.mxu0 }
 0x465   :  { %1612 = vrot.lane.b32.xlu0 %v6368_v49, %s8284_s24  ;;  %v939_v49 = vsel %vm626_vm11, %v6679_v50, -inf  ;;  %v6701_v62 = vsel %vm6601_vm13, %v1224_v29, -1e+30 }
 0x466   :  { %v5359_v30 = vpop.f32.mrf.mxu0  ;;  %v1247_v1 = vsel %vm613_vm10, %v6701_v62, -inf }
 0x468   :  { %v1229_v31 = vpop.f32.mrf.mxu0 }
 0x469   :  { %v6709_v3 = vsel %vm6639_vm8, %v1229_v31, -1e+30 }
 0x46a   :  { %v5362_v32 = vpop.f32.mrf.mxu0  ;;  %v1250_v5 = vsel %vm626_vm11, %v6709_v3, -inf }
 0x46c   :  { %v1520_v33 = vpop.f32.mrf.mxu0 }
 0x46d   :  { %v6713_v4 = vsel %vm230_vm9, %v1520_v33, -1e+30 }
 0x46e   :  { %v5400_v34 = vpop.f32.mrf.mxu0  ;;  %v1549_v7 = vsel %vm613_vm10, %v6713_v4, -inf }
 0x470   :  { %v1525_v35 = vpop.f32.mrf.mxu0 }
 0x471   :  { %v6721_v8 = vsel %vm230_vm9, %v1525_v35, -1e+30 }
 0x472   :  { %v5403_v36 = vpop.f32.mrf.mxu0  ;;  %v1552_v11 = vsel %vm613_vm10, %v6721_v8, -inf }
 0x474   :  { %v1530_v38 = vpop.f32.mrf.mxu0 }
 0x475   :  { %v6725_v9 = vsel %vm6621_vm1, %v1530_v38, -1e+30 }
 0x476   :  { %v5406_v39 = vpop.f32.mrf.mxu0  ;;  %v1555_v12 = vsel %vm613_vm10, %v6725_v9, -inf }
 0x478   :  { %v1535_v42 = vpop.f32.mrf.mxu0 }
 0x479   :  { %v6733_v13 = vsel %vm6601_vm13, %v1535_v42, -1e+30 }
 0x47a   :  { %v5409_v43 = vpop.f32.mrf.mxu0  ;;  %v1558_v16 = vsel %vm613_vm10, %v6733_v13, -inf }
 0x47c   :  { %v1540_v44 = vpop.f32.mrf.mxu0 }
 0x47d   :  { %v6737_v15 = vsel %vm6639_vm8, %v1540_v44, -1e+30 }
 0x47e   :  { %v5412_v47 = vpop.f32.mrf.mxu0  ;;  %v1561_v17 = vsel %vm626_vm11, %v6737_v15, -inf }
 0x484   :  { %940 = vmax.xlane.f32.xlu0 %v939_v49 }
 0x488   :  { %1239 = vmax.xlane.f32.xlu1 %v1238_v57  ;;  %1242 = vmax.xlane.f32.xlu0 %v1241_v58 }
 0x48c   :  { %1245 = vmax.xlane.f32.xlu1 %v1244_v63  ;;  %1248 = vmax.xlane.f32.xlu0 %v1247_v1 }
 0x490   :  { %1251 = vmax.xlane.f32.xlu1 %v1250_v5  ;;  %1550 = vmax.xlane.f32.xlu0 %v1549_v7 }
 0x494   :  { %1553 = vmax.xlane.f32.xlu1 %v1552_v11  ;;  %1556 = vmax.xlane.f32.xlu0 %v1555_v12 }
 0x498   :  { %1559 = vmax.xlane.f32.xlu1 %v1558_v16  ;;  %1562 = vmax.xlane.f32.xlu0 %v1561_v17 }
 0x4bc   :  { %v616_v28 = vpop.xlane.xlu1 %615 }
 0x4bd   :  { %v630_v29 = vsub.f32 %v6607_v41, %v616_v28 }
 0x4bf   :  { %v635_v30 = vmul.f32 1.442695, %v630_v29 }
 0x4c0   :  { %v619_v31 = vpop.xlane.xlu0 %618 }
 0x4c1   :  { %5864 = vpow2.f32 %v635_v30  ;;  %v631_v32 = vsub.f32 %v6617_v46, %v619_v31 }
 0x4c3   :  { %v637_v33 = vmul.f32 1.442695, %v631_v32 }
 0x4c4   :  { %v622_v34 = vpop.xlane.xlu0 %621 }
 0x4c5   :  { %5866 = vpow2.f32 %v637_v33  ;;  %v632_v35 = vsub.f32 %v6627_v56, %v622_v34 }
 0x4c7   :  { %v639_v36 = vmul.f32 1.442695, %v632_v35 }
 0x4c8   :  { %v625_v38 = vpop.xlane.xlu0 %624 }
 0x4c9   :  { %5868 = vpow2.f32 %v639_v36  ;;  %v633_v39 = vsub.f32 %v6633_v61, %v625_v38 }
 0x4cb   :  { %v641_v42 = vmul.f32 1.442695, %v633_v39 }
 0x4cc   :  { %v629_v43 = vpop.xlane.xlu1 %628 }
 0x4cd   :  { %5870 = vpow2.f32 %v641_v42  ;;  %v634_v41 = vsub.f32 %v6645_v2, %v629_v43 }
 0x4ce   :  { %v6766_v44 = vpop.eup %5864 }
 0x4cf   :  { %v643_v47 = vmul.f32 1.442695, %v634_v41  ;;  %v645_v46 = vsel %vm613_vm10, %v6766_v44, 0.0 }
 0x4d0   :  { %v929_v49 = vpop.xlane.xlu0 %928  ;;  %646 = vadd.xlane.f32.xlu1 %v645_v46 }
 0x4d1   :  { %5872 = vpow2.f32 %v643_v47  ;;  %v942_v56 = vsub.f32 %v6651_v6, %v929_v49 }
 0x4d2   :  { %v6771_v57 = vpop.eup %5866 }
 0x4d3   :  { %v947_v58 = vmul.f32 1.442695, %v942_v56  ;;  %v648_v61 = vsel %vm613_vm10, %v6771_v57, 0.0 }
 0x4d4   :  { %v932_v63 = vpop.xlane.xlu1 %931  ;;  %649 = vadd.xlane.f32.xlu0 %v648_v61 }
 0x4d5   :  { %5874 = vpow2.f32 %v947_v58  ;;  %v943_v2 = vsub.f32 %v6657_v10, %v932_v63 }
 0x4d6   :  { %v6776_v1 = vpop.eup %5868 }
 0x4d7   :  { %v949_v5 = vmul.f32 1.442695, %v943_v2  ;;  %v651_v7 = vsel %vm613_vm10, %v6776_v1, 0.0 }
 0x4d8   :  { %v935_v11 = vpop.xlane.xlu0 %934  ;;  %652 = vadd.xlane.f32.xlu1 %v651_v7 }
 0x4d9   :  { %5876 = vpow2.f32 %v949_v5  ;;  %v944_v6 = vsub.f32 %v6663_v14, %v935_v11 }
 0x4da   :  { %v6781_v12 = vpop.eup %5870 }
 0x4db   :  { %v951_v16 = vmul.f32 1.442695, %v944_v6  ;;  %v654_v17 = vsel %vm613_vm10, %v6781_v12, 0.0 }
 0x4dc   :  { %655 = vadd.xlane.f32.xlu0 %v654_v17  ;;  %v938_v34 = vpop.xlane.xlu1 %937  ;;  %v6806_v38 = vpop.permute.xlu0 %1612 }
 0x4dd   :  { %5878 = vpow2.f32 %v951_v16  ;;  %v945_v35 = vsub.f32 %v6669_v18, %v938_v34 }
 0x4de   :  { %v6785_v10 = vpop.eup %5872 }
 0x4df   :  { %v657_v28 = vsel %vm626_vm11, %v6785_v10, 0.0  ;;  %v953_v36 = vmul.f32 1.442695, %v945_v35 }
 0x4e0   :  { %658 = vadd.xlane.f32.xlu1 %v657_v28  ;;  %v6808_v39 = vpop.permute.xlu1 %1293 }
 0x4e1   :  { %5880 = vpow2.f32 %v953_v36 }
 0x4e2   :  { %v6789_v29 = vpop.eup %5874 }
 0x4e3   :  { %v957_v30 = vsel %vm613_vm10, %v6789_v29, 0.0 }
 0x4e4   :  { %958 = vadd.xlane.f32.xlu1 %v957_v30 }
 0x4e6   :  { %v6793_v14 = vpop.eup %5876 }
 0x4e7   :  { %v960_v31 = vsel %vm613_vm10, %v6793_v14, 0.0 }
 0x4e8   :  { %961 = vadd.xlane.f32.xlu0 %v960_v31 }
 0x4ea   :  { %v6797_v32 = vpop.eup %5878 }
 0x4eb   :  { %v963_v33 = vsel %vm613_vm10, %v6797_v32, 0.0 }
 0x4ec   :  { %964 = vadd.xlane.f32.xlu1 %v963_v33 }
 0x4ee   :  { %v6815_v5 = vpop.eup %5880 }
 0x4fd   :  { %1610 = vrot.lane.b32.xlu1 %v6362_v45, %s8284_s24 }
 0x4fe   :  { %1608 = vrot.lane.b32.xlu0 %v6366_v48, %s8284_s24 }
 0x50d   :  { %v941_v42 = vpop.xlane.xlu0 %940 }
 0x50e   :  { %v946_v43 = vsub.f32 %v6679_v50, %v941_v42 }
 0x510   :  { %v955_v41 = vmul.f32 1.442695, %v946_v43 }
 0x511   :  { %v1240_v47 = vpop.xlane.xlu1 %1239  ;;  %v1243_v46 = vpop.xlane.xlu0 %1242 }
 0x512   :  { %5882 = vpow2.f32 %v955_v41  ;;  %v1253_v45 = vsub.f32 %v6685_v54, %v1240_v47  ;;  %v1254_v48 = vsub.f32 %v6689_v55, %v1243_v46 }
 0x514   :  { %v1258_v49 = vmul.f32 1.442695, %v1253_v45  ;;  %v1260_v56 = vmul.f32 1.442695, %v1254_v48 }
 0x515   :  { %v1246_v18 = vpop.xlane.xlu1 %1245  ;;  %v1249_v58 = vpop.xlane.xlu0 %1248 }
 0x516   :  { %5884 = vpow2.f32 %v1258_v49  ;;  %v1255_v61 = vsub.f32 %v6697_v60, %v1246_v18  ;;  %v1256_v63 = vsub.f32 %v6701_v62, %v1249_v58  ;;  %v966_v60 = vsel %vm613_vm10, %v6815_v5, 0.0 }
 0x517   :  { %5886 = vpow2.f32 %v1260_v56 }
 0x518   :  { %v1262_v2 = vmul.f32 1.442695, %v1255_v61  ;;  %v1264_v50 = vmul.f32 1.442695, %v1256_v63 }
 0x519   :  { %v1252_v7 = vpop.xlane.xlu1 %1251  ;;  %v1551_v11 = vpop.xlane.xlu0 %1550 }
 0x51a   :  { %5888 = vpow2.f32 %v1262_v2  ;;  %v1257_v54 = vsub.f32 %v6709_v3, %v1252_v7  ;;  %v1564_v55 = vsub.f32 %v6713_v4, %v1551_v11 }
 0x51b   :  { %5890 = vpow2.f32 %v1264_v50 }
 0x51c   :  { %v1266_v6 = vmul.f32 1.442695, %v1257_v54  ;;  %v1569_v16 = vmul.f32 1.442695, %v1564_v55 }
 0x51d   :  { %v1554_v17 = vpop.xlane.xlu1 %1553  ;;  %v1557_v62 = vpop.xlane.xlu0 %1556  ;;  %967 = vadd.xlane.f32.xlu0 %v966_v60 }
 0x51e   :  { %5892 = vpow2.f32 %v1266_v6  ;;  %v1565_v28 = vsub.f32 %v6721_v8, %v1554_v17  ;;  %v1566_v30 = vsub.f32 %v6725_v9, %v1557_v62 }
 0x51f   :  { %v6823_v31 = vpop.eup %5882  ;;  %5894 = vpow2.f32 %v1569_v16 }
 0x520   :  { %v1571_v3 = vmul.f32 1.442695, %v1565_v28  ;;  %v1573_v33 = vmul.f32 1.442695, %v1566_v30  ;;  %v969_v4 = vsel %vm626_vm11, %v6823_v31, 0.0 }
 0x521   :  { %v1560_v34 = vpop.xlane.xlu1 %1559  ;;  %970 = vadd.xlane.f32.xlu0 %v969_v4  ;;  %v1563_v35 = vpop.xlane.xlu0 %1562 }
 0x522   :  { %5896 = vpow2.f32 %v1571_v3  ;;  %v1567_v36 = vsub.f32 %v6733_v13, %v1560_v34  ;;  %v1568_v42 = vsub.f32 %v6737_v15, %v1563_v35 }
 0x523   :  { %v6829_v43 = vpop.eup %5884  ;;  %5898 = vpow2.f32 %v1573_v33 }
 0x524   :  { %v6831_v8 = vpop.eup %5886  ;;  %v1575_v9 = vmul.f32 1.442695, %v1567_v36  ;;  %v1268_v41 = vsel %vm613_vm10, %v6829_v43, 0.0  ;;  %v1577_v47 = vmul.f32 1.442695, %v1568_v42 }
 0x525   :  { %1269 = vadd.xlane.f32.xlu1 %v1268_v41  ;;  %v1271_v46 = vsel %vm613_vm10, %v6831_v8, 0.0 }
 0x526   :  { %5900 = vpow2.f32 %v1575_v9  ;;  %1272 = vadd.xlane.f32.xlu0 %v1271_v46 }
 0x527   :  { %v6837_v45 = vpop.eup %5888  ;;  %5902 = vpow2.f32 %v1577_v47 }
 0x528   :  { %v6839_v13 = vpop.eup %5890  ;;  %v1274_v15 = vsel %vm613_vm10, %v6837_v45, 0.0 }
 0x529   :  { %1275 = vadd.xlane.f32.xlu1 %v1274_v15  ;;  %v1277_v48 = vsel %vm613_vm10, %v6839_v13, 0.0 }
 0x52a   :  { %1278 = vadd.xlane.f32.xlu0 %v1277_v48 }
 0x52b   :  { %v6845_v49 = vpop.eup %5892 }
 0x52c   :  { %v6847_v56 = vpop.eup %5894  ;;  %v1280_v18 = vsel %vm626_vm11, %v6845_v49, 0.0 }
 0x52d   :  { %v1579_v58 = vsel %vm613_vm10, %v6847_v56, 0.0 }
 0x52e   :  { %1580 = vadd.xlane.f32.xlu1 %v1579_v58  ;;  %1281 = vadd.xlane.f32.xlu0 %v1280_v18 }
 0x52f   :  { %v6853_v61 = vpop.eup %5896 }
 0x530   :  { %v6855_v63 = vpop.eup %5898  ;;  %v1582_v2 = vsel %vm613_vm10, %v6853_v61, 0.0 }
 0x531   :  { %v1585_v50 = vsel %vm613_vm10, %v6855_v63, 0.0 }
 0x532   :  { %1586 = vadd.xlane.f32.xlu1 %v1585_v50  ;;  %1583 = vadd.xlane.f32.xlu0 %v1582_v2 }
 0x533   :  { %v6861_v7 = vpop.eup %5900 }
 0x534   :  { %v1588_v11 = vsel %vm613_vm10, %v6861_v7, 0.0  ;;  %v6865_v54 = vpop.eup %5902 }
 0x535   :  { %v1591_v55 = vsel %vm626_vm11, %v6865_v54, 0.0 }
 0x536   :  { %1589 = vadd.xlane.f32.xlu0 %v1588_v11 }
 0x53a   :  { %1592 = vadd.xlane.f32.xlu0 %v1591_v55 }
 0x543   :  { %1606 = vrot.lane.b32.xlu1 %v6376_v52, %s8284_s24 }
 0x550   :  { %1604 = vrot.lane.b32.xlu0 %v6374_v51, %s8284_s24 }
 0x559   :  { %v647_v6 = vpop.xlane.xlu1 %646 }
 0x55a   :  { %5904 = vrcp.f32 %v647_v6 }
 0x55d   :  { %v650_v16 = vpop.xlane.xlu0 %649 }
 0x55e   :  { %5906 = vrcp.f32 %v650_v16 }
 0x561   :  { %v653_v60 = vpop.xlane.xlu1 %652 }
 0x562   :  { %5908 = vrcp.f32 %v653_v60 }
 0x565   :  { %v656_v17 = vpop.xlane.xlu0 %655 }
 0x566   :  { %5910 = vrcp.f32 %v656_v17 }
 0x567   :  { %v5905_v62 = vpop.eup %5904 }
 0x568   :  { %v665_v28 = vmul.f32 %v5905_v62, %v6766_v44 }
 0x569   :  { %v659_v30 = vpop.xlane.xlu1 %658 }
 0x56a   :  { %5912 = vrcp.f32 %v659_v30  ;;  %5274 = vmatmul.mubr.msk.f32.vlgmr.msra.gmra.mxu1 %vm613_vm10, %v665_v28 }
 0x56b   :  { %v5907_v3 = vpop.eup %5906  ;;  %5314 = vmatpush3.msk.msra.mxu1 %vm699_vm6, %v6747_v21  ;;  %5276 = vmatprep.mubr.msk.f32.mxu1 %vm6110_vm4, %v6109_v59 }
 0x56c   :  { %5315 = vmatprep.subr.mxu1 %v6109_v59  ;;  %v666_v51 = vmul.f32 %v5907_v3, %v6771_v57 }
 0x56d   :  { %5316 = vmatpush3.msra.mxu1 %v6743_v19  ;;  %v959_v52 = vpop.xlane.xlu1 %958 }
 0x56e   :  { %5317 = vmatprep.subr.mxu1 %v6109_v59  ;;  %5914 = vrcp.f32 %v959_v52  ;;  %5277 = vmatmul.mubr.msk.f32.gmra.mxu1 %vm613_vm10, %v666_v51 }
 0x56f   :  { %v5909_v44 = vpop.eup %5908  ;;  %5318 = vmatpush3.msra.mxu1 %v6751_v23  ;;  %5279 = vmatprep.mubr.msk.f32.mxu1 %vm6110_vm4, %v6109_v59 }
 0x570   :  { %5319 = vmatprep.subr.mxu1 %v6109_v59  ;;  %v667_v21 = vmul.f32 %v5909_v44, %v6776_v1 }
 0x571   :  { %5320 = vmatpush3.msra.mxu1 %v6745_v20  ;;  %v962_v57 = vpop.xlane.xlu0 %961 }
 0x572   :  { %5321 = vmatprep.subr.mxu1 %v6109_v59  ;;  %5916 = vrcp.f32 %v962_v57  ;;  %5280 = vmatmul.mubr.msk.f32.gmra.mxu1 %vm613_vm10, %v667_v21 }
 0x573   :  { %v5911_v19 = vpop.eup %5910  ;;  %5322 = vmatpush3.msra.mxu1 %v6749_v22  ;;  %5282 = vmatprep.mubr.msk.f32.mxu1 %vm6110_vm4, %v6109_v59 }
 0x574   :  { %v668_v23 = vmul.f32 %v5911_v19, %v6781_v12  ;;  %5363 = vmatprep.subr.mxu1 %v6109_v59 }
 0x575   :  { %v965_v33 = vpop.xlane.xlu1 %964 }
 0x576   :  { %5918 = vrcp.f32 %v965_v33  ;;  %5283 = vmatmul.mubr.msk.f32.gmra.mxu1 %vm613_vm10, %v668_v23 }
 0x577   :  { %v5913_v20 = vpop.eup %5912  ;;  %5285 = vmatprep.mubr.msk.f32.mxu1 %vm6110_vm4, %v6109_v59 }
 0x578   :  { %v669_v1 = vmul.f32 %v5913_v20, %v6785_v10 }
 0x57a   :  { %5286 = vmatmul.mubr.msk.f32.gmra.mxu1 %vm613_vm10, %v669_v1 }
 0x57b   :  { %v5915_v22 = vpop.eup %5914  ;;  %5323 = vmatprep.mubr.msk.f32.mxu1 %vm6110_vm4, %v6109_v59 }
 0x57c   :  { %v977_v12 = vmul.f32 %v5915_v22, %v6789_v29 }
 0x57e   :  { %5324 = vmatmul.mubr.msk.f32.vlgmr.msra.gmra.mxu1 %vm613_vm10, %v977_v12 }
 0x57f   :  { %v5917_v4 = vpop.eup %5916  ;;  %5364 = vmatpush3.msk.msra.mxu1 %vm699_vm6, %v6755_v25  ;;  %5326 = vmatprep.mubr.msk.f32.mxu1 %vm6110_vm4, %v6109_v59 }
 0x580   :  { %5365 = vmatprep.subr.mxu1 %v6109_v59  ;;  %v978_v10 = vmul.f32 %v5917_v4, %v6793_v14  ;;  %v1611_v14 = vpop.permute.xlu1 %1610 }
 0x581   :  { %5366 = vmatpush3.msra.mxu1 %v6753_v24  ;;  %v1609_v24 = vpop.permute.xlu0 %1608 }
 0x582   :  { %5367 = vmatprep.subr.mxu1 %v6109_v59  ;;  %5327 = vmatmul.mubr.msk.f32.gmra.mxu1 %vm613_vm10, %v978_v10  ;;  %v1804_v10 = vld [vmem:[%s8267_s10 + $0x18] sm:$0xff] }
 0x583   :  { %v5919_v29 = vpop.eup %5918  ;;  %5368 = vmatpush3.msra.mxu1 %v6759_v27  ;;  %5329 = vmatprep.mubr.msk.f32.mxu1 %vm6110_vm4, %v6109_v59 }
 0x584   :  { %5369 = vmatprep.subr.mxu1 %v6109_v59  ;;  %v979_v25 = vmul.f32 %v5919_v29, %v6797_v32  ;;  %5439 = vmatpush3.msra.mxu0 %v1804_v10  ;;  %v4802_v10 = vld [vmem:[%s8268_s11] ss:$0 sm:$0xff] }
 0x585   :  { %5370 = vmatpush3.msra.mxu1 %v6757_v26  ;;  %5440 = vmatprep.subr.mxu0 %v6109_v59 }
 0x586   :  { %5371 = vmatprep.subr.mxu1 %v6109_v59  ;;  %5330 = vmatmul.mubr.msk.f32.gmra.mxu1 %vm613_vm10, %v979_v25 }
 0x587   :  { %5372 = vmatpush3.msra.mxu1 %v6808_v39  ;;  %5332 = vmatprep.mubr.msk.f32.mxu1 %vm6110_vm4, %v6109_v59 }
 0x588   :  { %5413 = vmatprep.subr.mxu1 %v6109_v59 }
 0x5a6   :  { %v968_v27 = vpop.xlane.xlu0 %967 }
 0x5a7   :  { %5920 = vrcp.f32 %v968_v27  ;;  %v1803_v27 = vld [vmem:[%s8267_s10 + $0x10] sm:$0xff] }
 0x5a8   :  { %5441 = vmatpush3.msra.mxu0 %v1803_v27  ;;  %v6104_v27 = vld [vmem:[#allocation2] sm:$0xff] }
 0x5a9   :  { %5442 = vmatprep.subr.mxu0 %v6109_v59 }
 0x5aa   :  { %v971_v34 = vpop.xlane.xlu0 %970 }
 0x5ab   :  { %5922 = vrcp.f32 %v971_v34 }
 0x5ae   :  { %v1270_v32 = vpop.xlane.xlu1 %1269 }
 0x5af   :  { %5924 = vrcp.f32 %v1270_v32  ;;  %v1273_v26 = vpop.xlane.xlu0 %1272  ;;  %v1801_v32 = vld [vmem:[%s8267_s10] sm:$0xff] }
 0x5b0   :  { %5926 = vrcp.f32 %v1273_v26 }
 0x5b2   :  { %v1276_v35 = vpop.xlane.xlu1 %1275 }
 0x5b3   :  { %v1279_v36 = vpop.xlane.xlu0 %1278  ;;  %5928 = vrcp.f32 %v1276_v35 }
 0x5b4   :  { %v5921_v42 = vpop.eup %5920  ;;  %5930 = vrcp.f32 %v1279_v36 }
 0x5b5   :  { %v980_v39 = vmul.f32 %v5921_v42, %v6815_v5 }
 0x5b7   :  { %v1282_v9 = vpop.xlane.xlu0 %1281  ;;  %5333 = vmatmul.mubr.msk.f32.gmra.mxu1 %vm613_vm10, %v980_v39  ;;  %v1581_v47 = vpop.xlane.xlu1 %1580 }
 0x5b8   :  { %v5923_v41 = vpop.eup %5922  ;;  %5335 = vmatprep.mubr.msk.f32.mxu1 %vm6110_vm4, %v6109_v59  ;;  %5932 = vrcp.f32 %v1282_v9 }
 0x5b9   :  { %v981_v46 = vmul.f32 %v5923_v41, %v6823_v31  ;;  %5934 = vrcp.f32 %v1581_v47 }
 0x5bb   :  { %v1584_v15 = vpop.xlane.xlu0 %1583  ;;  %5336 = vmatmul.mubr.msk.f32.gmra.mxu1 %vm613_vm10, %v981_v46  ;;  %v1587_v58 = vpop.xlane.xlu1 %1586 }
 0x5bc   :  { %v5925_v48 = vpop.eup %5924  ;;  %5373 = vmatprep.mubr.msk.f32.mxu1 %vm6110_vm4, %v6109_v59  ;;  %5936 = vrcp.f32 %v1584_v15 }
 0x5bd   :  { %v1288_v5 = vmul.f32 %v5925_v48, %v6829_v43  ;;  %v5927_v18 = vpop.eup %5926  ;;  %5938 = vrcp.f32 %v1587_v58 }
 0x5be   :  { %v1289_v31 = vmul.f32 %v5927_v18, %v6831_v8 }
 0x5bf   :  { %v1590_v2 = vpop.xlane.xlu0 %1589  ;;  %5374 = vmatmul.mubr.msk.f32.vlgmr.msra.gmra.mxu1 %vm613_vm10, %v1288_v5 }
 0x5c0   :  { %5414 = vmatpush3.msk.msra.mxu1 %vm699_vm6, %v6806_v38  ;;  %5376 = vmatprep.mubr.msk.f32.mxu1 %vm6110_vm4, %v6109_v59  ;;  %v5929_v50 = vpop.eup %5928  ;;  %v1607_v38 = vpop.permute.xlu1 %1606  ;;  %5940 = vrcp.f32 %v1590_v2 }
 0x5c1   :  { %5415 = vmatprep.subr.mxu1 %v6109_v59  ;;  %v1290_v11 = vmul.f32 %v5929_v50, %v6837_v45  ;;  %v5931_v55 = vpop.eup %5930 }
 0x5c2   :  { %5416 = vmatpush3.msra.mxu1 %v1611_v14  ;;  %v1291_v6 = vmul.f32 %v5931_v55, %v6839_v13  ;;  %v1802_v14 = vld [vmem:[%s8267_s10 + $0x8] sm:$0xff] }
 0x5c3   :  { %5417 = vmatprep.subr.mxu1 %v6109_v59  ;;  %v1593_v43 = vpop.xlane.xlu0 %1592  ;;  %5377 = vmatmul.mubr.msk.f32.gmra.mxu1 %vm613_vm10, %v1289_v31 }
 0x5c4   :  { %5418 = vmatpush3.msra.mxu1 %v1609_v24  ;;  %5379 = vmatprep.mubr.msk.f32.mxu1 %vm6110_vm4, %v6109_v59  ;;  %5942 = vrcp.f32 %v1593_v43 }
 0x5c5   :  { %5419 = vmatprep.subr.mxu1 %v6109_v59  ;;  %v5933_v16 = vpop.eup %5932  ;;  %5443 = vmatpush3.msra.mxu0 %v1802_v14 }
 0x5c6   :  { %5420 = vmatpush3.msra.mxu1 %v1607_v38  ;;  %v1292_v45 = vmul.f32 %v5933_v16, %v6845_v49  ;;  %v5935_v60 = vpop.eup %5934  ;;  %5444 = vmatprep.subr.mxu0 %v6109_v59 }
 0x5c7   :  { %5421 = vmatprep.subr.mxu1 %v6109_v59  ;;  %v1605_v8 = vpop.permute.xlu0 %1604  ;;  %5380 = vmatmul.mubr.msk.f32.gmra.mxu1 %vm613_vm10, %v1290_v11  ;;  %v1599_v17 = vmul.f32 %v5935_v60, %v6847_v56 }
 0x5c8   :  { %5422 = vmatpush3.msra.mxu1 %v1605_v8  ;;  %5382 = vmatprep.mubr.msk.f32.mxu1 %vm6110_vm4, %v6109_v59 }
 0x5c9   :  { %5461 = vmatprep.subr.mxu1 %v6109_v59  ;;  %v5937_v13 = vpop.eup %5936  ;;  %5445 = vmatpush3.msra.mxu0 %v1801_v32 }
 0x5ca   :  { %v1600_v62 = vmul.f32 %v5937_v13, %v6853_v61  ;;  %v5939_v28 = vpop.eup %5938  ;;  %5484 = vmatprep.subr.mxu0 %v6109_v59 }
 0x5cb   :  { %5383 = vmatmul.mubr.msk.f32.gmra.mxu1 %vm613_vm10, %v1291_v6  ;;  %v1601_v49 = vmul.f32 %v5939_v28, %v6855_v63 }
 0x5cc   :  { %5385 = vmatprep.mubr.msk.f32.mxu1 %vm6110_vm4, %v6109_v59 }
 0x5cd   :  { %v5941_v30 = vpop.eup %5940 }
 0x5ce   :  { %v1602_v56 = vmul.f32 %v5941_v30, %v6861_v7 }
 0x5cf   :  { %5386 = vmatmul.mubr.msk.f32.gmra.mxu1 %vm613_vm10, %v1292_v45 }
 0x5d0   :  { %5423 = vmatprep.mubr.msk.f32.mxu1 %vm6110_vm4, %v6109_v59 }
 0x5d1   :  { %v5943_v3 = vpop.eup %5942 }
 0x5d2   :  { %v1603_v61 = vmul.f32 %v5943_v3, %v6865_v54 }
 0x5d3   :  { %5424 = vmatmul.mubr.msk.f32.vlgmr.msra.gmra.mxu1 %vm613_vm10, %v1599_v17 }
 0x5d4   :  { %5426 = vmatprep.mubr.msk.f32.mxu1 %vm6110_vm4, %v6109_v59 }
 0x5d7   :  { %5427 = vmatmul.mubr.msk.f32.gmra.mxu1 %vm613_vm10, %v1600_v62 }
 0x5d8   :  { %5429 = vmatprep.mubr.msk.f32.mxu1 %vm6110_vm4, %v6109_v59 }
 0x5db   :  { %5430 = vmatmul.mubr.msk.f32.gmra.mxu1 %vm613_vm10, %v1601_v49 }
 0x5dc   :  { %5432 = vmatprep.mubr.msk.f32.mxu1 %vm6110_vm4, %v6109_v59 }
 0x5df   :  { %5433 = vmatmul.mubr.msk.f32.gmra.mxu1 %vm613_vm10, %v1602_v56 }
 0x5e0   :  { %5435 = vmatprep.mubr.msk.f32.mxu1 %vm6110_vm4, %v6109_v59 }
 0x5e3   :  { %5436 = vmatmul.mubr.msk.f32.gmra.mxu1 %vm613_vm10, %v1603_v61 }
 0x5e4   :  { %5469 = vmatprep.mubr.msk.f32.mxu1 %vm6110_vm4, %v6109_v59 }
 0x62a   :  { %v6982_v63 = vpop.f32.mrf.mxu1 }
 0x62c   :  { %v5275_v51 = vpop.f32.mrf.mxu1 }
 0x62e   :  { %v6984_v52 = vpop.f32.mrf.mxu1 }
 0x630   :  { %v5278_v44 = vpop.f32.mrf.mxu1 }
 0x632   :  { %v6986_v7 = vpop.f32.mrf.mxu1 }
 0x634   :  { %v5281_v21 = vpop.f32.mrf.mxu1 }
 0x636   :  { %v6988_v57 = vpop.f32.mrf.mxu1 }
 0x638   :  { %v5284_v19 = vpop.f32.mrf.mxu1 }
 0x63a   :  { %v6990_v23 = vpop.f32.mrf.mxu1 }
 0x63c   :  { %v5287_v54 = vpop.f32.mrf.mxu1 }
 0x63e   :  { %v1079_v33 = vpop.f32.mrf.mxu1 }
 0x63f   :  { %1730 = vrot.lane.b32.xlu1 %v1079_v33, %s8298_s8 }
 0x640   :  { %v5325_v20 = vpop.f32.mrf.mxu1 }
 0x642   :  { %v1084_v1 = vpop.f32.mrf.mxu1 }
 0x643   :  { %1732 = vrot.lane.b32.xlu0 %v1084_v1, %s8298_s8 }
 0x644   :  { %v5328_v22 = vpop.f32.mrf.mxu1 }
 0x646   :  { %v1089_v12 = vpop.f32.mrf.mxu1 }
 0x647   :  { %1734 = vrot.lane.b32.xlu1 %v1089_v12, %s8298_s8 }
 0x648   :  { %v5331_v4 = vpop.f32.mrf.mxu1 }
 0x677   :  { %v1094_v29 = vpop.f32.mrf.mxu1 }
 0x679   :  { %v5334_v25 = vpop.f32.mrf.mxu1 }
 0x67b   :  { %v1099_v24 = vpop.f32.mrf.mxu1 }
 0x67d   :  { %v5337_v34 = vpop.f32.mrf.mxu1 }
 0x67f   :  { %v1390_v26 = vpop.f32.mrf.mxu1 }
 0x680   :  { %1750 = vrot.lane.b32.xlu0 %v1390_v26, %s8296_s1 }
 0x681   :  { %v5375_v35 = vpop.f32.mrf.mxu1 }
 0x682   :  { %v6105_v35 = vld [vmem:[#allocation2 + $0x8] sm:$0xff] }
 0x683   :  { %v1395_v36 = vpop.f32.mrf.mxu1 }
 0x684   :  { %1752 = vrot.lane.b32.xlu1 %v1395_v36, %s8296_s1 }
 0x685   :  { %v5378_v42 = vpop.f32.mrf.mxu1 }
 0x687   :  { %v1400_v39 = vpop.f32.mrf.mxu1 }
 0x688   :  { %1754 = vrot.lane.b32.xlu0 %v1400_v39, %s8296_s1 }
 0x689   :  { %v5381_v9 = vpop.f32.mrf.mxu1 }
 0x68b   :  { %v1405_v41 = vpop.f32.mrf.mxu1 }
 0x68d   :  { %v5384_v47 = vpop.f32.mrf.mxu1 }
 0x68e   :  { %v6106_v47 = vld [vmem:[#allocation2 + $0x10] sm:$0xff] }
 0x68f   :  { %v1410_v46 = vpop.f32.mrf.mxu1 }
 0x691   :  { %v5387_v15 = vpop.f32.mrf.mxu1 }
 0x693   :  { %v1701_v48 = vpop.f32.mrf.mxu1 }
 0x694   :  { %1770 = vrot.lane.b32.xlu1 %v1701_v48, %s8294_s23 }
 0x695   :  { %v5425_v5 = vpop.f32.mrf.mxu1 }
 0x697   :  { %v1706_v18 = vpop.f32.mrf.mxu1 }
 0x698   :  { %1756 = vrot.lane.b32.xlu1 %v1405_v41, %s8296_s1  ;;  %1772 = vrot.lane.b32.xlu0 %v1706_v18, %s8294_s23 }
 0x699   :  { %v5428_v58 = vpop.f32.mrf.mxu1 }
 0x69a   :  { %v6107_v58 = vld [vmem:[#allocation2 + $0x18] sm:$0xff] }
 0x69b   :  { %v1711_v2 = vpop.f32.mrf.mxu1 }
 0x69c   :  { %1736 = vrot.lane.b32.xlu0 %v1094_v29, %s8298_s8  ;;  %1774 = vrot.lane.b32.xlu1 %v1711_v2, %s8294_s23 }
 0x69d   :  { %v5431_v31 = vpop.f32.mrf.mxu1 }
 0x69f   :  { %v1716_v50 = vpop.f32.mrf.mxu1 }
 0x6a0   :  { %1738 = vrot.lane.b32.xlu1 %v1099_v24, %s8298_s8  ;;  %1776 = vrot.lane.b32.xlu0 %v1716_v50, %s8294_s23  ;;  %s8326_s8 = smov 16  }
 0x6a1   :  { %v5434_v43 = vpop.f32.mrf.mxu1 }
 0x6a3   :  { %v1721_v38 = vpop.f32.mrf.mxu1 }
 0x6a4   :  { %1758 = vrot.lane.b32.xlu0 %v1410_v46, %s8296_s1  ;;  %1778 = vrot.lane.b32.xlu1 %v1721_v38, %s8294_s23 }
 0x6a5   :  { %v5437_v11 = vpop.f32.mrf.mxu1 }
 0x6a6   :  { %v6108_v11 = vld [vmem:[#allocation2 + $0x20] sm:$0x3] }
 0x6b1   :  { %v1731_v55 = vpop.permute.xlu1 %1730 }
 0x6b2   :  { %v1785_v60 = vsel %vm492_vm5, %v6982_v63, %v1731_v55 }
 0x6b5   :  { %v1733_v8 = vpop.permute.xlu0 %1732 }
 0x6b6   :  { %v1786_v49 = vsel %vm492_vm5, %v6984_v52, %v1733_v8 }
 0x6b9   :  { %v1735_v6 = vpop.permute.xlu1 %1734 }
 0x6ba   :  { %v1787_v63 = vsel %vm492_vm5, %v6986_v7, %v1735_v6 }
 0x6f2   :  { %v1751_v16 = vpop.permute.xlu0 %1750 }
 0x6f3   :  { %v1790_v17 = vsel %vm86_vm0, %v1785_v60, %v1751_v16 }
 0x6f6   :  { %v1753_v45 = vpop.permute.xlu1 %1752 }
 0x6f7   :  { %v1791_v30 = vsel %vm86_vm0, %v1786_v49, %v1753_v45 }
 0x6fa   :  { %v1755_v13 = vpop.permute.xlu0 %1754 }
 0x6fb   :  { %v1792_v51 = vsel %vm86_vm0, %v1787_v63, %v1755_v13 }
 0x706   :  { %v1771_v62 = vpop.permute.xlu1 %1770 }
 0x707   :  { %v1796_v28 = vsel %vm1795_vm12, %v1790_v17, %v1771_v62 }
 0x708   :  { %5447 = vmatmul.mubr.msk.f32.vlgmr.msra.gmra.mxu0 %vm193_vm2, %v1796_v28 }
 0x709   :  { %5449 = vmatprep.mubr.msk.f32.mxu0 %vm6110_vm4, %v6109_v59 }
 0x70a   :  { %v1757_v56 = vpop.permute.xlu1 %1756  ;;  %v1773_v3 = vpop.permute.xlu0 %1772 }
 0x70b   :  { %v1797_v61 = vsel %vm1795_vm12, %v1791_v30, %v1773_v3 }
 0x70c   :  { %5450 = vmatmul.mubr.msk.f32.gmra.mxu0 %vm193_vm2, %v1797_v61 }
 0x70d   :  { %5452 = vmatprep.mubr.msk.f32.mxu0 %vm6110_vm4, %v6109_v59 }
 0x70e   :  { %v1737_v52 = vpop.permute.xlu0 %1736  ;;  %v1775_v44 = vpop.permute.xlu1 %1774 }
 0x70f   :  { %v1788_v21 = vsel %vm492_vm5, %v6988_v57, %v1737_v52  ;;  %v1798_v19 = vsel %vm1795_vm12, %v1792_v51, %v1775_v44 }
 0x710   :  { %5453 = vmatmul.mubr.msk.f32.gmra.mxu0 %vm193_vm2, %v1798_v19  ;;  %v1793_v7 = vsel %vm86_vm0, %v1788_v21, %v1757_v56 }
 0x711   :  { %5455 = vmatprep.mubr.msk.f32.mxu0 %vm6110_vm4, %v6109_v59 }
 0x712   :  { %v1739_v54 = vpop.permute.xlu1 %1738  ;;  %v1777_v33 = vpop.permute.xlu0 %1776 }
 0x713   :  { %v1799_v20 = vsel %vm1795_vm12, %v1793_v7, %v1777_v33  ;;  %v1789_v57 = vsel %vm492_vm5, %v6990_v23, %v1739_v54 }
 0x714   :  { %5456 = vmatmul.mubr.msk.f32.gmra.mxu0 %vm193_vm2, %v1799_v20 }
 0x715   :  { %5458 = vmatprep.mubr.msk.f32.mxu0 %vm6110_vm4, %v6109_v59 }
 0x716   :  { %v1759_v1 = vpop.permute.xlu0 %1758  ;;  %v1779_v22 = vpop.permute.xlu1 %1778 }
 0x717   :  { %v1794_v12 = vsel %vm86_vm0, %v1789_v57, %v1759_v1 }
 0x718   :  { %v1800_v4 = vsel %vm1795_vm12, %v1794_v12, %v1779_v22  ;;  %v2014_v22 = vld [vmem:[%s8269_s14 + $0x18] sm:$0xff]  ;;  %v2013_v12 = vld [vmem:[%s8269_s14 + $0x10] sm:$0xff] }
 0x719   :  { %5459 = vmatmul.mubr.msk.f32.gmra.mxu0 %vm193_vm2, %v1800_v4  ;;  %5462 = vmatpush3.msra.mxu1 %v2014_v22  ;;  %v2012_v4 = vld [vmem:[%s8269_s14 + $0x8] sm:$0xff] }
 0x71a   :  { %5500 = vmatprep.mubr.msk.f32.mxu0 %vm6110_vm4, %v6109_v59  ;;  %5463 = vmatprep.subr.mxu1 %v6109_v59 }
 0x71b   :  { %5464 = vmatpush3.msra.mxu1 %v2013_v12 }
 0x71c   :  { %5465 = vmatprep.subr.mxu1 %v6109_v59 }
 0x71d   :  { %5466 = vmatpush3.msra.mxu1 %v2012_v4 }
 0x71e   :  { %5467 = vmatprep.subr.mxu1 %v6109_v59 }
 0x7c8   :  { %v1893_v29 = vpop.f32.mrf.mxu0 }
 0x7c9   :  { %v1894_v25 = vadd.f32 %v4802_v10, %v1893_v29 }
 0x7ca   :  { %v5448_v24 = vpop.f32.mrf.mxu0 }
 0x7cb   :  { %v7061_v23 = vadd.f32 %v6104_v27, %v1894_v25 }
 0x7cc   :  { %v1898_v14 = vpop.f32.mrf.mxu0 }
 0x7cd   :  { %v1899_v34 = vadd.f32 %v4802_v10, %v1898_v14  ;;  %v1924_v32 = vsel %vm193_vm2, %v7061_v23, 0.0 }
 0x7ce   :  { %v5451_v26 = vpop.f32.mrf.mxu0  ;;  %1925 = vadd.xlane.f32.xlu0 %v1924_v32 }
 0x7cf   :  { %v7065_v36 = vadd.f32 %v6105_v35, %v1899_v34 }
 0x7d0   :  { %v1903_v42 = vpop.f32.mrf.mxu0 }
 0x7d1   :  { %v1904_v39 = vadd.f32 %v4802_v10, %v1903_v42  ;;  %v1927_v9 = vsel %vm193_vm2, %v7065_v36, 0.0 }
 0x7d2   :  { %v5454_v41 = vpop.f32.mrf.mxu0  ;;  %1928 = vadd.xlane.f32.xlu1 %v1927_v9 }
 0x7d3   :  { %v7069_v46 = vadd.f32 %v6106_v47, %v1904_v39 }
 0x7d4   :  { %v1908_v15 = vpop.f32.mrf.mxu0 }
 0x7d5   :  { %v1909_v48 = vadd.f32 %v4802_v10, %v1908_v15  ;;  %v1930_v5 = vsel %vm193_vm2, %v7069_v46, 0.0  ;;  %v4808_v15 = vld [vmem:[%s8270_s12] ss:$0 sm:$0xff] }
 0x7d6   :  { %1931 = vadd.xlane.f32.xlu0 %v1930_v5  ;;  %v5457_v18 = vpop.f32.mrf.mxu0 }
 0x7d7   :  { %v7073_v2 = vadd.f32 %v6107_v58, %v1909_v48  ;;  %v4809_v58 = vld [vmem:[%s8271_s13] ss:$0 sm:$0xff] }
 0x7d9   :  { %v1913_v31 = vpop.f32.mrf.mxu0  ;;  %v1933_v50 = vsel %vm193_vm2, %v7073_v2, 0.0 }
 0x7da   :  { %v1914_v43 = vadd.f32 %v4802_v10, %v1913_v31  ;;  %1934 = vadd.xlane.f32.xlu0 %v1933_v50  ;;  %v2011_v10 = vld [vmem:[%s8269_s14] sm:$0xff] }
 0x7db   :  { %v5460_v38 = vpop.f32.mrf.mxu0  ;;  %5468 = vmatpush3.msra.mxu1 %v2011_v10 }
 0x7dc   :  { %v7077_v55 = vadd.f32 %v6108_v11, %v1914_v43  ;;  %5515 = vmatprep.subr.mxu1 %v6109_v59 }
 0x7de   :  { %v1936_v8 = vsel %vm279_vm3, %v7077_v55, 0.0 }
 0x7df   :  { %1937 = vadd.xlane.f32.xlu0 %v1936_v8 }
 0x857   :  { %v1926_v6 = vpop.xlane.xlu0 %1925 }
 0x858   :  { %v1939_v16 = vmul.f32 0.03125, %v1926_v6 }
 0x85a   :  { %v7082_v45 = vsub.f32 %v7061_v23, %v1939_v16 }
 0x85b   :  { %v1929_v60 = vpop.xlane.xlu1 %1928 }
 0x85c   :  { %v1940_v17 = vmul.f32 0.03125, %v1929_v60  ;;  %v1949_v13 = vmul.f32 %v7082_v45, %v7082_v45 }
 0x85e   :  { %v7087_v62 = vsub.f32 %v7065_v36, %v1940_v17  ;;  %v1954_v28 = vsel %vm193_vm2, %v1949_v13, 0.0 }
 0x85f   :  { %v1932_v49 = vpop.xlane.xlu0 %1931  ;;  %1955 = vadd.xlane.f32.xlu1 %v1954_v28 }
 0x860   :  { %v1941_v30 = vmul.f32 0.03125, %v1932_v49  ;;  %v1950_v56 = vmul.f32 %v7087_v62, %v7087_v62 }
 0x862   :  { %v7093_v3 = vsub.f32 %v7069_v46, %v1941_v30  ;;  %v1957_v61 = vsel %vm193_vm2, %v1950_v56, 0.0 }
 0x863   :  { %v1935_v63 = vpop.xlane.xlu0 %1934  ;;  %1958 = vadd.xlane.f32.xlu0 %v1957_v61  ;;  %v2269_v61 = vld [vmem:[%s8272_s16 + $0x38] sm:$0xff] }
 0x864   :  { %v1942_v51 = vmul.f32 0.03125, %v1935_v63  ;;  %v1951_v52 = vmul.f32 %v7093_v3, %v7093_v3  ;;  %5485 = vmatpush3.msra.mxu0 %v2269_v61  ;;  %v2268_v63 = vld [vmem:[%s8272_s16 + $0x30] sm:$0xff] }
 0x865   :  { %5486 = vmatprep.subr.mxu0 %v6109_v59 }
 0x866   :  { %v7099_v44 = vsub.f32 %v7073_v2, %v1942_v51  ;;  %v1960_v21 = vsel %vm193_vm2, %v1951_v52, 0.0  ;;  %5487 = vmatpush3.msra.mxu0 %v2268_v63  ;;  %v2267_v51 = vld [vmem:[%s8272_s16 + $0x28] sm:$0xff]  ;;  %v2266_v52 = vld [vmem:[%s8272_s16 + $0x20] sm:$0xff] }
 0x867   :  { %1961 = vadd.xlane.f32.xlu1 %v1960_v21  ;;  %5488 = vmatprep.subr.mxu0 %v6109_v59  ;;  %v2264_v21 = vld [vmem:[%s8272_s16 + $0x10] sm:$0xff] }
 0x868   :  { %v1938_v19 = vpop.xlane.xlu0 %1937  ;;  %v1952_v54 = vmul.f32 %v7099_v44, %v7099_v44  ;;  %5489 = vmatpush3.msra.mxu0 %v2267_v51 }
 0x869   :  { %v1943_v7 = vmul.f32 0.03125, %v1938_v19  ;;  %5490 = vmatprep.subr.mxu0 %v6109_v59  ;;  %v2263_v19 = vld [vmem:[%s8272_s16 + $0x8] sm:$0xff] }
 0x86a   :  { %v1963_v33 = vsel %vm193_vm2, %v1952_v54, 0.0  ;;  %5491 = vmatpush3.msra.mxu0 %v2266_v52  ;;  %v2262_v54 = vld [vmem:[%s8272_s16] sm:$0xff] }
 0x86b   :  { %v7106_v20 = vsub.f32 %v7077_v55, %v1943_v7  ;;  %1964 = vadd.xlane.f32.xlu0 %v1963_v33  ;;  %5492 = vmatprep.subr.mxu0 %v6109_v59  ;;  %v4810_v7 = vld [vmem:[%s8273_s15] ss:$0 sm:$0xff] }
 0x86d   :  { %v1953_v57 = vmul.f32 %v7106_v20, %v7106_v20 }
 0x86f   :  { %v1966_v1 = vsel %vm279_vm3, %v1953_v57, 0.0 }
 0x870   :  { %1967 = vadd.xlane.f32.xlu1 %v1966_v1 }
 0x8e8   :  { %v1956_v29 = vpop.xlane.xlu1 %1955 }
 0x8e9   :  { %v1969_v25 = vmul.f32 0.03125, %v1956_v29 }
 0x8eb   :  { %v1974_v24 = vadd.f32 1e-06, %v1969_v25 }
 0x8ec   :  { %v1959_v27 = vpop.xlane.xlu0 %1958 }
 0x8ed   :  { %5944 = vrsqrt.f32 %v1974_v24  ;;  %v1970_v14 = vmul.f32 0.03125, %v1959_v27 }
 0x8ef   :  { %v1975_v34 = vadd.f32 1e-06, %v1970_v14 }
 0x8f0   :  { %v1962_v32 = vpop.xlane.xlu1 %1961 }
 0x8f1   :  { %5946 = vrsqrt.f32 %v1975_v34  ;;  %v1971_v26 = vmul.f32 0.03125, %v1962_v32 }
 0x8f3   :  { %v1976_v35 = vadd.f32 1e-06, %v1971_v26 }
 0x8f4   :  { %v1965_v42 = vpop.xlane.xlu0 %1964 }
 0x8f5   :  { %5948 = vrsqrt.f32 %v1976_v35  ;;  %v1972_v39 = vmul.f32 0.03125, %v1965_v42 }
 0x8f7   :  { %v1977_v9 = vadd.f32 1e-06, %v1972_v39 }
 0x8f9   :  { %5950 = vrsqrt.f32 %v1977_v9  ;;  %v1968_v41 = vpop.xlane.xlu1 %1967 }
 0x8fa   :  { %v5945_v47 = vpop.eup %5944  ;;  %v1973_v48 = vmul.f32 0.03125, %v1968_v41 }
 0x8fb   :  { %v1984_v5 = vmul.f32 %v5945_v47, %v7082_v45 }
 0x8fc   :  { %v1978_v18 = vadd.f32 1e-06, %v1973_v48 }
 0x8fd   :  { %v1995_v31 = vmul.f32 %v4808_v15, %v1984_v5 }
 0x8fe   :  { %v5947_v50 = vpop.eup %5946  ;;  %5952 = vrsqrt.f32 %v1978_v18 }
 0x8ff   :  { %v2006_v43 = vadd.f32 %v4809_v58, %v1995_v31  ;;  %v1985_v38 = vmul.f32 %v5947_v50, %v7087_v62 }
 0x901   :  { %5470 = vmatmul.mubr.msk.f32.vlgmr.msra.gmra.mxu1 %vm193_vm2, %v2006_v43  ;;  %v1996_v11 = vmul.f32 %v4808_v15, %v1985_v38 }
 0x902   :  { %v5949_v8 = vpop.eup %5948  ;;  %5472 = vmatprep.mubr.msk.f32.mxu1 %vm6110_vm4, %v6109_v59 }
 0x903   :  { %v2007_v6 = vadd.f32 %v4809_v58, %v1996_v11  ;;  %v1986_v16 = vmul.f32 %v5949_v8, %v7093_v3 }
 0x905   :  { %5473 = vmatmul.mubr.msk.f32.gmra.mxu1 %vm193_vm2, %v2007_v6  ;;  %v1997_v45 = vmul.f32 %v4808_v15, %v1986_v16 }
 0x906   :  { %v5951_v60 = vpop.eup %5950  ;;  %5475 = vmatprep.mubr.msk.f32.mxu1 %vm6110_vm4, %v6109_v59 }
 0x907   :  { %v2008_v17 = vadd.f32 %v4809_v58, %v1997_v45  ;;  %v1987_v13 = vmul.f32 %v5951_v60, %v7099_v44  ;;  %v2265_v44 = vld [vmem:[%s8272_s16 + $0x18] sm:$0xff] }
 0x908   :  { %5493 = vmatpush3.msra.mxu0 %v2265_v44 }
 0x909   :  { %5476 = vmatmul.mubr.msk.f32.gmra.mxu1 %vm193_vm2, %v2008_v17  ;;  %v1998_v62 = vmul.f32 %v4808_v15, %v1987_v13  ;;  %5494 = vmatprep.subr.mxu0 %v6109_v59 }
 0x90a   :  { %5478 = vmatprep.mubr.msk.f32.mxu1 %vm6110_vm4, %v6109_v59  ;;  %5495 = vmatpush3.msra.mxu0 %v2264_v21 }
 0x90b   :  { %v5953_v28 = vpop.eup %5952  ;;  %v2009_v49 = vadd.f32 %v4809_v58, %v1998_v62  ;;  %5496 = vmatprep.subr.mxu0 %v6109_v59 }
 0x90c   :  { %v1988_v30 = vmul.f32 %v5953_v28, %v7106_v20  ;;  %5497 = vmatpush3.msra.mxu0 %v2263_v19 }
 0x90d   :  { %5479 = vmatmul.mubr.msk.f32.gmra.mxu1 %vm193_vm2, %v2009_v49  ;;  %5498 = vmatprep.subr.mxu0 %v6109_v59 }
 0x90e   :  { %5481 = vmatprep.mubr.msk.f32.mxu1 %vm6110_vm4, %v6109_v59  ;;  %v1999_v56 = vmul.f32 %v4808_v15, %v1988_v30  ;;  %5499 = vmatpush3.msra.mxu0 %v2262_v54 }
 0x90f   :  { %5538 = vmatprep.subr.mxu0 %v6109_v59 }
 0x910   :  { %v2010_v3 = vadd.f32 %v4809_v58, %v1999_v56 }
 0x912   :  { %5482 = vmatmul.mubr.msk.f32.gmra.mxu1 %vm193_vm2, %v2010_v3 }
 0x913   :  { %5523 = vmatprep.mubr.msk.f32.mxu1 %vm6110_vm4, %v6109_v59 }
 0x9c1   :  { %v2103_v33 = vpop.f32.mrf.mxu1 }
 0x9c2   :  { %v7188_v20 = vadd.f32 %v4810_v7, %v2103_v33 }
 0x9c3   :  { %v5471_v57 = vpop.f32.mrf.mxu1 }
 0x9c4   :  { %v7191_v1 = vmul.f32 0.70710677, %v7188_v20 }
 0x9c5   :  { %v2108_v22 = vpop.f32.mrf.mxu1 }
 0x9c6   :  { %v2137_v12 = vand.u32 2147483647, %v7191_v1  ;;  %v7194_v4 = vadd.f32 %v4810_v7, %v2108_v22  ;;  %vm2237_vm14 = vcmp.ge.f32.partialorder %v7191_v1, 0.0 }
 0x9c7   :  { %v5474_v10 = vpop.f32.mrf.mxu1 }
 0x9c8   :  { %v2142_v29 = vmul.f32 0.3275911, %v2137_v12  ;;  %v7197_v25 = vmul.f32 0.70710677, %v7194_v4  ;;  %v2207_v15 = vsub.f32 0.0, %v2137_v12 }
 0x9c9   :  { %v2113_v24 = vpop.f32.mrf.mxu1 }
 0x9ca   :  { %v2147_v27 = vadd.f32 1.0, %v2142_v29  ;;  %v2138_v14 = vand.u32 2147483647, %v7197_v25  ;;  %v7200_v34 = vadd.f32 %v4810_v7, %v2113_v24  ;;  %v2212_v43 = vmul.f32 %v2207_v15, %v2137_v12 }
 0x9cb   :  { %v5477_v32 = vpop.f32.mrf.mxu1  ;;  %vm2238_vm7 = vcmp.ge.f32.partialorder %v7197_v25, 0.0 }
 0x9cc   :  { %5954 = vrcp.f32 %v2147_v27  ;;  %v2143_v26 = vmul.f32 0.3275911, %v2138_v14  ;;  %v7203_v35 = vmul.f32 0.70710677, %v7200_v34  ;;  %v2208_v6 = vsub.f32 0.0, %v2138_v14 }
 0x9cd   :  { %v2118_v42 = vpop.f32.mrf.mxu1  ;;  %v2217_v60 = vmul.f32 1.442695, %v2212_v43 }
 0x9ce   :  { %v2148_v39 = vadd.f32 1.0, %v2143_v26  ;;  %v7205_v9 = vadd.f32 %v4810_v7, %v2118_v42  ;;  %v2139_v41 = vand.u32 2147483647, %v7203_v35  ;;  %v2213_v28 = vmul.f32 %v2208_v6, %v2138_v14 }
 0x9cf   :  { %v5480_v47 = vpop.f32.mrf.mxu1 }
 0x9d0   :  { %5956 = vrcp.f32 %v2148_v39  ;;  %v7209_v48 = vmul.f32 0.70710677, %v7205_v9  ;;  %v2144_v5 = vmul.f32 0.3275911, %v2139_v41  ;;  %v2209_v49 = vsub.f32 0.0, %v2139_v41 }
 0x9d1   :  { %v2219_v51 = vmul.f32 1.442695, %v2213_v28 }
 0x9d2   :  { %v2140_v18 = vand.u32 2147483647, %v7209_v48  ;;  %v2123_v58 = vpop.f32.mrf.mxu1  ;;  %v2149_v31 = vadd.f32 1.0, %v2144_v5  ;;  %v2214_v44 = vmul.f32 %v2209_v49, %v2139_v41 }
 0x9d3   :  { %v7212_v50 = vadd.f32 %v4810_v7, %v2123_v58 }
 0x9d4   :  { %v2145_v38 = vmul.f32 0.3275911, %v2140_v18  ;;  %v5483_v11 = vpop.f32.mrf.mxu1  ;;  %5958 = vrcp.f32 %v2149_v31  ;;  %v2210_v52 = vsub.f32 0.0, %v2140_v18  ;;  %v2221_v12 = vmul.f32 1.442695, %v2214_v44 }
 0x9d5   :  { %v7215_v8 = vmul.f32 0.70710677, %v7212_v50 }
 0x9d6   :  { %v2150_v16 = vadd.f32 1.0, %v2145_v38  ;;  %v2215_v57 = vmul.f32 %v2210_v52, %v2140_v18 }
 0x9d7   :  { %v2141_v45 = vand.u32 2147483647, %v7215_v8 }
 0x9d8   :  { %5960 = vrcp.f32 %v2150_v16  ;;  %v2223_v39 = vmul.f32 1.442695, %v2215_v57 }
 0x9d9   :  { %v5955_v17 = vpop.eup %5954  ;;  %v2146_v13 = vmul.f32 0.3275911, %v2141_v45  ;;  %5962 = vpow2.f32 %v2217_v60  ;;  %v2211_v10 = vsub.f32 0.0, %v2141_v45 }
 0x9da   :  { %v2162_v62 = vmul.f32 1.0614054, %v5955_v17 }
 0x9db   :  { %v2151_v30 = vadd.f32 1.0, %v2146_v13  ;;  %v2216_v41 = vmul.f32 %v2211_v10, %v2141_v45  ;;  %v2127_v10 = vmul.f32 0.5, %v7188_v20 }
 0x9dc   :  { %v2167_v56 = vadd.f32 -1.4531521, %v2162_v62 }
 0x9dd   :  { %v5957_v3 = vpop.eup %5956  ;;  %5964 = vrcp.f32 %v2151_v30  ;;  %v2225_v13 = vmul.f32 1.442695, %v2216_v41 }
 0x9de   :  { %v2172_v61 = vmul.f32 %v5955_v17, %v2167_v56  ;;  %v2163_v63 = vmul.f32 1.0614054, %v5957_v3  ;;  %5966 = vpow2.f32 %v2219_v51 }
 0x9df   :  { %5968 = vpow2.f32 %v2221_v12 }
 0x9e0   :  { %v2177_v21 = vadd.f32 1.4214138, %v2172_v61  ;;  %v2168_v19 = vadd.f32 -1.4531521, %v2163_v63  ;;  %5970 = vpow2.f32 %v2223_v39 }
 0x9e1   :  { %v5959_v54 = vpop.eup %5958  ;;  %5972 = vpow2.f32 %v2225_v13 }
 0x9e2   :  { %v2182_v7 = vmul.f32 %v5955_v17, %v2177_v21  ;;  %v2173_v33 = vmul.f32 %v5957_v3, %v2168_v19  ;;  %v2164_v22 = vmul.f32 1.0614054, %v5959_v54 }
 0x9e4   :  { %v2187_v29 = vadd.f32 -0.28449672, %v2182_v7  ;;  %v2178_v24 = vadd.f32 1.4214138, %v2173_v33  ;;  %v2169_v14 = vadd.f32 -1.4531521, %v2164_v22 }
 0x9e5   :  { %v5961_v27 = vpop.eup %5960 }
 0x9e6   :  { %v2192_v32 = vmul.f32 %v5955_v17, %v2187_v29  ;;  %v2183_v26 = vmul.f32 %v5957_v3, %v2178_v24  ;;  %v2165_v42 = vmul.f32 1.0614054, %v5961_v27  ;;  %v2174_v47 = vmul.f32 %v5959_v54, %v2169_v14  ;;  %v5963_v31 = vpop.eup %5962 }
 0x9e8   :  { %v2197_v15 = vadd.f32 0.2548296, %v2192_v32  ;;  %v2188_v5 = vadd.f32 -0.28449672, %v2183_v26  ;;  %v2170_v58 = vadd.f32 -1.4531521, %v2165_v42 }
 0x9e9   :  { %v2179_v43 = vadd.f32 1.4214138, %v2174_v47 }
 0x9ea   :  { %v5965_v18 = vpop.eup %5964  ;;  %v2202_v38 = vmul.f32 %v5955_v17, %v2197_v15  ;;  %v2193_v11 = vmul.f32 %v5957_v3, %v2188_v5  ;;  %v2175_v6 = vmul.f32 %v5961_v27, %v2170_v58  ;;  %v2128_v5 = vmul.f32 0.5, %v7194_v4 }
 0x9eb   :  { %v2184_v16 = vmul.f32 %v5959_v54, %v2179_v43  ;;  %v2166_v60 = vmul.f32 1.0614054, %v5965_v18  ;;  %v5967_v51 = vpop.eup %5966 }
 0x9ec   :  { %v2227_v62 = vmul.f32 %v5963_v31, %v2202_v38  ;;  %v2198_v28 = vadd.f32 0.2548296, %v2193_v11  ;;  %v2180_v49 = vadd.f32 1.4214138, %v2175_v6  ;;  %v5969_v14 = vpop.eup %5968 }
 0x9ed   :  { %v2189_v30 = vadd.f32 -0.28449672, %v2184_v16  ;;  %v2171_v56 = vadd.f32 -1.4531521, %v2166_v60  ;;  %v5971_v15 = vpop.eup %5970  ;;  %v2129_v16 = vmul.f32 0.5, %v7200_v34 }
 0x9ee   :  { %v2232_v61 = vsub.f32 1.0, %v2227_v62  ;;  %v2203_v45 = vmul.f32 %v5957_v3, %v2198_v28  ;;  %v2185_v63 = vmul.f32 %v5961_v27, %v2180_v49  ;;  %v5973_v4 = vpop.eup %5972 }
 0x9ef   :  { %v2194_v52 = vmul.f32 %v5959_v54, %v2189_v30  ;;  %v2176_v44 = vmul.f32 %v5965_v18, %v2171_v56 }
 0x9f0   :  { %v2242_v21 = vsub.f32 0.0, %v2232_v61  ;;  %v2228_v17 = vmul.f32 %v5967_v51, %v2203_v45  ;;  %v2190_v19 = vadd.f32 -0.28449672, %v2185_v63  ;;  %v2131_v45 = vmul.f32 0.5, %v7212_v50  ;;  %v4816_v63 = vld [vmem:[%s8274_s17] ss:$0 sm:$0xff] }
 0x9f1   :  { %v2199_v7 = vadd.f32 0.2548296, %v2194_v52  ;;  %v2181_v33 = vadd.f32 1.4214138, %v2176_v44 }
 0x9f2   :  { %v2247_v57 = vsel %vm2237_vm14, %v2232_v61, %v2242_v21  ;;  %v2233_v22 = vsub.f32 1.0, %v2228_v17  ;;  %v2195_v12 = vmul.f32 %v5961_v27, %v2190_v19  ;;  %vm2239_vm14 = vcmp.ge.f32.partialorder %v7203_v35, 0.0 }
 0x9f3   :  { %v2252_v29 = vadd.f32 1.0, %v2247_v57  ;;  %v2204_v24 = vmul.f32 %v5959_v54, %v2199_v7  ;;  %v2186_v3 = vmul.f32 %v5965_v18, %v2181_v33  ;;  %v2130_v35 = vmul.f32 0.5, %v7205_v9 }
 0x9f4   :  { %v2243_v32 = vsub.f32 0.0, %v2233_v22  ;;  %v2200_v26 = vadd.f32 0.2548296, %v2195_v12 }
 0x9f5   :  { %v2257_v42 = vmul.f32 %v2252_v29, %v2127_v10  ;;  %v2229_v39 = vmul.f32 %v5969_v14, %v2204_v24  ;;  %v2191_v47 = vadd.f32 -0.28449672, %v2186_v3 }
 0x9f6   :  { %v2248_v1 = vsel %vm2238_vm7, %v2233_v22, %v2243_v32  ;;  %v2205_v41 = vmul.f32 %v5961_v27, %v2200_v26  ;;  %vm2240_vm7 = vcmp.ge.f32.partialorder %v7209_v48, 0.0 }
 0x9f7   :  { %v2253_v58 = vadd.f32 1.0, %v2248_v1  ;;  %v2234_v31 = vsub.f32 1.0, %v2229_v39  ;;  %v2196_v20 = vmul.f32 %v5965_v18, %v2191_v47  ;;  %5501 = vmatmul.mubr.msk.f32.vlgmr.msra.gmra.mxu0 %vm2277_vm15, %v2257_v42 }
 0x9f8   :  { %v2230_v54 = vmul.f32 %v5971_v15, %v2205_v41  ;;  %5503 = vmatprep.mubr.msk.f32.mxu0 %vm6110_vm4, %v6109_v59 }
 0x9f9   :  { %v2258_v43 = vmul.f32 %v2253_v58, %v2128_v5  ;;  %v2244_v38 = vsub.f32 0.0, %v2234_v31  ;;  %v2201_v11 = vadd.f32 0.2548296, %v2196_v20 }
 0x9fa   :  { %v2235_v25 = vsub.f32 1.0, %v2230_v54 }
 0x9fb   :  { %v2249_v6 = vsel %vm2239_vm14, %v2234_v31, %v2244_v38  ;;  %v2206_v27 = vmul.f32 %v5965_v18, %v2201_v11  ;;  %5504 = vmatmul.mubr.msk.f32.gmra.mxu0 %vm2277_vm15, %v2258_v43  ;;  %vm2241_vm14 = vcmp.ge.f32.partialorder %v7215_v8, 0.0 }
 0x9fc   :  { %v2254_v60 = vadd.f32 1.0, %v2249_v6  ;;  %v2245_v13 = vsub.f32 0.0, %v2235_v25  ;;  %5506 = vmatprep.mubr.msk.f32.mxu0 %vm6110_vm4, %v6109_v59 }
 0x9fd   :  { %v2231_v62 = vmul.f32 %v5973_v4, %v2206_v27 }
 0x9fe   :  { %v2259_v28 = vmul.f32 %v2254_v60, %v2129_v16  ;;  %v2250_v49 = vsel %vm2240_vm7, %v2235_v25, %v2245_v13 }
 0x9ff   :  { %v2255_v30 = vadd.f32 1.0, %v2250_v49  ;;  %v2236_v56 = vsub.f32 1.0, %v2231_v62 }
 0xa00   :  { %5507 = vmatmul.mubr.msk.f32.gmra.mxu0 %vm2277_vm15, %v2259_v28 }
 0xa01   :  { %v2260_v18 = vmul.f32 %v2255_v30, %v2130_v35  ;;  %v2246_v61 = vsub.f32 0.0, %v2236_v56  ;;  %5509 = vmatprep.mubr.msk.f32.mxu0 %vm6110_vm4, %v6109_v59  ;;  %v4829_v30 = vld [vmem:[%s8313_s4 + $0x38] sm:$0xff] }
 0xa02   :  { %5516 = vmatpush3.msra.mxu1 %v4829_v30 }
 0xa03   :  { %v2251_v34 = vsel %vm2241_vm14, %v2236_v56, %v2246_v61  ;;  %5517 = vmatprep.subr.mxu1 %v6109_v59  ;;  %v4828_v56 = vld [vmem:[%s8313_s4 + $0x30] sm:$0xff]  ;;  %v4826_v61 = vld [vmem:[%s8313_s4 + $0x20] sm:$0xff] }
 0xa04   :  { %v2256_v48 = vadd.f32 1.0, %v2251_v34  ;;  %5510 = vmatmul.mubr.msk.f32.gmra.mxu0 %vm2277_vm15, %v2260_v18  ;;  %v4827_v18 = vld [vmem:[%s8313_s4 + $0x28] sm:$0xff]  ;;  %5518 = vmatpush3.msra.mxu1 %v4828_v56 }
 0xa05   :  { %5512 = vmatprep.mubr.msk.f32.mxu0 %vm6110_vm4, %v6109_v59  ;;  %5519 = vmatprep.subr.mxu1 %v6109_v59 }
 0xa06   :  { %v2261_v9 = vmul.f32 %v2256_v48, %v2131_v45  ;;  %5520 = vmatpush3.msra.mxu1 %v4827_v18 }
 0xa07   :  { %5521 = vmatprep.subr.mxu1 %v6109_v59 }
 0xa08   :  { %5513 = vmatmul.mubr.msk.f32.gmra.mxu0 %vm2277_vm15, %v2261_v9  ;;  %5522 = vmatpush3.msra.mxu1 %v4826_v61 }
 0xa09   :  { %5548 = vmatprep.mubr.msk.f32.mxu0 %vm6110_vm4, %v6109_v59  ;;  %5563 = vmatprep.subr.mxu1 %v6109_v59 }
 0xab7   :  { %v2359_v8 = vpop.f32.mrf.mxu0 }
 0xab8   :  { %v2360_v51 = vadd.f32 %v4816_v63, %v2359_v8 }
 0xab9   :  { %v5502_v52 = vpop.f32.mrf.mxu0 }
 0xaba   :  { %v7247_v50 = vadd.f32 %v2360_v51, %v7061_v23 }
 0xabb   :  { %v2364_v44 = vpop.f32.mrf.mxu0 }
 0xabc   :  { %v2365_v21 = vadd.f32 %v4816_v63, %v2364_v44  ;;  %v2392_v17 = vsel %vm193_vm2, %v7247_v50, 0.0 }
 0xabd   :  { %2393 = vadd.xlane.f32.xlu0 %v2392_v17  ;;  %v5505_v19 = vpop.f32.mrf.mxu0 }
 0xabe   :  { %v7252_v7 = vadd.f32 %v2365_v21, %v7065_v36 }
 0xac0   :  { %v2369_v33 = vpop.f32.mrf.mxu0  ;;  %v2395_v57 = vsel %vm193_vm2, %v7252_v7, 0.0 }
 0xac1   :  { %v2370_v22 = vadd.f32 %v4816_v63, %v2369_v33  ;;  %2396 = vadd.xlane.f32.xlu1 %v2395_v57 }
 0xac2   :  { %v5508_v12 = vpop.f32.mrf.mxu0 }
 0xac3   :  { %v7257_v23 = vadd.f32 %v2370_v22, %v7069_v46  ;;  %v4824_v22 = vld [vmem:[%s8264_s6 + $0x1] ss:$0 sm:$0xff] }
 0xac4   :  { %v2374_v10 = vpop.f32.mrf.mxu0 }
 0xac5   :  { %v2375_v29 = vadd.f32 %v4816_v63, %v2374_v10  ;;  %v2398_v24 = vsel %vm193_vm2, %v7257_v23, 0.0 }
 0xac6   :  { %2399 = vadd.xlane.f32.xlu0 %v2398_v24  ;;  %v5511_v3 = vpop.f32.mrf.mxu0 }
 0xac7   :  { %v7262_v36 = vadd.f32 %v2375_v29, %v7073_v2  ;;  %v4825_v29 = vld [vmem:[%s8265_s7 + $0x1] ss:$0 sm:$0xff] }
 0xac8   :  { %v2379_v14 = vpop.f32.mrf.mxu0 }
 0xac9   :  { %v2380_v32 = vadd.f32 %v4816_v63, %v2379_v14  ;;  %v2401_v26 = vsel %vm193_vm2, %v7262_v36, 0.0 }
 0xaca   :  { %2402 = vadd.xlane.f32.xlu1 %v2401_v26  ;;  %v5514_v42 = vpop.f32.mrf.mxu0 }
 0xacb   :  { %v7267_v46 = vadd.f32 %v2380_v32, %v7077_v55 }
 0xacd   :  { %v2404_v39 = vsel %vm279_vm3, %v7267_v46, 0.0 }
 0xace   :  { %2405 = vadd.xlane.f32.xlu0 %v2404_v39 }
 0xb46   :  { %v2394_v47 = vpop.xlane.xlu0 %2393 }
 0xb47   :  { %v2407_v1 = vmul.f32 0.03125, %v2394_v47 }
 0xb49   :  { %v2412_v41 = vsub.f32 %v7247_v50, %v2407_v1 }
 0xb4a   :  { %v2397_v2 = vpop.xlane.xlu1 %2396 }
 0xb4b   :  { %v2408_v15 = vmul.f32 0.03125, %v2397_v2  ;;  %v2417_v5 = vmul.f32 %v2412_v41, %v2412_v41 }
 0xb4d   :  { %v7273_v58 = vsub.f32 %v7252_v7, %v2408_v15  ;;  %v2422_v31 = vsel %vm193_vm2, %v2417_v5, 0.0 }
 0xb4e   :  { %2423 = vadd.xlane.f32.xlu1 %v2422_v31 }
 0xb4f   :  { %v2400_v20 = vpop.xlane.xlu0 %2399  ;;  %v2418_v55 = vmul.f32 %v7273_v58, %v7273_v58 }
 0xb50   :  { %v2409_v54 = vmul.f32 0.03125, %v2400_v20 }
 0xb51   :  { %v2425_v43 = vsel %vm193_vm2, %v2418_v55, 0.0 }
 0xb52   :  { %v2414_v38 = vsub.f32 %v7257_v23, %v2409_v54  ;;  %2426 = vadd.xlane.f32.xlu0 %v2425_v43 }
 0xb53   :  { %v2403_v11 = vpop.xlane.xlu1 %2402 }
 0xb54   :  { %v2410_v25 = vmul.f32 0.03125, %v2403_v11  ;;  %v2419_v6 = vmul.f32 %v2414_v38, %v2414_v38 }
 0xb56   :  { %v7281_v27 = vsub.f32 %v7262_v36, %v2410_v25  ;;  %v2428_v4 = vsel %vm193_vm2, %v2419_v6, 0.0 }
 0xb57   :  { %2429 = vadd.xlane.f32.xlu1 %v2428_v4  ;;  %v2406_v16 = vpop.xlane.xlu0 %2405 }
 0xb58   :  { %v2411_v60 = vmul.f32 0.03125, %v2406_v16  ;;  %v2420_v13 = vmul.f32 %v7281_v27, %v7281_v27  ;;  %v4831_v16 = vld [vmem:[%s8266_s9 + $0x1] ss:$0 sm:$0xff]  ;;  %s8320_s9 = smov 104  }
 0xb5a   :  { %v7287_v62 = vsub.f32 %v7267_v46, %v2411_v60  ;;  %v2431_v28 = vsel %vm193_vm2, %v2420_v13, 0.0 }
 0xb5b   :  { %2432 = vadd.xlane.f32.xlu0 %v2431_v28 }
 0xb5c   :  { %v2421_v49 = vmul.f32 %v7287_v62, %v7287_v62 }
 0xb5e   :  { %v2434_v35 = vsel %vm279_vm3, %v2421_v49, 0.0 }
 0xb5f   :  { %2435 = vadd.xlane.f32.xlu1 %v2434_v35 }
 0xbd7   :  { %v2424_v34 = vpop.xlane.xlu1 %2423 }
 0xbd8   :  { %v2437_v45 = vmul.f32 0.03125, %v2424_v34 }
 0xbda   :  { %v2442_v48 = vadd.f32 1e-06, %v2437_v45 }
 0xbdb   :  { %v2427_v9 = vpop.xlane.xlu0 %2426 }
 0xbdc   :  { %5974 = vrsqrt.f32 %v2442_v48  ;;  %v2438_v63 = vmul.f32 0.03125, %v2427_v9 }
 0xbde   :  { %v2443_v8 = vadd.f32 1e-06, %v2438_v63 }
 0xbe0   :  { %5976 = vrsqrt.f32 %v2443_v8  ;;  %v2430_v51 = vpop.xlane.xlu1 %2429 }
 0xbe1   :  { %v2439_v52 = vmul.f32 0.03125, %v2430_v51 }
 0xbe3   :  { %v2444_v44 = vadd.f32 1e-06, %v2439_v52 }
 0xbe4   :  { %v2433_v21 = vpop.xlane.xlu0 %2432 }
 0xbe5   :  { %5978 = vrsqrt.f32 %v2444_v44  ;;  %v2440_v17 = vmul.f32 0.03125, %v2433_v21 }
 0xbe7   :  { %v2445_v19 = vadd.f32 1e-06, %v2440_v17 }
 0xbe8   :  { %v2436_v33 = vpop.xlane.xlu1 %2435 }
 0xbe9   :  { %v5975_v57 = vpop.eup %5974  ;;  %5980 = vrsqrt.f32 %v2445_v19  ;;  %v2441_v12 = vmul.f32 0.03125, %v2436_v33 }
 0xbea   :  { %v2452_v10 = vmul.f32 %v5975_v57, %v2412_v41 }
 0xbeb   :  { %v2446_v24 = vadd.f32 1e-06, %v2441_v12 }
 0xbec   :  { %v2463_v3 = vmul.f32 %v4824_v22, %v2452_v10 }
 0xbed   :  { %v5977_v14 = vpop.eup %5976  ;;  %5982 = vrsqrt.f32 %v2446_v24 }
 0xbee   :  { %v2474_v32 = vadd.f32 %v4825_v29, %v2463_v3  ;;  %v2453_v26 = vmul.f32 %v5977_v14, %v7273_v58 }
 0xbf0   :  { %5524 = vmatmul.mubr.msk.f32.vlgmr.msra.gmra.mxu1 %vm193_vm2, %v2474_v32  ;;  %v2464_v42 = vmul.f32 %v4824_v22, %v2453_v26 }
 0xbf1   :  { %5526 = vmatprep.mubr.msk.f32.mxu1 %vm6110_vm4, %v6109_v59 }
 0xbf2   :  { %v5979_v39 = vpop.eup %5978  ;;  %v2475_v47 = vadd.f32 %v4825_v29, %v2464_v42 }
 0xbf3   :  { %v2454_v1 = vmul.f32 %v5979_v39, %v2414_v38 }
 0xbf4   :  { %5527 = vmatmul.mubr.msk.f32.gmra.mxu1 %vm193_vm2, %v2475_v47 }
 0xbf5   :  { %5529 = vmatprep.mubr.msk.f32.mxu1 %vm6110_vm4, %v6109_v59  ;;  %v2465_v41 = vmul.f32 %v4824_v22, %v2454_v1 }
 0xbf6   :  { %v5981_v2 = vpop.eup %5980 }
 0xbf7   :  { %v2476_v15 = vadd.f32 %v4825_v29, %v2465_v41  ;;  %v2455_v5 = vmul.f32 %v5981_v2, %v7281_v27 }
 0xbf9   :  { %5530 = vmatmul.mubr.msk.f32.gmra.mxu1 %vm193_vm2, %v2476_v15  ;;  %v2466_v58 = vmul.f32 %v4824_v22, %v2455_v5 }
 0xbfa   :  { %v5983_v31 = vpop.eup %5982  ;;  %5532 = vmatprep.mubr.msk.f32.mxu1 %vm6110_vm4, %v6109_v59 }
 0xbfb   :  { %v2477_v20 = vadd.f32 %v4825_v29, %v2466_v58  ;;  %v2456_v55 = vmul.f32 %v5983_v31, %v7287_v62 }
 0xbfd   :  { %5533 = vmatmul.mubr.msk.f32.gmra.mxu1 %vm193_vm2, %v2477_v20  ;;  %v2467_v54 = vmul.f32 %v4824_v22, %v2456_v55 }
 0xbfe   :  { %5535 = vmatprep.mubr.msk.f32.mxu1 %vm6110_vm4, %v6109_v59 }
 0xbff   :  { %v2478_v43 = vadd.f32 %v4825_v29, %v2467_v54 }
 0xc01   :  { %5536 = vmatmul.mubr.msk.f32.gmra.mxu1 %vm193_vm2, %v2478_v43 }
 0xc02   :  { %5573 = vmatprep.mubr.msk.f32.mxu1 %vm6110_vm4, %v6109_v59 }
 0xcb0   :  { %v2573_v38 = vpop.f32.mrf.mxu1 }
 0xcb1   :  { %v7348_v56 = vadd.f32 %v4831_v16, %v2573_v38 }
 0xcb2   :  { %v5525_v11 = vpop.f32.mrf.mxu1 }
 0xcb3   :  { %v7365_v61 = vmul.f32 0.35355338, %v7348_v56 }
 0xcb4   :  { %v2578_v25 = vpop.f32.mrf.mxu1 }
 0xcb5   :  { %v7350_v18 = vadd.f32 %v4831_v16, %v2578_v25 }
 0xcb6   :  { %v5528_v6 = vpop.f32.mrf.mxu1 }
 0xcb7   :  { %v7372_v34 = vmul.f32 0.35355338, %v7350_v18 }
 0xcb9   :  { %v2583_v27 = vpop.f32.mrf.mxu1 }
 0xcba   :  { %v7340_v49 = vadd.f32 %v4831_v16, %v2583_v27 }
 0xcbb   :  { %v5531_v4 = vpop.f32.mrf.mxu1 }
 0xcbc   :  { %v7379_v45 = vmul.f32 0.35355338, %v7340_v49 }
 0xcbd   :  { %v2588_v60 = vpop.f32.mrf.mxu1 }
 0xcbe   :  { %v7336_v13 = vadd.f32 %v4831_v16, %v2588_v60 }
 0xcbf   :  { %v5534_v62 = vpop.f32.mrf.mxu1 }
 0xcc0   :  { %2613 = vrot.lane.b32.xlu1 %v7336_v13, %s6111_s3  ;;  %v7386_v48 = vmul.f32 0.35355338, %v7336_v13 }
 0xcc1   :  { %v2593_v28 = vpop.f32.mrf.mxu1 }
 0xcc2   :  { %v7342_v35 = vadd.f32 %v4831_v16, %v2593_v28 }
 0xcc3   :  { %v5537_v30 = vpop.f32.mrf.mxu1 }
 0xcc4   :  { %2611 = vrot.lane.b32.xlu1 %v7340_v49, %s6111_s3  ;;  %2615 = vrot.lane.b32.xlu0 %v7342_v35, %s6111_s3  ;;  %v7393_v9 = vmul.f32 0.35355338, %v7342_v35 }
 0xcc8   :  { %2609 = vrot.lane.b32.xlu1 %v7350_v18, %s6111_s3  ;;  %2607 = vrot.lane.b32.xlu0 %v7348_v56, %s6111_s3  ;;  %s8321_s3 = smov 64  }
 0xccc   :  { %2931 = vrot.lane.b32.xlu1 %v7342_v35, %s6112_s27  ;;  %2929 = vrot.lane.b32.xlu0 %v7336_v13, %s6112_s27 }
 0xcd0   :  { %2927 = vrot.lane.b32.xlu1 %v7340_v49, %s6112_s27  ;;  %2925 = vrot.lane.b32.xlu0 %v7350_v18, %s6112_s27 }
 0xcd4   :  { %2923 = vrot.lane.b32.xlu1 %v7348_v56, %s6112_s27  ;;  %2913 = vrot.lane.b32.xlu0 %v7365_v61, %s6113_s28  ;;  %s8322_s27 = smov 56  }
 0xcd8   :  { %3242 = vrot.lane.b32.xlu1 %v7342_v35, %s6114_s29  ;;  %2915 = vrot.lane.b32.xlu0 %v7372_v34, %s6113_s28 }
 0xcdc   :  { %3240 = vrot.lane.b32.xlu1 %v7336_v13, %s6114_s29  ;;  %2917 = vrot.lane.b32.xlu0 %v7379_v45, %s6113_s28 }
 0xce0   :  { %3238 = vrot.lane.b32.xlu1 %v7340_v49, %s6114_s29  ;;  %2919 = vrot.lane.b32.xlu0 %v7386_v48, %s6113_s28 }
 0xce4   :  { %3236 = vrot.lane.b32.xlu1 %v7350_v18, %s6114_s29  ;;  %2921 = vrot.lane.b32.xlu0 %v7393_v9, %s6113_s28  ;;  %s8323_s28 = smov 48  }
 0xce8   :  { %3234 = vrot.lane.b32.xlu1 %v7348_v56, %s6114_s29  ;;  %3224 = vrot.lane.b32.xlu0 %v7365_v61, %s6115_s30  ;;  %s8324_s29 = smov 40  }
 0xcec   :  { %3553 = vrot.lane.b32.xlu1 %v7342_v35, %s6116_s2  ;;  %3226 = vrot.lane.b32.xlu0 %v7372_v34, %s6115_s30 }
 0xcf0   :  { %3551 = vrot.lane.b32.xlu1 %v7336_v13, %s6116_s2  ;;  %3228 = vrot.lane.b32.xlu0 %v7379_v45, %s6115_s30 }
 0xcf4   :  { %3549 = vrot.lane.b32.xlu1 %v7340_v49, %s6116_s2  ;;  %3230 = vrot.lane.b32.xlu0 %v7386_v48, %s6115_s30 }
 0xcf8   :  { %3547 = vrot.lane.b32.xlu1 %v7350_v18, %s6116_s2  ;;  %3232 = vrot.lane.b32.xlu0 %v7393_v9, %s6115_s30  ;;  %s8325_s30 = smov 8  }
 0xcfc   :  { %3545 = vrot.lane.b32.xlu1 %v7348_v56, %s6116_s2  ;;  %3535 = vrot.lane.b32.xlu0 %v7365_v61, %s8320_s9 }
 0xd00   :  { %3537 = vrot.lane.b32.xlu1 %v7372_v34, %s8320_s9  ;;  %3539 = vrot.lane.b32.xlu0 %v7379_v45, %s8320_s9 }
 0xd04   :  { %3541 = vrot.lane.b32.xlu1 %v7386_v48, %s8320_s9  ;;  %3543 = vrot.lane.b32.xlu0 %v7393_v9, %s8320_s9 }
 0xd08   :  { %2798 = vrot.lane.b32.xlu1 %v7336_v13, %s8321_s3  ;;  %2800 = vrot.lane.b32.xlu0 %v7342_v35, %s8321_s3 }
 0xd0c   :  { %2796 = vrot.lane.b32.xlu1 %v7340_v49, %s8321_s3  ;;  %3111 = vrot.lane.b32.xlu0 %v7342_v35, %s8322_s27 }
 0xd10   :  { %2794 = vrot.lane.b32.xlu1 %v7350_v18, %s8321_s3  ;;  %3107 = vrot.lane.b32.xlu0 %v7340_v49, %s8322_s27 }
 0xd14   :  { %2792 = vrot.lane.b32.xlu1 %v7348_v56, %s8321_s3  ;;  %3422 = vrot.lane.b32.xlu0 %v7342_v35, %s8323_s28 }
 0xd18   :  { %3109 = vrot.lane.b32.xlu1 %v7336_v13, %s8322_s27  ;;  %3418 = vrot.lane.b32.xlu0 %v7340_v49, %s8323_s28 }
 0xd1c   :  { %3105 = vrot.lane.b32.xlu1 %v7350_v18, %s8322_s27 }
 0xd20   :  { %3103 = vrot.lane.b32.xlu1 %v7348_v56, %s8322_s27 }
 0xd24   :  { %3420 = vrot.lane.b32.xlu1 %v7336_v13, %s8323_s28 }
 0xd28   :  { %3416 = vrot.lane.b32.xlu1 %v7350_v18, %s8323_s28 }
 0xd32   :  { %v2614_v63 = vpop.permute.xlu1 %2613 }
 0xd36   :  { %v2612_v8 = vpop.permute.xlu1 %2611  ;;  %v2616_v51 = vpop.permute.xlu0 %2615 }
 0xd37   :  { %5539 = vmatpush3.xpose.msk.msra.mxu0 %vm492_vm5, %v2616_v51 }
 0xd38   :  { %5540 = vmatprep.subr.mxu0 %v6109_v59 }
 0xd3a   :  { %v2610_v52 = vpop.permute.xlu1 %2609  ;;  %v2608_v44 = vpop.permute.xlu0 %2607 }
 0xd3b   :  { %5541 = vmatpush3.xpose.msk.msra.mxu0 %vm492_vm5, %v2614_v63 }
 0xd3c   :  { %5542 = vmatprep.subr.mxu0 %v6109_v59 }
 0xd3e   :  { %v2932_v21 = vpop.permute.xlu1 %2931  ;;  %v2930_v17 = vpop.permute.xlu0 %2929 }
 0xd3f   :  { %5543 = vmatpush3.xpose.msk.msra.mxu0 %vm492_vm5, %v2612_v8 }
 0xd40   :  { %5544 = vmatprep.subr.mxu0 %v6109_v59 }
 0xd42   :  { %v2928_v19 = vpop.permute.xlu1 %2927  ;;  %v2926_v33 = vpop.permute.xlu0 %2925 }
 0xd43   :  { %5545 = vmatpush3.xpose.msk.msra.mxu0 %vm492_vm5, %v2610_v52 }
 0xd44   :  { %5546 = vmatprep.subr.mxu0 %v6109_v59 }
 0xd46   :  { %v2924_v57 = vpop.permute.xlu1 %2923  ;;  %v2914_v22 = vpop.permute.xlu0 %2913 }
 0xd47   :  { %5547 = vmatpush3.xpose.msk.msra.mxu0 %vm492_vm5, %v2608_v44 }
 0xd48   :  { %5588 = vmatprep.subr.mxu0 %v6109_v59 }
 0xd4a   :  { %v3243_v12 = vpop.permute.xlu1 %3242  ;;  %5549 = vmatmul.mubr.msk.f32.vlgmr.msra.gmra.mxu0 %vm492_vm5, %v7365_v61  ;;  %v2916_v10 = vpop.permute.xlu0 %2915 }
 0xd4b   :  { %5589 = vmatpush3.xpose.msk.msra.mxu0 %vm492_vm5, %v2932_v21  ;;  %5551 = vmatprep.mubr.msk.f32.mxu0 %vm6110_vm4, %v6109_v59 }
 0xd4c   :  { %5590 = vmatprep.subr.mxu0 %v6109_v59 }
 0xd4e   :  { %v3241_v29 = vpop.permute.xlu1 %3240  ;;  %5552 = vmatmul.mubr.msk.f32.gmra.mxu0 %vm492_vm5, %v7372_v34  ;;  %v2918_v24 = vpop.permute.xlu0 %2917 }
 0xd4f   :  { %5591 = vmatpush3.xpose.msk.msra.mxu0 %vm492_vm5, %v2930_v17  ;;  %5554 = vmatprep.mubr.msk.f32.mxu0 %vm6110_vm4, %v6109_v59 }
 0xd50   :  { %5592 = vmatprep.subr.mxu0 %v6109_v59 }
 0xd52   :  { %v3239_v3 = vpop.permute.xlu1 %3238  ;;  %5555 = vmatmul.mubr.msk.f32.gmra.mxu0 %vm492_vm5, %v7379_v45  ;;  %v2920_v14 = vpop.permute.xlu0 %2919 }
 0xd53   :  { %5593 = vmatpush3.xpose.msk.msra.mxu0 %vm492_vm5, %v2928_v19  ;;  %5557 = vmatprep.mubr.msk.f32.mxu0 %vm6110_vm4, %v6109_v59 }
 0xd54   :  { %5594 = vmatprep.subr.mxu0 %v6109_v59 }
 0xd56   :  { %v3237_v32 = vpop.permute.xlu1 %3236  ;;  %5558 = vmatmul.mubr.msk.f32.gmra.mxu0 %vm492_vm5, %v7386_v48  ;;  %v2922_v26 = vpop.permute.xlu0 %2921 }
 0xd57   :  { %5595 = vmatpush3.xpose.msk.msra.mxu0 %vm492_vm5, %v2926_v33  ;;  %5560 = vmatprep.mubr.msk.f32.mxu0 %vm6110_vm4, %v6109_v59 }
 0xd58   :  { %5596 = vmatprep.subr.mxu0 %v6109_v59 }
 0xd5a   :  { %v3235_v42 = vpop.permute.xlu1 %3234  ;;  %v3225_v39 = vpop.permute.xlu0 %3224  ;;  %5561 = vmatmul.mubr.msk.f32.gmra.mxu0 %vm492_vm5, %v7393_v9 }
 0xd5b   :  { %5597 = vmatpush3.xpose.msk.msra.mxu0 %vm492_vm5, %v2924_v57  ;;  %5598 = vmatprep.mubr.msk.f32.mxu0 %vm6110_vm4, %v6109_v59 }
 0xd5c   :  { %5638 = vmatprep.subr.mxu0 %v6109_v59 }
 0xd5e   :  { %v3554_v47 = vpop.permute.xlu1 %3553  ;;  %v3227_v1 = vpop.permute.xlu0 %3226  ;;  %5599 = vmatmul.mubr.msk.f32.vlgmr.msra.gmra.mxu0 %vm492_vm5, %v2914_v22 }
 0xd5f   :  { %5639 = vmatpush3.xpose.msk.msra.mxu0 %vm492_vm5, %v3243_v12  ;;  %5601 = vmatprep.mubr.msk.f32.mxu0 %vm6110_vm4, %v6109_v59 }
 0xd60   :  { %5640 = vmatprep.subr.mxu0 %v6109_v59 }
 0xd62   :  { %v3552_v41 = vpop.permute.xlu1 %3551  ;;  %v3229_v2 = vpop.permute.xlu0 %3228  ;;  %5602 = vmatmul.mubr.msk.f32.gmra.mxu0 %vm492_vm5, %v2916_v10 }
 0xd63   :  { %5641 = vmatpush3.xpose.msk.msra.mxu0 %vm492_vm5, %v3241_v29  ;;  %5604 = vmatprep.mubr.msk.f32.mxu0 %vm6110_vm4, %v6109_v59 }
 0xd64   :  { %5642 = vmatprep.subr.mxu0 %v6109_v59 }
 0xd66   :  { %v3550_v15 = vpop.permute.xlu1 %3549  ;;  %v3231_v5 = vpop.permute.xlu0 %3230  ;;  %5605 = vmatmul.mubr.msk.f32.gmra.mxu0 %vm492_vm5, %v2918_v24 }
 0xd67   :  { %5643 = vmatpush3.xpose.msk.msra.mxu0 %vm492_vm5, %v3239_v3  ;;  %5607 = vmatprep.mubr.msk.f32.mxu0 %vm6110_vm4, %v6109_v59 }
 0xd68   :  { %5644 = vmatprep.subr.mxu0 %v6109_v59 }
 0xd6a   :  { %v3548_v58 = vpop.permute.xlu1 %3547  ;;  %v3233_v31 = vpop.permute.xlu0 %3232  ;;  %5608 = vmatmul.mubr.msk.f32.gmra.mxu0 %vm492_vm5, %v2920_v14 }
 0xd6b   :  { %5645 = vmatpush3.xpose.msk.msra.mxu0 %vm492_vm5, %v3237_v32  ;;  %5610 = vmatprep.mubr.msk.f32.mxu0 %vm6110_vm4, %v6109_v59 }
 0xd6c   :  { %5646 = vmatprep.subr.mxu0 %v6109_v59 }
 0xd6e   :  { %v3546_v20 = vpop.permute.xlu1 %3545  ;;  %v3536_v55 = vpop.permute.xlu0 %3535  ;;  %5611 = vmatmul.mubr.msk.f32.gmra.mxu0 %vm492_vm5, %v2922_v26 }
 0xd6f   :  { %5647 = vmatpush3.xpose.msk.msra.mxu0 %vm492_vm5, %v3235_v42  ;;  %5648 = vmatprep.mubr.msk.f32.mxu0 %vm6110_vm4, %v6109_v59 }
 0xd70   :  { %5688 = vmatprep.subr.mxu0 %v6109_v59 }
 0xd72   :  { %v3538_v54 = vpop.permute.xlu1 %3537  ;;  %v3540_v43 = vpop.permute.xlu0 %3539  ;;  %5649 = vmatmul.mubr.msk.f32.vlgmr.msra.gmra.mxu0 %vm492_vm5, %v3225_v39 }
 0xd73   :  { %5689 = vmatpush3.xpose.msk.msra.mxu0 %vm492_vm5, %v3554_v47  ;;  %5651 = vmatprep.mubr.msk.f32.mxu0 %vm6110_vm4, %v6109_v59 }
 0xd74   :  { %5690 = vmatprep.subr.mxu0 %v6109_v59 }
 0xd76   :  { %v3542_v38 = vpop.permute.xlu1 %3541  ;;  %v3544_v11 = vpop.permute.xlu0 %3543  ;;  %5652 = vmatmul.mubr.msk.f32.gmra.mxu0 %vm492_vm5, %v3227_v1 }
 0xd77   :  { %5691 = vmatpush3.xpose.msk.msra.mxu0 %vm492_vm5, %v3552_v41  ;;  %5654 = vmatprep.mubr.msk.f32.mxu0 %vm6110_vm4, %v6109_v59 }
 0xd78   :  { %5692 = vmatprep.subr.mxu0 %v6109_v59 }
 0xd7a   :  { %v2799_v25 = vpop.permute.xlu1 %2798  ;;  %v2801_v6 = vpop.permute.xlu0 %2800  ;;  %5655 = vmatmul.mubr.msk.f32.gmra.mxu0 %vm492_vm5, %v3229_v2 }
 0xd7b   :  { %5564 = vmatpush3.msk.msra.mxu1 %vm699_vm6, %v2801_v6  ;;  %5693 = vmatpush3.xpose.msk.msra.mxu0 %vm492_vm5, %v3550_v15 }
 0xd7c   :  { %5565 = vmatprep.subr.mxu1 %v6109_v59  ;;  %5657 = vmatprep.mubr.msk.f32.mxu0 %vm6110_vm4, %v6109_v59 }
 0xd7d   :  { %5566 = vmatpush3.msra.mxu1 %v2799_v25  ;;  %5694 = vmatprep.subr.mxu0 %v6109_v59 }
 0xd7e   :  { %v2797_v27 = vpop.permute.xlu1 %2796  ;;  %5567 = vmatprep.subr.mxu1 %v6109_v59  ;;  %5658 = vmatmul.mubr.msk.f32.gmra.mxu0 %vm492_vm5, %v3231_v5  ;;  %v7698_v40 = vpop.permute.xlu0 %3111 }
 0xd7f   :  { %5568 = vmatpush3.msra.mxu1 %v2797_v27  ;;  %5695 = vmatpush3.xpose.msk.msra.mxu0 %vm492_vm5, %v3548_v58 }
 0xd80   :  { %5569 = vmatprep.subr.mxu1 %v6109_v59  ;;  %5660 = vmatprep.mubr.msk.f32.mxu0 %vm6110_vm4, %v6109_v59 }
 0xd81   :  { %5696 = vmatprep.subr.mxu0 %v6109_v59 }
 0xd82   :  { %v2795_v4 = vpop.permute.xlu1 %2794  ;;  %5661 = vmatmul.mubr.msk.f32.gmra.mxu0 %vm492_vm5, %v3233_v31  ;;  %v7702_v0 = vpop.permute.xlu0 %3107 }
 0xd83   :  { %5570 = vmatpush3.msra.mxu1 %v2795_v4  ;;  %5697 = vmatpush3.xpose.msk.msra.mxu0 %vm492_vm5, %v3546_v20 }
 0xd84   :  { %5571 = vmatprep.subr.mxu1 %v6109_v59  ;;  %5698 = vmatprep.mubr.msk.f32.mxu0 %vm6110_vm4, %v6109_v59 }
 0xd85   :  { %5738 = vmatprep.subr.mxu0 %v6109_v59 }
 0xd86   :  { %v2793_v16 = vpop.permute.xlu1 %2792  ;;  %5699 = vmatmul.mubr.msk.f32.vlgmr.msra.gmra.mxu0 %vm492_vm5, %v3536_v55 }
 0xd87   :  { %5572 = vmatpush3.msra.mxu1 %v2793_v16  ;;  %5701 = vmatprep.mubr.msk.f32.mxu0 %vm6110_vm4, %v6109_v59 }
 0xd88   :  { %5613 = vmatprep.subr.mxu1 %v6109_v59 }
 0xd8a   :  { %5702 = vmatmul.mubr.msk.f32.gmra.mxu0 %vm492_vm5, %v3538_v54 }
 0xd8b   :  { %5704 = vmatprep.mubr.msk.f32.mxu0 %vm6110_vm4, %v6109_v59 }
 0xd8e   :  { %5705 = vmatmul.mubr.msk.f32.gmra.mxu0 %vm492_vm5, %v3540_v43 }
 0xd8f   :  { %5707 = vmatprep.mubr.msk.f32.mxu0 %vm6110_vm4, %v6109_v59 }
 0xd92   :  { %5708 = vmatmul.mubr.msk.f32.gmra.mxu0 %vm492_vm5, %v3542_v38 }
 0xd93   :  { %5710 = vmatprep.mubr.msk.f32.mxu0 %vm6110_vm4, %v6109_v59 }
 0xd96   :  { %5711 = vmatmul.mubr.msk.f32.gmra.mxu0 %vm492_vm5, %v3544_v11 }
 0xd97   :  { %5746 = vmatprep.mubr.msk.f32.mxu0 %vm6110_vm4, %v6109_v59 }
 0xe0a   :  { %v2708_v60 = vpop.f32.mrf.mxu0 }
 0xe0b   :  { %v7572_v62 = vsel %vm230_vm9, %v2708_v60, -1e+30 }
 0xe0c   :  { %v2737_v28 = vsel %vm613_vm10, %v7572_v62, -inf  ;;  %v5550_v30 = vpop.f32.mrf.mxu0 }
 0xe0d   :  { %2738 = vmax.xlane.f32.xlu1 %v2737_v28 }
 0xe0e   :  { %v2713_v61 = vpop.f32.mrf.mxu0 }
 0xe0f   :  { %v7578_v34 = vsel %vm230_vm9, %v2713_v61, -1e+30 }
 0xe10   :  { %v2740_v45 = vsel %vm613_vm10, %v7578_v34, -inf  ;;  %v5553_v48 = vpop.f32.mrf.mxu0 }
 0xe11   :  { %2741 = vmax.xlane.f32.xlu0 %v2740_v45 }
 0xe12   :  { %v2718_v9 = vpop.f32.mrf.mxu0 }
 0xe13   :  { %v7584_v63 = vsel %vm6621_vm1, %v2718_v9, -1e+30 }
 0xe14   :  { %v2743_v8 = vsel %vm613_vm10, %v7584_v63, -inf  ;;  %v5556_v51 = vpop.f32.mrf.mxu0 }
 0xe15   :  { %2744 = vmax.xlane.f32.xlu0 %v2743_v8 }
 0xe16   :  { %v2723_v52 = vpop.f32.mrf.mxu0 }
 0xe17   :  { %v7590_v44 = vsel %vm6601_vm13, %v2723_v52, -1e+30 }
 0xe18   :  { %v2746_v21 = vsel %vm613_vm10, %v7590_v44, -inf  ;;  %v5559_v17 = vpop.f32.mrf.mxu0 }
 0xe19   :  { %2747 = vmax.xlane.f32.xlu0 %v2746_v21 }
 0xe1a   :  { %v2728_v19 = vpop.f32.mrf.mxu0 }
 0xe1b   :  { %v7596_v33 = vsel %vm6639_vm8, %v2728_v19, -1e+30 }
 0xe1c   :  { %v2749_v57 = vsel %vm626_vm11, %v7596_v33, -inf  ;;  %v5562_v22 = vpop.f32.mrf.mxu0 }
 0xe1d   :  { %2750 = vmax.xlane.f32.xlu1 %v2749_v57 }
 0xe1e   :  { %v3019_v12 = vpop.f32.mrf.mxu0 }
 0xe1f   :  { %v7602_v10 = vsel %vm230_vm9, %v3019_v12, -1e+30 }
 0xe20   :  { %v3048_v29 = vsel %vm613_vm10, %v7602_v10, -inf  ;;  %v5600_v24 = vpop.f32.mrf.mxu0 }
 0xe21   :  { %3049 = vmax.xlane.f32.xlu0 %v3048_v29 }
 0xe22   :  { %v3024_v3 = vpop.f32.mrf.mxu0 }
 0xe23   :  { %v7608_v14 = vsel %vm230_vm9, %v3024_v3, -1e+30 }
 0xe24   :  { %v3051_v32 = vsel %vm613_vm10, %v7608_v14, -inf  ;;  %v5603_v26 = vpop.f32.mrf.mxu0 }
 0xe25   :  { %3052 = vmax.xlane.f32.xlu1 %v3051_v32 }
 0xe26   :  { %v3029_v42 = vpop.f32.mrf.mxu0 }
 0xe27   :  { %v7614_v39 = vsel %vm6621_vm1, %v3029_v42, -1e+30 }
 0xe28   :  { %v3054_v47 = vsel %vm613_vm10, %v7614_v39, -inf  ;;  %v5606_v1 = vpop.f32.mrf.mxu0 }
 0xe29   :  { %3055 = vmax.xlane.f32.xlu0 %v3054_v47 }
 0xe2a   :  { %v3034_v41 = vpop.f32.mrf.mxu0 }
 0xe2b   :  { %v7620_v2 = vsel %vm6601_vm13, %v3034_v41, -1e+30 }
 0xe2c   :  { %v3057_v15 = vsel %vm613_vm10, %v7620_v2, -inf  ;;  %v5609_v5 = vpop.f32.mrf.mxu0 }
 0xe2d   :  { %3058 = vmax.xlane.f32.xlu1 %v3057_v15 }
 0xe2e   :  { %v3039_v58 = vpop.f32.mrf.mxu0 }
 0xe2f   :  { %v7630_v52 = vsel %vm6639_vm8, %v3039_v58, -1e+30 }
 0xe30   :  { %v5612_v31 = vpop.f32.mrf.mxu0 }
 0xe31   :  { %v7694_v31 = vpop.permute.xlu1 %3109 }
 0xe32   :  { %v3330_v20 = vpop.f32.mrf.mxu0 }
 0xe33   :  { %v7636_v21 = vsel %vm230_vm9, %v3330_v20, -1e+30 }
 0xe34   :  { %v5650_v55 = vpop.f32.mrf.mxu0  ;;  %v3359_v19 = vsel %vm613_vm10, %v7636_v21, -inf }
 0xe35   :  { %v7696_v20 = vpop.permute.xlu1 %3105 }
 0xe36   :  { %v3335_v54 = vpop.f32.mrf.mxu0 }
 0xe37   :  { %v7640_v17 = vsel %vm230_vm9, %v3335_v54, -1e+30 }
 0xe38   :  { %v5653_v43 = vpop.f32.mrf.mxu0  ;;  %v3362_v57 = vsel %vm613_vm10, %v7640_v17, -inf }
 0xe39   :  { %v7700_v55 = vpop.permute.xlu1 %3103  ;;  %v7706_v43 = vpop.permute.xlu0 %3422 }
 0xe3a   :  { %v3340_v38 = vpop.f32.mrf.mxu0 }
 0xe3b   :  { %v7648_v22 = vsel %vm6621_vm1, %v3340_v38, -1e+30 }
 0xe3c   :  { %v5656_v11 = vpop.f32.mrf.mxu0  ;;  %v3365_v29 = vsel %vm613_vm10, %v7648_v22, -inf }
 0xe3d   :  { %v7704_v54 = vpop.permute.xlu1 %3420  ;;  %v7710_v11 = vpop.permute.xlu0 %3418 }
 0xe3e   :  { %3414 = vrot.lane.b32.xlu1 %v7348_v56, %s8323_s28  ;;  %v3345_v25 = vpop.f32.mrf.mxu0 }
 0xe3f   :  { %3733 = vrot.lane.b32.xlu0 %v7342_v35, %s8324_s29  ;;  %v3060_v35 = vsel %vm626_vm11, %v7630_v52, -inf  ;;  %v7652_v12 = vsel %vm6601_vm13, %v3345_v25, -1e+30 }
 0xe40   :  { %v5659_v6 = vpop.f32.mrf.mxu0  ;;  %v3368_v24 = vsel %vm613_vm10, %v7652_v12, -inf }
 0xe41   :  { %v7708_v38 = vpop.permute.xlu1 %3416 }
 0xe42   :  { %v3350_v27 = vpop.f32.mrf.mxu0 }
 0xe43   :  { %v7660_v3 = vsel %vm6639_vm8, %v3350_v27, -1e+30 }
 0xe44   :  { %v5662_v4 = vpop.f32.mrf.mxu0  ;;  %v3371_v26 = vsel %vm626_vm11, %v7660_v3, -inf }
 0xe46   :  { %v3641_v16 = vpop.f32.mrf.mxu0 }
 0xe47   :  { %v7664_v32 = vsel %vm230_vm9, %v3641_v16, -1e+30 }
 0xe48   :  { %v5700_v60 = vpop.f32.mrf.mxu0  ;;  %v3670_v42 = vsel %vm613_vm10, %v7664_v32, -inf }
 0xe4a   :  { %v3646_v28 = vpop.f32.mrf.mxu0 }
 0xe4b   :  { %v7672_v47 = vsel %vm230_vm9, %v3646_v28, -1e+30 }
 0xe4c   :  { %v5703_v30 = vpop.f32.mrf.mxu0  ;;  %v3673_v41 = vsel %vm613_vm10, %v7672_v47, -inf }
 0xe4e   :  { %v3651_v61 = vpop.f32.mrf.mxu0 }
 0xe4f   :  { %v7676_v1 = vsel %vm6621_vm1, %v3651_v61, -1e+30 }
 0xe50   :  { %v5706_v45 = vpop.f32.mrf.mxu0  ;;  %v3676_v15 = vsel %vm613_vm10, %v7676_v1, -inf }
 0xe52   :  { %v3656_v48 = vpop.f32.mrf.mxu0 }
 0xe53   :  { %v7684_v5 = vsel %vm6601_vm13, %v3656_v48, -1e+30  ;;  %vm4719_vm13 = vcmask 1025  }
 0xe54   :  { %v5709_v9 = vpop.f32.mrf.mxu0  ;;  %v3679_v53 = vsel %vm613_vm10, %v7684_v5, -inf }
 0xe56   :  { %v3661_v8 = vpop.f32.mrf.mxu0 }
 0xe57   :  { %v7688_v37 = vsel %vm6639_vm8, %v3661_v8, -1e+30 }
 0xe58   :  { %v5712_v51 = vpop.f32.mrf.mxu0  ;;  %v3682_v58 = vsel %vm626_vm11, %v7688_v37, -inf }
 0xe5e   :  { %3061 = vmax.xlane.f32.xlu0 %v3060_v35 }
 0xe62   :  { %3360 = vmax.xlane.f32.xlu1 %v3359_v19  ;;  %3363 = vmax.xlane.f32.xlu0 %v3362_v57 }
 0xe66   :  { %3366 = vmax.xlane.f32.xlu1 %v3365_v29  ;;  %3369 = vmax.xlane.f32.xlu0 %v3368_v24 }
 0xe6a   :  { %3372 = vmax.xlane.f32.xlu1 %v3371_v26  ;;  %3671 = vmax.xlane.f32.xlu0 %v3670_v42 }
 0xe6e   :  { %3674 = vmax.xlane.f32.xlu1 %v3673_v41  ;;  %3677 = vmax.xlane.f32.xlu0 %v3676_v15 }
 0xe72   :  { %3680 = vmax.xlane.f32.xlu1 %v3679_v53  ;;  %3683 = vmax.xlane.f32.xlu0 %v3682_v58 }
 0xe96   :  { %v2739_v25 = vpop.xlane.xlu1 %2738 }
 0xe97   :  { %v2752_v6 = vsub.f32 %v7572_v62, %v2739_v25 }
 0xe99   :  { %v2757_v27 = vmul.f32 1.442695, %v2752_v6 }
 0xe9a   :  { %v2742_v4 = vpop.xlane.xlu0 %2741 }
 0xe9b   :  { %5984 = vpow2.f32 %v2757_v27  ;;  %v2753_v16 = vsub.f32 %v7578_v34, %v2742_v4 }
 0xe9d   :  { %v2759_v60 = vmul.f32 1.442695, %v2753_v16 }
 0xe9e   :  { %v2745_v28 = vpop.xlane.xlu0 %2744 }
 0xe9f   :  { %5986 = vpow2.f32 %v2759_v60  ;;  %v2754_v30 = vsub.f32 %v7584_v63, %v2745_v28 }
 0xea1   :  { %v2761_v61 = vmul.f32 1.442695, %v2754_v30 }
 0xea2   :  { %v2748_v45 = vpop.xlane.xlu0 %2747 }
 0xea3   :  { %5988 = vpow2.f32 %v2761_v61  ;;  %v2755_v48 = vsub.f32 %v7590_v44, %v2748_v45 }
 0xea5   :  { %v2763_v9 = vmul.f32 1.442695, %v2755_v48 }
 0xea6   :  { %v2751_v8 = vpop.xlane.xlu1 %2750 }
 0xea7   :  { %5990 = vpow2.f32 %v2763_v9  ;;  %v2756_v62 = vsub.f32 %v7596_v33, %v2751_v8 }
 0xea8   :  { %v7717_v51 = vpop.eup %5984 }
 0xea9   :  { %v2765_v35 = vmul.f32 1.442695, %v2756_v62  ;;  %v2767_v34 = vsel %vm613_vm10, %v7717_v51, 0.0 }
 0xeaa   :  { %v3050_v19 = vpop.xlane.xlu0 %3049  ;;  %2768 = vadd.xlane.f32.xlu1 %v2767_v34 }
 0xeab   :  { %5992 = vpow2.f32 %v2765_v35  ;;  %v3063_v63 = vsub.f32 %v7602_v10, %v3050_v19 }
 0xeac   :  { %v7722_v57 = vpop.eup %5986 }
 0xead   :  { %v3068_v29 = vmul.f32 1.442695, %v3063_v63  ;;  %v2770_v44 = vsel %vm613_vm10, %v7722_v57, 0.0 }
 0xeae   :  { %v3053_v24 = vpop.xlane.xlu1 %3052  ;;  %2771 = vadd.xlane.f32.xlu0 %v2770_v44 }
 0xeaf   :  { %5994 = vpow2.f32 %v3068_v29  ;;  %v3064_v33 = vsub.f32 %v7608_v14, %v3053_v24 }
 0xeb0   :  { %v7727_v26 = vpop.eup %5988 }
 0xeb1   :  { %v3070_v42 = vmul.f32 1.442695, %v3064_v33  ;;  %v2773_v41 = vsel %vm613_vm10, %v7727_v26, 0.0 }
 0xeb2   :  { %v3056_v15 = vpop.xlane.xlu0 %3055  ;;  %2774 = vadd.xlane.f32.xlu1 %v2773_v41 }
 0xeb3   :  { %5996 = vpow2.f32 %v3070_v42  ;;  %v3065_v10 = vsub.f32 %v7614_v39, %v3056_v15 }
 0xeb4   :  { %v7732_v53 = vpop.eup %5990 }
 0xeb5   :  { %v3072_v58 = vmul.f32 1.442695, %v3065_v10  ;;  %v2776_v25 = vsel %vm613_vm10, %v7732_v53, 0.0 }
 0xeb6   :  { %2777 = vadd.xlane.f32.xlu0 %v2776_v25  ;;  %v3059_v30 = vpop.xlane.xlu1 %3058  ;;  %v7757_v48 = vpop.permute.xlu0 %3733 }
 0xeb7   :  { %5998 = vpow2.f32 %v3072_v58  ;;  %v3066_v61 = vsub.f32 %v7620_v2, %v3059_v30 }
 0xeb8   :  { %v7736_v14 = vpop.eup %5992 }
 0xeb9   :  { %v2779_v6 = vsel %vm626_vm11, %v7736_v14, 0.0  ;;  %v3074_v45 = vmul.f32 1.442695, %v3066_v61 }
 0xeba   :  { %2780 = vadd.xlane.f32.xlu1 %v2779_v6  ;;  %v7759_v9 = vpop.permute.xlu1 %3414 }
 0xebb   :  { %6000 = vpow2.f32 %v3074_v45 }
 0xebc   :  { %v7740_v27 = vpop.eup %5994 }
 0xebd   :  { %v3078_v4 = vsel %vm613_vm10, %v7740_v27, 0.0 }
 0xebe   :  { %3079 = vadd.xlane.f32.xlu1 %v3078_v4 }
 0xec0   :  { %v7744_v39 = vpop.eup %5996 }
 0xec1   :  { %v3081_v16 = vsel %vm613_vm10, %v7744_v39, 0.0 }
 0xec2   :  { %3082 = vadd.xlane.f32.xlu0 %v3081_v16 }
 0xec4   :  { %v7748_v60 = vpop.eup %5998 }
 0xec5   :  { %v3084_v28 = vsel %vm613_vm10, %v7748_v60, 0.0 }
 0xec6   :  { %3085 = vadd.xlane.f32.xlu1 %v3084_v28 }
 0xec8   :  { %v7766_v41 = vpop.eup %6000 }
 0xed7   :  { %3731 = vrot.lane.b32.xlu1 %v7336_v13, %s8324_s29 }
 0xed8   :  { %3729 = vrot.lane.b32.xlu0 %v7340_v49, %s8324_s29 }
 0xee7   :  { %v3062_v8 = vpop.xlane.xlu0 %3061 }
 0xee8   :  { %v3067_v62 = vsub.f32 %v7630_v52, %v3062_v8 }
 0xeea   :  { %v3076_v35 = vmul.f32 1.442695, %v3067_v62 }
 0xeeb   :  { %v3361_v34 = vpop.xlane.xlu1 %3360  ;;  %v3364_v19 = vpop.xlane.xlu0 %3363 }
 0xeec   :  { %6002 = vpow2.f32 %v3076_v35  ;;  %v3374_v13 = vsub.f32 %v7636_v21, %v3361_v34  ;;  %v3375_v49 = vsub.f32 %v7640_v17, %v3364_v19 }
 0xeee   :  { %v3379_v63 = vmul.f32 1.442695, %v3374_v13  ;;  %v3381_v29 = vmul.f32 1.442695, %v3375_v49 }
 0xeef   :  { %v3367_v2 = vpop.xlane.xlu1 %3366  ;;  %v3370_v44 = vpop.xlane.xlu0 %3369 }
 0xef0   :  { %6004 = vpow2.f32 %v3379_v63  ;;  %v3376_v24 = vsub.f32 %v7648_v22, %v3367_v2  ;;  %v3377_v33 = vsub.f32 %v7652_v12, %v3370_v44  ;;  %v3087_v22 = vsel %vm613_vm10, %v7766_v41, 0.0 }
 0xef1   :  { %6006 = vpow2.f32 %v3381_v29 }
 0xef2   :  { %v3383_v42 = vmul.f32 1.442695, %v3376_v24  ;;  %v3385_v52 = vmul.f32 1.442695, %v3377_v33 }
 0xef3   :  { %v3373_v15 = vpop.xlane.xlu1 %3372  ;;  %v3672_v10 = vpop.xlane.xlu0 %3671 }
 0xef4   :  { %6008 = vpow2.f32 %v3383_v42  ;;  %v3378_v21 = vsub.f32 %v7660_v3, %v3373_v15  ;;  %v3685_v17 = vsub.f32 %v7664_v32, %v3672_v10 }
 0xef5   :  { %6010 = vpow2.f32 %v3385_v52 }
 0xef6   :  { %v3387_v58 = vmul.f32 1.442695, %v3378_v21  ;;  %v3690_v25 = vmul.f32 1.442695, %v3685_v17 }
 0xef7   :  { %v3675_v6 = vpop.xlane.xlu1 %3674  ;;  %v3678_v12 = vpop.xlane.xlu0 %3677  ;;  %3088 = vadd.xlane.f32.xlu0 %v3087_v22 }
 0xef8   :  { %6012 = vpow2.f32 %v3387_v58  ;;  %v3686_v4 = vsub.f32 %v7672_v47, %v3675_v6  ;;  %v3687_v16 = vsub.f32 %v7676_v1, %v3678_v12 }
 0xef9   :  { %v7774_v28 = vpop.eup %6002  ;;  %6014 = vpow2.f32 %v3690_v25 }
 0xefa   :  { %v3692_v3 = vmul.f32 1.442695, %v3686_v4  ;;  %v3694_v30 = vmul.f32 1.442695, %v3687_v16  ;;  %v3090_v32 = vsel %vm626_vm11, %v7774_v28, 0.0 }
 0xefb   :  { %v3681_v61 = vpop.xlane.xlu1 %3680  ;;  %3091 = vadd.xlane.f32.xlu0 %v3090_v32  ;;  %v3684_v45 = vpop.xlane.xlu0 %3683 }
 0xefc   :  { %6016 = vpow2.f32 %v3692_v3  ;;  %v3688_v8 = vsub.f32 %v7684_v5, %v3681_v61  ;;  %v3689_v62 = vsub.f32 %v7688_v37, %v3684_v45 }
 0xefd   :  { %v7780_v35 = vpop.eup %6004  ;;  %6018 = vpow2.f32 %v3694_v30 }
 0xefe   :  { %v7782_v47 = vpop.eup %6006  ;;  %v3696_v1 = vmul.f32 1.442695, %v3688_v8  ;;  %v3389_v34 = vsel %vm613_vm10, %v7780_v35, 0.0  ;;  %v3698_v19 = vmul.f32 1.442695, %v3689_v62 }
 0xeff   :  { %3390 = vadd.xlane.f32.xlu1 %v3389_v34  ;;  %v3392_v13 = vsel %vm613_vm10, %v7782_v47, 0.0 }
 0xf00   :  { %6020 = vpow2.f32 %v3696_v1  ;;  %3393 = vadd.xlane.f32.xlu0 %v3392_v13 }
 0xf01   :  { %v7788_v49 = vpop.eup %6008  ;;  %6022 = vpow2.f32 %v3698_v19 }
 0xf02   :  { %v7790_v5 = vpop.eup %6010  ;;  %v3395_v37 = vsel %vm613_vm10, %v7788_v49, 0.0 }
 0xf03   :  { %3396 = vadd.xlane.f32.xlu1 %v3395_v37  ;;  %v3398_v63 = vsel %vm613_vm10, %v7790_v5, 0.0 }
 0xf04   :  { %3399 = vadd.xlane.f32.xlu0 %v3398_v63 }
 0xf05   :  { %v7796_v29 = vpop.eup %6012 }
 0xf06   :  { %v7798_v2 = vpop.eup %6014  ;;  %v3401_v44 = vsel %vm626_vm11, %v7796_v29, 0.0 }
 0xf07   :  { %v3700_v24 = vsel %vm613_vm10, %v7798_v2, 0.0 }
 0xf08   :  { %3701 = vadd.xlane.f32.xlu1 %v3700_v24  ;;  %3402 = vadd.xlane.f32.xlu0 %v3401_v44 }
 0xf09   :  { %v7804_v33 = vpop.eup %6016 }
 0xf0a   :  { %v7806_v42 = vpop.eup %6018  ;;  %v3703_v52 = vsel %vm613_vm10, %v7804_v33, 0.0 }
 0xf0b   :  { %v3706_v15 = vsel %vm613_vm10, %v7806_v42, 0.0 }
 0xf0c   :  { %3707 = vadd.xlane.f32.xlu1 %v3706_v15  ;;  %3704 = vadd.xlane.f32.xlu0 %v3703_v52 }
 0xf0d   :  { %v7812_v10 = vpop.eup %6020 }
 0xf0e   :  { %v3709_v21 = vsel %vm613_vm10, %v7812_v10, 0.0  ;;  %v7816_v17 = vpop.eup %6022 }
 0xf0f   :  { %v3712_v58 = vsel %vm626_vm11, %v7816_v17, 0.0 }
 0xf10   :  { %3710 = vadd.xlane.f32.xlu0 %v3709_v21 }
 0xf14   :  { %3713 = vadd.xlane.f32.xlu0 %v3712_v58 }
 0xf1d   :  { %3727 = vrot.lane.b32.xlu1 %v7350_v18, %s8324_s29 }
 0xf2a   :  { %3725 = vrot.lane.b32.xlu0 %v7348_v56, %s8324_s29 }
 0xf33   :  { %v2769_v25 = vpop.xlane.xlu1 %2768 }
 0xf34   :  { %6024 = vrcp.f32 %v2769_v25 }
 0xf37   :  { %v2772_v22 = vpop.xlane.xlu0 %2771 }
 0xf38   :  { %6026 = vrcp.f32 %v2772_v22 }
 0xf3b   :  { %v2775_v6 = vpop.xlane.xlu1 %2774 }
 0xf3c   :  { %6028 = vrcp.f32 %v2775_v6 }
 0xf3f   :  { %v2778_v12 = vpop.xlane.xlu0 %2777 }
 0xf40   :  { %6030 = vrcp.f32 %v2778_v12 }
 0xf41   :  { %v6025_v4 = vpop.eup %6024 }
 0xf42   :  { %v2787_v16 = vmul.f32 %v6025_v4, %v7717_v51 }
 0xf43   :  { %v2781_v3 = vpop.xlane.xlu1 %2780 }
 0xf44   :  { %6032 = vrcp.f32 %v2781_v3  ;;  %5574 = vmatmul.mubr.msk.f32.vlgmr.msra.gmra.mxu1 %vm613_vm10, %v2787_v16 }
 0xf45   :  { %v6027_v30 = vpop.eup %6026  ;;  %5614 = vmatpush3.msk.msra.mxu1 %vm699_vm6, %v7698_v40  ;;  %5576 = vmatprep.mubr.msk.f32.mxu1 %vm6110_vm4, %v6109_v59 }
 0xf46   :  { %5615 = vmatprep.subr.mxu1 %v6109_v59  ;;  %v2788_v56 = vmul.f32 %v6027_v30, %v7722_v57 }
 0xf47   :  { %5616 = vmatpush3.msra.mxu1 %v7694_v31  ;;  %v3080_v18 = vpop.xlane.xlu1 %3079 }
 0xf48   :  { %5617 = vmatprep.subr.mxu1 %v6109_v59  ;;  %6034 = vrcp.f32 %v3080_v18  ;;  %5577 = vmatmul.mubr.msk.f32.gmra.mxu1 %vm613_vm10, %v2788_v56 }
 0xf49   :  { %v6029_v51 = vpop.eup %6028  ;;  %5618 = vmatpush3.msra.mxu1 %v7702_v0  ;;  %5579 = vmatprep.mubr.msk.f32.mxu1 %vm6110_vm4, %v6109_v59 }
 0xf4a   :  { %5619 = vmatprep.subr.mxu1 %v6109_v59  ;;  %v2789_v40 = vmul.f32 %v6029_v51, %v7727_v26 }
 0xf4b   :  { %5620 = vmatpush3.msra.mxu1 %v7696_v20  ;;  %v3083_v57 = vpop.xlane.xlu0 %3082 }
 0xf4c   :  { %5621 = vmatprep.subr.mxu1 %v6109_v59  ;;  %6036 = vrcp.f32 %v3083_v57  ;;  %5580 = vmatmul.mubr.msk.f32.gmra.mxu1 %vm613_vm10, %v2789_v40 }
 0xf4d   :  { %v6031_v31 = vpop.eup %6030  ;;  %5622 = vmatpush3.msra.mxu1 %v7700_v55  ;;  %5582 = vmatprep.mubr.msk.f32.mxu1 %vm6110_vm4, %v6109_v59 }
 0xf4e   :  { %v2790_v0 = vmul.f32 %v6031_v31, %v7732_v53  ;;  %5663 = vmatprep.subr.mxu1 %v6109_v59 }
 0xf4f   :  { %v3086_v32 = vpop.xlane.xlu1 %3085 }
 0xf50   :  { %6038 = vrcp.f32 %v3086_v32  ;;  %5583 = vmatmul.mubr.msk.f32.gmra.mxu1 %vm613_vm10, %v2790_v0 }
 0xf51   :  { %v6033_v20 = vpop.eup %6032  ;;  %5585 = vmatprep.mubr.msk.f32.mxu1 %vm6110_vm4, %v6109_v59 }
 0xf52   :  { %v2791_v26 = vmul.f32 %v6033_v20, %v7736_v14 }
 0xf54   :  { %5586 = vmatmul.mubr.msk.f32.gmra.mxu1 %vm613_vm10, %v2791_v26 }
 0xf55   :  { %v6035_v55 = vpop.eup %6034  ;;  %5623 = vmatprep.mubr.msk.f32.mxu1 %vm6110_vm4, %v6109_v59 }
 0xf56   :  { %v3098_v53 = vmul.f32 %v6035_v55, %v7740_v27 }
 0xf58   :  { %5624 = vmatmul.mubr.msk.f32.vlgmr.msra.gmra.mxu1 %vm613_vm10, %v3098_v53 }
 0xf59   :  { %v6037_v61 = vpop.eup %6036  ;;  %5664 = vmatpush3.msk.msra.mxu1 %vm699_vm6, %v7706_v43  ;;  %5626 = vmatprep.mubr.msk.f32.mxu1 %vm6110_vm4, %v6109_v59 }
 0xf5a   :  { %5665 = vmatprep.subr.mxu1 %v6109_v59  ;;  %v3099_v14 = vmul.f32 %v6037_v61, %v7744_v39  ;;  %v3732_v39 = vpop.permute.xlu1 %3731 }
 0xf5b   :  { %5666 = vmatpush3.msra.mxu1 %v7704_v54  ;;  %v3730_v54 = vpop.permute.xlu0 %3729 }
 0xf5c   :  { %5667 = vmatprep.subr.mxu1 %v6109_v59  ;;  %5627 = vmatmul.mubr.msk.f32.gmra.mxu1 %vm613_vm10, %v3099_v14 }
 0xf5d   :  { %v6039_v27 = vpop.eup %6038  ;;  %5668 = vmatpush3.msra.mxu1 %v7710_v11  ;;  %5629 = vmatprep.mubr.msk.f32.mxu1 %vm6110_vm4, %v6109_v59 }
 0xf5e   :  { %5669 = vmatprep.subr.mxu1 %v6109_v59  ;;  %v3100_v43 = vmul.f32 %v6039_v27, %v7748_v60  ;;  %v4904_v27 = vld [vmem:[%s8267_s10 + $0x38] sm:$0xff] }
 0xf5f   :  { %5670 = vmatpush3.msra.mxu1 %v7708_v38  ;;  %5739 = vmatpush3.msra.mxu0 %v4904_v27 }
 0xf60   :  { %5671 = vmatprep.subr.mxu1 %v6109_v59  ;;  %5630 = vmatmul.mubr.msk.f32.gmra.mxu1 %vm613_vm10, %v3100_v43 }
 0xf61   :  { %5672 = vmatpush3.msra.mxu1 %v7759_v9  ;;  %5632 = vmatprep.mubr.msk.f32.mxu1 %vm6110_vm4, %v6109_v59 }
 0xf62   :  { %5713 = vmatprep.subr.mxu1 %v6109_v59  ;;  %5740 = vmatprep.subr.mxu0 %v6109_v59 }
 0xf80   :  { %v3089_v11 = vpop.xlane.xlu0 %3088 }
 0xf81   :  { %6040 = vrcp.f32 %v3089_v11 }
 0xf84   :  { %v3092_v45 = vpop.xlane.xlu0 %3091 }
 0xf85   :  { %6042 = vrcp.f32 %v3092_v45  ;;  %v4902_v45 = vld [vmem:[%s8267_s10 + $0x28] sm:$0xff] }
 0xf88   :  { %v3391_v60 = vpop.xlane.xlu1 %3390 }
 0xf89   :  { %6044 = vrcp.f32 %v3391_v60  ;;  %v3394_v38 = vpop.xlane.xlu0 %3393 }
 0xf8a   :  { %6046 = vrcp.f32 %v3394_v38  ;;  %v4901_v38 = vld [vmem:[%s8267_s10 + $0x20] sm:$0xff] }
 0xf8c   :  { %v3397_v8 = vpop.xlane.xlu1 %3396 }
 0xf8d   :  { %v3400_v62 = vpop.xlane.xlu0 %3399  ;;  %6048 = vrcp.f32 %v3397_v8 }
 0xf8e   :  { %v6041_v1 = vpop.eup %6040  ;;  %6050 = vrcp.f32 %v3400_v62 }
 0xf8f   :  { %v3101_v9 = vmul.f32 %v6041_v1, %v7766_v41 }
 0xf91   :  { %v3403_v34 = vpop.xlane.xlu0 %3402  ;;  %5633 = vmatmul.mubr.msk.f32.gmra.mxu1 %vm613_vm10, %v3101_v9  ;;  %v3702_v13 = vpop.xlane.xlu1 %3701 }
 0xf92   :  { %v6043_v19 = vpop.eup %6042  ;;  %5635 = vmatprep.mubr.msk.f32.mxu1 %vm6110_vm4, %v6109_v59  ;;  %6052 = vrcp.f32 %v3403_v34 }
 0xf93   :  { %v3102_v37 = vmul.f32 %v6043_v19, %v7774_v28  ;;  %6054 = vrcp.f32 %v3702_v13 }
 0xf95   :  { %v3705_v63 = vpop.xlane.xlu0 %3704  ;;  %5636 = vmatmul.mubr.msk.f32.gmra.mxu1 %vm613_vm10, %v3102_v37  ;;  %v3708_v52 = vpop.xlane.xlu1 %3707 }
 0xf96   :  { %v6045_v44 = vpop.eup %6044  ;;  %5673 = vmatprep.mubr.msk.f32.mxu1 %vm6110_vm4, %v6109_v59  ;;  %6056 = vrcp.f32 %v3705_v63 }
 0xf97   :  { %v3409_v41 = vmul.f32 %v6045_v44, %v7780_v35  ;;  %v6047_v24 = vpop.eup %6046  ;;  %6058 = vrcp.f32 %v3708_v52 }
 0xf98   :  { %v3410_v28 = vmul.f32 %v6047_v24, %v7782_v47 }
 0xf99   :  { %v3711_v15 = vpop.xlane.xlu0 %3710  ;;  %5674 = vmatmul.mubr.msk.f32.vlgmr.msra.gmra.mxu1 %vm613_vm10, %v3409_v41 }
 0xf9a   :  { %5714 = vmatpush3.msk.msra.mxu1 %vm699_vm6, %v7757_v48  ;;  %5676 = vmatprep.mubr.msk.f32.mxu1 %vm6110_vm4, %v6109_v59  ;;  %v6049_v21 = vpop.eup %6048  ;;  %v3728_v48 = vpop.permute.xlu1 %3727  ;;  %6060 = vrcp.f32 %v3711_v15 }
 0xf9b   :  { %5715 = vmatprep.subr.mxu1 %v6109_v59  ;;  %v3411_v58 = vmul.f32 %v6049_v21, %v7788_v49  ;;  %v6051_v25 = vpop.eup %6050 }
 0xf9c   :  { %5716 = vmatpush3.msra.mxu1 %v3732_v39  ;;  %v3412_v22 = vmul.f32 %v6051_v25, %v7790_v5  ;;  %v4903_v39 = vld [vmem:[%s8267_s10 + $0x30] sm:$0xff]  ;;  %s8327_s10 = smov 24  }
 0xf9d   :  { %5717 = vmatprep.subr.mxu1 %v6109_v59  ;;  %v3714_v35 = vpop.xlane.xlu0 %3713  ;;  %5677 = vmatmul.mubr.msk.f32.gmra.mxu1 %vm613_vm10, %v3410_v28 }
 0xf9e   :  { %5718 = vmatpush3.msra.mxu1 %v3730_v54  ;;  %5679 = vmatprep.mubr.msk.f32.mxu1 %vm6110_vm4, %v6109_v59  ;;  %6062 = vrcp.f32 %v3714_v35 }
 0xf9f   :  { %5719 = vmatprep.subr.mxu1 %v6109_v59  ;;  %v6053_v6 = vpop.eup %6052  ;;  %5741 = vmatpush3.msra.mxu0 %v4903_v39 }
 0xfa0   :  { %5720 = vmatpush3.msra.mxu1 %v3728_v48  ;;  %v3413_v49 = vmul.f32 %v6053_v6, %v7796_v29  ;;  %v6055_v12 = vpop.eup %6054  ;;  %5742 = vmatprep.subr.mxu0 %v6109_v59 }
 0xfa1   :  { %5721 = vmatprep.subr.mxu1 %v6109_v59  ;;  %v3726_v47 = vpop.permute.xlu0 %3725  ;;  %5680 = vmatmul.mubr.msk.f32.gmra.mxu1 %vm613_vm10, %v3411_v58  ;;  %v3720_v4 = vmul.f32 %v6055_v12, %v7798_v2 }
 0xfa2   :  { %5722 = vmatpush3.msra.mxu1 %v3726_v47  ;;  %5682 = vmatprep.mubr.msk.f32.mxu1 %vm6110_vm4, %v6109_v59 }
 0xfa3   :  { %5761 = vmatprep.subr.mxu1 %v6109_v59  ;;  %v6057_v5 = vpop.eup %6056  ;;  %5743 = vmatpush3.msra.mxu0 %v4902_v45 }
 0xfa4   :  { %v3721_v16 = vmul.f32 %v6057_v5, %v7804_v33  ;;  %v6059_v3 = vpop.eup %6058  ;;  %5744 = vmatprep.subr.mxu0 %v6109_v59 }
 0xfa5   :  { %5683 = vmatmul.mubr.msk.f32.gmra.mxu1 %vm613_vm10, %v3412_v22  ;;  %v3722_v29 = vmul.f32 %v6059_v3, %v7806_v42  ;;  %5745 = vmatpush3.msra.mxu0 %v4901_v38 }
 0xfa6   :  { %5685 = vmatprep.mubr.msk.f32.mxu1 %vm6110_vm4, %v6109_v59  ;;  %5784 = vmatprep.subr.mxu0 %v6109_v59 }
 0xfa7   :  { %v6061_v30 = vpop.eup %6060 }
 0xfa8   :  { %v3723_v2 = vmul.f32 %v6061_v30, %v7812_v10 }
 0xfa9   :  { %5686 = vmatmul.mubr.msk.f32.gmra.mxu1 %vm613_vm10, %v3413_v49 }
 0xfaa   :  { %5723 = vmatprep.mubr.msk.f32.mxu1 %vm6110_vm4, %v6109_v59 }
 0xfab   :  { %v6063_v56 = vpop.eup %6062 }
 0xfac   :  { %v3724_v33 = vmul.f32 %v6063_v56, %v7816_v17 }
 0xfad   :  { %5724 = vmatmul.mubr.msk.f32.vlgmr.msra.gmra.mxu1 %vm613_vm10, %v3720_v4 }
 0xfae   :  { %5726 = vmatprep.mubr.msk.f32.mxu1 %vm6110_vm4, %v6109_v59 }
 0xfb1   :  { %5727 = vmatmul.mubr.msk.f32.gmra.mxu1 %vm613_vm10, %v3721_v16 }
 0xfb2   :  { %5729 = vmatprep.mubr.msk.f32.mxu1 %vm6110_vm4, %v6109_v59 }
 0xfb5   :  { %5730 = vmatmul.mubr.msk.f32.gmra.mxu1 %vm613_vm10, %v3722_v29 }
 0xfb6   :  { %5732 = vmatprep.mubr.msk.f32.mxu1 %vm6110_vm4, %v6109_v59 }
 0xfb9   :  { %5733 = vmatmul.mubr.msk.f32.gmra.mxu1 %vm613_vm10, %v3723_v2 }
 0xfba   :  { %5735 = vmatprep.mubr.msk.f32.mxu1 %vm6110_vm4, %v6109_v59 }
 0xfbd   :  { %5736 = vmatmul.mubr.msk.f32.gmra.mxu1 %vm613_vm10, %v3724_v33 }
 0xfbe   :  { %5769 = vmatprep.mubr.msk.f32.mxu1 %vm6110_vm4, %v6109_v59 }
0x1004   :  { %v7933_v42 = vpop.f32.mrf.mxu1 }
0x1006   :  { %v5575_v18 = vpop.f32.mrf.mxu1 }
0x1008   :  { %v7935_v51 = vpop.f32.mrf.mxu1 }
0x100a   :  { %v5578_v40 = vpop.f32.mrf.mxu1 }
0x100c   :  { %v7937_v10 = vpop.f32.mrf.mxu1 }
0x100e   :  { %v5581_v57 = vpop.f32.mrf.mxu1 }
0x1010   :  { %v7939_v31 = vpop.f32.mrf.mxu1 }
0x1012   :  { %v5584_v0 = vpop.f32.mrf.mxu1 }
0x1014   :  { %v7941_v32 = vpop.f32.mrf.mxu1 }
0x1016   :  { %v5587_v17 = vpop.f32.mrf.mxu1 }
0x1018   :  { %v3200_v20 = vpop.f32.mrf.mxu1 }
0x1019   :  { %3851 = vrot.lane.b32.xlu1 %v3200_v20, %s8325_s30 }
0x101a   :  { %v5625_v26 = vpop.f32.mrf.mxu1 }
0x101c   :  { %v3205_v55 = vpop.f32.mrf.mxu1 }
0x101d   :  { %3853 = vrot.lane.b32.xlu0 %v3205_v55, %s8325_s30 }
0x101e   :  { %v5628_v53 = vpop.f32.mrf.mxu1 }
0x1020   :  { %v3210_v61 = vpop.f32.mrf.mxu1 }
0x1021   :  { %3855 = vrot.lane.b32.xlu1 %v3210_v61, %s8325_s30 }
0x1022   :  { %v5631_v14 = vpop.f32.mrf.mxu1 }
0x1051   :  { %v3215_v43 = vpop.f32.mrf.mxu1 }
0x1053   :  { %v5634_v54 = vpop.f32.mrf.mxu1 }
0x1055   :  { %v3220_v11 = vpop.f32.mrf.mxu1 }
0x1057   :  { %v5637_v60 = vpop.f32.mrf.mxu1 }
0x1059   :  { %v3511_v8 = vpop.f32.mrf.mxu1 }
0x105a   :  { %3871 = vrot.lane.b32.xlu0 %v3511_v8, %s8326_s8 }
0x105b   :  { %v5675_v62 = vpop.f32.mrf.mxu1 }
0x105d   :  { %v3516_v1 = vpop.f32.mrf.mxu1 }
0x105e   :  { %3873 = vrot.lane.b32.xlu1 %v3516_v1, %s8326_s8 }
0x105f   :  { %v5678_v9 = vpop.f32.mrf.mxu1 }
0x1061   :  { %v3521_v34 = vpop.f32.mrf.mxu1 }
0x1062   :  { %3875 = vrot.lane.b32.xlu0 %v3521_v34, %s8326_s8 }
0x1063   :  { %v5681_v19 = vpop.f32.mrf.mxu1 }
0x1065   :  { %v3526_v13 = vpop.f32.mrf.mxu1 }
0x1067   :  { %v5684_v37 = vpop.f32.mrf.mxu1 }
0x1069   :  { %v3531_v63 = vpop.f32.mrf.mxu1 }
0x106b   :  { %v5687_v44 = vpop.f32.mrf.mxu1 }
0x106d   :  { %v3822_v41 = vpop.f32.mrf.mxu1 }
0x106e   :  { %3891 = vrot.lane.b32.xlu1 %v3822_v41, %s8327_s10 }
0x106f   :  { %v5725_v24 = vpop.f32.mrf.mxu1 }
0x1071   :  { %v3827_v52 = vpop.f32.mrf.mxu1 }
0x1072   :  { %3877 = vrot.lane.b32.xlu1 %v3526_v13, %s8326_s8  ;;  %3893 = vrot.lane.b32.xlu0 %v3827_v52, %s8327_s10 }
0x1073   :  { %v5728_v15 = vpop.f32.mrf.mxu1 }
0x1075   :  { %v3832_v28 = vpop.f32.mrf.mxu1 }
0x1076   :  { %3857 = vrot.lane.b32.xlu0 %v3215_v43, %s8325_s30  ;;  %3895 = vrot.lane.b32.xlu1 %v3832_v28, %s8327_s10  ;;  %v4906_v43 = vld [vmem:[%s8268_s11 + $0x1] ss:$0 sm:$0xff] }
0x1077   :  { %v5731_v21 = vpop.f32.mrf.mxu1 }
0x1079   :  { %v3837_v35 = vpop.f32.mrf.mxu1 }
0x107a   :  { %3859 = vrot.lane.b32.xlu1 %v3220_v11, %s8325_s30  ;;  %3897 = vrot.lane.b32.xlu0 %v3837_v35, %s8327_s10 }
0x107b   :  { %v5734_v48 = vpop.f32.mrf.mxu1 }
0x107d   :  { %v3842_v58 = vpop.f32.mrf.mxu1 }
0x107e   :  { %3879 = vrot.lane.b32.xlu0 %v3531_v63, %s8326_s8  ;;  %3899 = vrot.lane.b32.xlu1 %v3842_v58, %s8327_s10 }
0x107f   :  { %v5737_v25 = vpop.f32.mrf.mxu1 }
0x108b   :  { %v3852_v47 = vpop.permute.xlu1 %3851 }
0x108c   :  { %v3906_v4 = vsel %vm492_vm5, %v7933_v42, %v3852_v47 }
0x108f   :  { %v3854_v22 = vpop.permute.xlu0 %3853 }
0x1090   :  { %v3907_v30 = vsel %vm492_vm5, %v7935_v51, %v3854_v22 }
0x1093   :  { %v3856_v6 = vpop.permute.xlu1 %3855 }
0x1094   :  { %v3908_v18 = vsel %vm492_vm5, %v7937_v10, %v3856_v6 }
0x10cc   :  { %v3872_v49 = vpop.permute.xlu0 %3871 }
0x10cd   :  { %v3911_v5 = vsel %vm86_vm0, %v3906_v4, %v3872_v49 }
0x10d0   :  { %v3874_v12 = vpop.permute.xlu1 %3873 }
0x10d1   :  { %v3912_v2 = vsel %vm86_vm0, %v3907_v30, %v3874_v12 }
0x10d4   :  { %v3876_v16 = vpop.permute.xlu0 %3875 }
0x10d5   :  { %v3913_v40 = vsel %vm86_vm0, %v3908_v18, %v3876_v16 }
0x10e0   :  { %v3892_v3 = vpop.permute.xlu1 %3891 }
0x10e1   :  { %v3916_v29 = vsel %vm1795_vm12, %v3911_v5, %v3892_v3 }
0x10e2   :  { %5747 = vmatmul.mubr.msk.f32.vlgmr.msra.gmra.mxu0 %vm193_vm2, %v3916_v29 }
0x10e3   :  { %5749 = vmatprep.mubr.msk.f32.mxu0 %vm6110_vm4, %v6109_v59 }
0x10e4   :  { %v3878_v56 = vpop.permute.xlu1 %3877  ;;  %v3894_v33 = vpop.permute.xlu0 %3893 }
0x10e5   :  { %v3917_v42 = vsel %vm1795_vm12, %v3912_v2, %v3894_v33 }
0x10e6   :  { %5750 = vmatmul.mubr.msk.f32.gmra.mxu0 %vm193_vm2, %v3917_v42 }
0x10e7   :  { %5752 = vmatprep.mubr.msk.f32.mxu0 %vm6110_vm4, %v6109_v59 }
0x10e8   :  { %v3858_v51 = vpop.permute.xlu0 %3857  ;;  %v3896_v57 = vpop.permute.xlu1 %3895 }
0x10e9   :  { %v3909_v0 = vsel %vm492_vm5, %v7939_v31, %v3858_v51  ;;  %v3918_v17 = vsel %vm1795_vm12, %v3913_v40, %v3896_v57  ;;  %v4919_v57 = vld [vmem:[%s8269_s14 + $0x38] sm:$0xff] }
0x10ea   :  { %5753 = vmatmul.mubr.msk.f32.gmra.mxu0 %vm193_vm2, %v3918_v17  ;;  %v3914_v10 = vsel %vm86_vm0, %v3909_v0, %v3878_v56  ;;  %5762 = vmatpush3.msra.mxu1 %v4919_v57  ;;  %v4918_v0 = vld [vmem:[%s8269_s14 + $0x30] sm:$0xff]  ;;  %v4917_v17 = vld [vmem:[%s8269_s14 + $0x28] sm:$0xff] }
0x10eb   :  { %5755 = vmatprep.mubr.msk.f32.mxu0 %vm6110_vm4, %v6109_v59  ;;  %5763 = vmatprep.subr.mxu1 %v6109_v59 }
0x10ec   :  { %v3860_v20 = vpop.permute.xlu1 %3859  ;;  %v3898_v26 = vpop.permute.xlu0 %3897  ;;  %5764 = vmatpush3.msra.mxu1 %v4918_v0 }
0x10ed   :  { %v3919_v55 = vsel %vm1795_vm12, %v3914_v10, %v3898_v26  ;;  %v3910_v31 = vsel %vm492_vm5, %v7941_v32, %v3860_v20  ;;  %5765 = vmatprep.subr.mxu1 %v6109_v59  ;;  %v4916_v20 = vld [vmem:[%s8269_s14 + $0x20] sm:$0xff] }
0x10ee   :  { %5756 = vmatmul.mubr.msk.f32.gmra.mxu0 %vm193_vm2, %v3919_v55  ;;  %5766 = vmatpush3.msra.mxu1 %v4917_v17 }
0x10ef   :  { %5758 = vmatprep.mubr.msk.f32.mxu0 %vm6110_vm4, %v6109_v59  ;;  %5767 = vmatprep.subr.mxu1 %v6109_v59 }
0x10f0   :  { %v3880_v53 = vpop.permute.xlu0 %3879  ;;  %v3900_v61 = vpop.permute.xlu1 %3899  ;;  %5768 = vmatpush3.msra.mxu1 %v4916_v20 }
0x10f1   :  { %v3915_v14 = vsel %vm86_vm0, %v3910_v31, %v3880_v53  ;;  %5815 = vmatprep.subr.mxu1 %v6109_v59 }
0x10f2   :  { %v3920_v27 = vsel %vm1795_vm12, %v3915_v14, %v3900_v61 }
0x10f3   :  { %5759 = vmatmul.mubr.msk.f32.gmra.mxu0 %vm193_vm2, %v3920_v27 }
0x10f4   :  { %5800 = vmatprep.mubr.msk.f32.mxu0 %vm6110_vm4, %v6109_v59 }
0x11a2   :  { %v4015_v54 = vpop.f32.mrf.mxu0 }
0x11a3   :  { %v4016_v11 = vadd.f32 %v4906_v43, %v4015_v54 }
0x11a4   :  { %v5748_v39 = vpop.f32.mrf.mxu0 }
0x11a5   :  { %v8013_v32 = vadd.f32 %v4016_v11, %v7247_v50 }
0x11a6   :  { %v4020_v45 = vpop.f32.mrf.mxu0 }
0x11a7   :  { %v4021_v60 = vadd.f32 %v4906_v43, %v4020_v45  ;;  %v4048_v38 = vsel %vm193_vm2, %v8013_v32, 0.0 }
0x11a8   :  { %v5751_v8 = vpop.f32.mrf.mxu0  ;;  %4049 = vadd.xlane.f32.xlu0 %v4048_v38  ;;  %v4914_v38 = vld [vmem:[%s8270_s12 + $0x1] ss:$0 sm:$0xff] }
0x11a9   :  { %v8018_v62 = vadd.f32 %v4021_v60, %v7252_v7 }
0x11aa   :  { %v4025_v1 = vpop.f32.mrf.mxu0 }
0x11ab   :  { %v4026_v9 = vadd.f32 %v4906_v43, %v4025_v1  ;;  %v4051_v34 = vsel %vm193_vm2, %v8018_v62, 0.0 }
0x11ac   :  { %v5754_v19 = vpop.f32.mrf.mxu0  ;;  %4052 = vadd.xlane.f32.xlu1 %v4051_v34  ;;  %v4915_v34 = vld [vmem:[%s8271_s13 + $0x1] ss:$0 sm:$0xff] }
0x11ad   :  { %v8023_v50 = vadd.f32 %v4026_v9, %v7257_v23 }
0x11ae   :  { %v4030_v13 = vpop.f32.mrf.mxu0 }
0x11af   :  { %v4031_v37 = vadd.f32 %v4906_v43, %v4030_v13  ;;  %v4054_v63 = vsel %vm193_vm2, %v8023_v50, 0.0 }
0x11b0   :  { %4055 = vadd.xlane.f32.xlu0 %v4054_v63  ;;  %v5757_v44 = vpop.f32.mrf.mxu0 }
0x11b1   :  { %v8028_v7 = vadd.f32 %v4031_v37, %v7262_v36 }
0x11b3   :  { %v4035_v41 = vpop.f32.mrf.mxu0  ;;  %v4057_v24 = vsel %vm193_vm2, %v8028_v7, 0.0 }
0x11b4   :  { %v4036_v52 = vadd.f32 %v4906_v43, %v4035_v41  ;;  %4058 = vadd.xlane.f32.xlu0 %v4057_v24 }
0x11b5   :  { %v5760_v15 = vpop.f32.mrf.mxu0 }
0x11b6   :  { %v8033_v23 = vadd.f32 %v4036_v52, %v7267_v46 }
0x11b8   :  { %v4060_v28 = vsel %vm279_vm3, %v8033_v23, 0.0 }
0x11b9   :  { %4061 = vadd.xlane.f32.xlu0 %v4060_v28 }
0x1231   :  { %v4050_v21 = vpop.xlane.xlu0 %4049 }
0x1232   :  { %v4063_v35 = vmul.f32 0.03125, %v4050_v21 }
0x1234   :  { %v4068_v48 = vsub.f32 %v8013_v32, %v4063_v35 }
0x1235   :  { %v4053_v36 = vpop.xlane.xlu1 %4052 }
0x1236   :  { %v4064_v58 = vmul.f32 0.03125, %v4053_v36  ;;  %v4073_v25 = vmul.f32 %v4068_v48, %v4068_v48 }
0x1238   :  { %v4069_v47 = vsub.f32 %v8018_v62, %v4064_v58  ;;  %v4078_v22 = vsel %vm193_vm2, %v4073_v25, 0.0 }
0x1239   :  { %v4056_v6 = vpop.xlane.xlu0 %4055  ;;  %4079 = vadd.xlane.f32.xlu1 %v4078_v22 }
0x123a   :  { %v4065_v49 = vmul.f32 0.03125, %v4056_v6  ;;  %v4074_v46 = vmul.f32 %v4069_v47, %v4069_v47  ;;  %v4934_v6 = vld [vmem:[%s8272_s16 + $0x78] sm:$0xff] }
0x123b   :  { %5785 = vmatpush3.msra.mxu0 %v4934_v6 }
0x123c   :  { %v4070_v12 = vsub.f32 %v8023_v50, %v4065_v49  ;;  %v4081_v4 = vsel %vm193_vm2, %v4074_v46, 0.0  ;;  %5786 = vmatprep.subr.mxu0 %v6109_v59  ;;  %v4933_v49 = vld [vmem:[%s8272_s16 + $0x70] sm:$0xff]  ;;  %v4932_v46 = vld [vmem:[%s8272_s16 + $0x68] sm:$0xff] }
0x123d   :  { %v4059_v5 = vpop.xlane.xlu0 %4058  ;;  %4082 = vadd.xlane.f32.xlu0 %v4081_v4  ;;  %5787 = vmatpush3.msra.mxu0 %v4933_v49  ;;  %v4930_v4 = vld [vmem:[%s8272_s16 + $0x58] sm:$0xff] }
0x123e   :  { %v4066_v16 = vmul.f32 0.03125, %v4059_v5  ;;  %v4075_v3 = vmul.f32 %v4070_v12, %v4070_v12  ;;  %5788 = vmatprep.subr.mxu0 %v6109_v59  ;;  %v4929_v5 = vld [vmem:[%s8272_s16 + $0x50] sm:$0xff] }
0x123f   :  { %5789 = vmatpush3.msra.mxu0 %v4932_v46 }
0x1240   :  { %v4071_v29 = vsub.f32 %v8028_v7, %v4066_v16  ;;  %v4084_v30 = vsel %vm193_vm2, %v4075_v3, 0.0  ;;  %5790 = vmatprep.subr.mxu0 %v6109_v59  ;;  %v4928_v16 = vld [vmem:[%s8272_s16 + $0x48] sm:$0xff]  ;;  %v4927_v3 = vld [vmem:[%s8272_s16 + $0x40] sm:$0xff] }
0x1241   :  { %4085 = vadd.xlane.f32.xlu1 %v4084_v30 }
0x1242   :  { %v4062_v2 = vpop.xlane.xlu0 %4061  ;;  %v4076_v56 = vmul.f32 %v4071_v29, %v4071_v29 }
0x1243   :  { %v4067_v33 = vmul.f32 0.03125, %v4062_v2 }
0x1244   :  { %v4087_v42 = vsel %vm193_vm2, %v4076_v56, 0.0 }
0x1245   :  { %v4072_v18 = vsub.f32 %v8033_v23, %v4067_v33  ;;  %4088 = vadd.xlane.f32.xlu0 %v4087_v42 }
0x1247   :  { %v4077_v40 = vmul.f32 %v4072_v18, %v4072_v18 }
0x1249   :  { %v4090_v51 = vsel %vm279_vm3, %v4077_v40, 0.0 }
0x124a   :  { %4091 = vadd.xlane.f32.xlu1 %v4090_v51 }
0x12c2   :  { %v4080_v10 = vpop.xlane.xlu1 %4079 }
0x12c3   :  { %v4093_v26 = vmul.f32 0.03125, %v4080_v10 }
0x12c5   :  { %v4098_v55 = vadd.f32 1e-06, %v4093_v26 }
0x12c6   :  { %v4083_v31 = vpop.xlane.xlu0 %4082 }
0x12c7   :  { %6064 = vrsqrt.f32 %v4098_v55  ;;  %v4094_v53 = vmul.f32 0.03125, %v4083_v31 }
0x12c9   :  { %v4099_v61 = vadd.f32 1e-06, %v4094_v53 }
0x12ca   :  { %v4086_v14 = vpop.xlane.xlu1 %4085 }
0x12cb   :  { %6066 = vrsqrt.f32 %v4099_v61  ;;  %v4095_v27 = vmul.f32 0.03125, %v4086_v14 }
0x12cd   :  { %v4100_v43 = vadd.f32 1e-06, %v4095_v27 }
0x12ce   :  { %v4089_v54 = vpop.xlane.xlu0 %4088 }
0x12cf   :  { %6068 = vrsqrt.f32 %v4100_v43  ;;  %v4096_v11 = vmul.f32 0.03125, %v4089_v54 }
0x12d1   :  { %v4101_v39 = vadd.f32 1e-06, %v4096_v11 }
0x12d3   :  { %6070 = vrsqrt.f32 %v4101_v39  ;;  %v4092_v45 = vpop.xlane.xlu1 %4091 }
0x12d4   :  { %v6065_v60 = vpop.eup %6064  ;;  %v4097_v8 = vmul.f32 0.03125, %v4092_v45 }
0x12d5   :  { %v4108_v1 = vmul.f32 %v6065_v60, %v4068_v48 }
0x12d6   :  { %v4102_v9 = vadd.f32 1e-06, %v4097_v8 }
0x12d7   :  { %v4119_v19 = vmul.f32 %v4914_v38, %v4108_v1 }
0x12d8   :  { %v6067_v13 = vpop.eup %6066  ;;  %6072 = vrsqrt.f32 %v4102_v9 }
0x12d9   :  { %v4109_v37 = vmul.f32 %v6067_v13, %v4069_v47  ;;  %v4130_v63 = vadd.f32 %v4915_v34, %v4119_v19 }
0x12db   :  { %5770 = vmatmul.mubr.msk.f32.vlgmr.msra.gmra.mxu1 %vm193_vm2, %v4130_v63  ;;  %v4120_v44 = vmul.f32 %v4914_v38, %v4109_v37 }
0x12dc   :  { %v6069_v41 = vpop.eup %6068  ;;  %5772 = vmatprep.mubr.msk.f32.mxu1 %vm6110_vm4, %v6109_v59 }
0x12dd   :  { %v4110_v24 = vmul.f32 %v6069_v41, %v4070_v12  ;;  %v4131_v52 = vadd.f32 %v4915_v34, %v4120_v44  ;;  %v4931_v12 = vld [vmem:[%s8272_s16 + $0x60] sm:$0xff] }
0x12de   :  { %5791 = vmatpush3.msra.mxu0 %v4931_v12 }
0x12df   :  { %5773 = vmatmul.mubr.msk.f32.gmra.mxu1 %vm193_vm2, %v4131_v52  ;;  %v4121_v15 = vmul.f32 %v4914_v38, %v4110_v24  ;;  %5792 = vmatprep.subr.mxu0 %v6109_v59 }
0x12e0   :  { %v6071_v28 = vpop.eup %6070  ;;  %5775 = vmatprep.mubr.msk.f32.mxu1 %vm6110_vm4, %v6109_v59  ;;  %5793 = vmatpush3.msra.mxu0 %v4930_v4 }
0x12e1   :  { %v4111_v21 = vmul.f32 %v6071_v28, %v4071_v29  ;;  %v4132_v35 = vadd.f32 %v4915_v34, %v4121_v15  ;;  %5794 = vmatprep.subr.mxu0 %v6109_v59  ;;  %v4921_v29 = vld [vmem:[%s8273_s15 + $0x1] ss:$0 sm:$0xff] }
0x12e2   :  { %5795 = vmatpush3.msra.mxu0 %v4929_v5 }
0x12e3   :  { %5776 = vmatmul.mubr.msk.f32.gmra.mxu1 %vm193_vm2, %v4132_v35  ;;  %v4122_v48 = vmul.f32 %v4914_v38, %v4111_v21  ;;  %5796 = vmatprep.subr.mxu0 %v6109_v59 }
0x12e4   :  { %5778 = vmatprep.mubr.msk.f32.mxu1 %vm6110_vm4, %v6109_v59  ;;  %5797 = vmatpush3.msra.mxu0 %v4928_v16 }
0x12e5   :  { %v6073_v36 = vpop.eup %6072  ;;  %v4133_v58 = vadd.f32 %v4915_v34, %v4122_v48  ;;  %5798 = vmatprep.subr.mxu0 %v6109_v59 }
0x12e6   :  { %v4112_v25 = vmul.f32 %v6073_v36, %v4072_v18  ;;  %5799 = vmatpush3.msra.mxu0 %v4927_v3 }
0x12e7   :  { %5779 = vmatmul.mubr.msk.f32.gmra.mxu1 %vm193_vm2, %v4133_v58 }
0x12e8   :  { %5781 = vmatprep.mubr.msk.f32.mxu1 %vm6110_vm4, %v6109_v59  ;;  %v4123_v47 = vmul.f32 %v4914_v38, %v4112_v25 }
0x12ea   :  { %v4134_v22 = vadd.f32 %v4915_v34, %v4123_v47 }
0x12ec   :  { %5782 = vmatmul.mubr.msk.f32.gmra.mxu1 %vm193_vm2, %v4134_v22 }
0x12ed   :  { %5823 = vmatprep.mubr.msk.f32.mxu1 %vm6110_vm4, %v6109_v59 }
0x139b   :  { %v4229_v30 = vpop.f32.mrf.mxu1 }
0x139c   :  { %v8118_v2 = vadd.f32 %v4921_v29, %v4229_v30 }
0x139d   :  { %v5771_v56 = vpop.f32.mrf.mxu1 }
0x139e   :  { %v8121_v33 = vmul.f32 0.70710677, %v8118_v2 }
0x139f   :  { %v4234_v42 = vpop.f32.mrf.mxu1 }
0x13a0   :  { %v4263_v18 = vand.u32 2147483647, %v8121_v33  ;;  %v8124_v40 = vadd.f32 %v4921_v29, %v4234_v42  ;;  %vm4363_vm0 = vcmp.ge.f32.partialorder %v8121_v33, 0.0 }
0x13a1   :  { %v5774_v51 = vpop.f32.mrf.mxu1 }
0x13a2   :  { %v4268_v57 = vmul.f32 0.3275911, %v4263_v18  ;;  %v8127_v0 = vmul.f32 0.70710677, %v8124_v40  ;;  %v4333_v11 = vsub.f32 0.0, %v4263_v18 }
0x13a3   :  { %v4239_v17 = vpop.f32.mrf.mxu1 }
0x13a4   :  { %v4273_v20 = vadd.f32 1.0, %v4268_v57  ;;  %v4264_v10 = vand.u32 2147483647, %v8127_v0  ;;  %v8130_v26 = vadd.f32 %v4921_v29, %v4239_v17  ;;  %v4338_v9 = vmul.f32 %v4333_v11, %v4263_v18 }
0x13a5   :  { %v5777_v55 = vpop.f32.mrf.mxu1  ;;  %vm4364_vm5 = vcmp.ge.f32.partialorder %v8127_v0, 0.0 }
0x13a6   :  { %6074 = vrcp.f32 %v4273_v20  ;;  %v4269_v31 = vmul.f32 0.3275911, %v4264_v10  ;;  %v8133_v53 = vmul.f32 0.70710677, %v8130_v26  ;;  %v4334_v37 = vsub.f32 0.0, %v4264_v10 }
0x13a7   :  { %v4244_v61 = vpop.f32.mrf.mxu1  ;;  %v4343_v41 = vmul.f32 1.442695, %v4338_v9 }
0x13a8   :  { %v4274_v14 = vadd.f32 1.0, %v4269_v31  ;;  %v8135_v27 = vadd.f32 %v4921_v29, %v4244_v61  ;;  %v4265_v43 = vand.u32 2147483647, %v8133_v53  ;;  %v4339_v28 = vmul.f32 %v4334_v37, %v4264_v10 }
0x13a9   :  { %v5780_v54 = vpop.f32.mrf.mxu1  ;;  %vm4365_vm6 = vcmp.ge.f32.partialorder %v8133_v53, 0.0 }
0x13aa   :  { %6076 = vrcp.f32 %v4274_v14  ;;  %v8139_v39 = vmul.f32 0.70710677, %v8135_v27  ;;  %v4270_v45 = vmul.f32 0.3275911, %v4265_v43  ;;  %v4335_v21 = vsub.f32 0.0, %v4265_v43 }
0x13ab   :  { %v4345_v47 = vmul.f32 1.442695, %v4339_v28  ;;  %v4256_v53 = vmul.f32 0.5, %v8135_v27 }
0x13ac   :  { %v4266_v60 = vand.u32 2147483647, %v8139_v39  ;;  %v4249_v38 = vpop.f32.mrf.mxu1  ;;  %v4275_v8 = vadd.f32 1.0, %v4270_v45  ;;  %v4340_v6 = vmul.f32 %v4335_v21, %v4265_v43  ;;  %vm4366_vm9 = vcmp.ge.f32.partialorder %v8139_v39, 0.0 }
0x13ad   :  { %v8142_v1 = vadd.f32 %v4921_v29, %v4249_v38 }
0x13ae   :  { %v4271_v34 = vmul.f32 0.3275911, %v4266_v60  ;;  %v5783_v19 = vpop.f32.mrf.mxu1  ;;  %6078 = vrcp.f32 %v4275_v8  ;;  %v4336_v22 = vsub.f32 0.0, %v4266_v60  ;;  %v4347_v29 = vmul.f32 1.442695, %v4340_v6 }
0x13af   :  { %v8145_v13 = vmul.f32 0.70710677, %v8142_v1 }
0x13b0   :  { %v4276_v63 = vadd.f32 1.0, %v4271_v34  ;;  %v4341_v16 = vmul.f32 %v4336_v22, %v4266_v60 }
0x13b1   :  { %v4267_v44 = vand.u32 2147483647, %v8145_v13  ;;  %vm4367_vm10 = vcmp.ge.f32.partialorder %v8145_v13, 0.0 }
0x13b2   :  { %6080 = vrcp.f32 %v4276_v63  ;;  %v4349_v10 = vmul.f32 1.442695, %v4341_v16 }
0x13b3   :  { %v6075_v24 = vpop.eup %6074  ;;  %v4272_v52 = vmul.f32 0.3275911, %v4267_v44  ;;  %6082 = vpow2.f32 %v4343_v41  ;;  %v4337_v30 = vsub.f32 0.0, %v4267_v44 }
0x13b4   :  { %v4288_v15 = vmul.f32 1.0614054, %v6075_v24 }
0x13b5   :  { %v4277_v35 = vadd.f32 1.0, %v4272_v52  ;;  %v4342_v31 = vmul.f32 %v4337_v30, %v4267_v44 }
0x13b6   :  { %v4293_v48 = vadd.f32 -1.4531521, %v4288_v15 }
0x13b7   :  { %v6077_v36 = vpop.eup %6076  ;;  %6084 = vrcp.f32 %v4277_v35  ;;  %v4351_v19 = vmul.f32 1.442695, %v4342_v31 }
0x13b8   :  { %v4298_v58 = vmul.f32 %v6075_v24, %v4293_v48  ;;  %v4289_v25 = vmul.f32 1.0614054, %v6077_v36  ;;  %6086 = vpow2.f32 %v4345_v47 }
0x13b9   :  { %6088 = vpow2.f32 %v4347_v29 }
0x13ba   :  { %v4303_v49 = vadd.f32 1.4214138, %v4298_v58  ;;  %v4294_v46 = vadd.f32 -1.4531521, %v4289_v25  ;;  %6090 = vpow2.f32 %v4349_v10  ;;  %v4254_v10 = vmul.f32 0.5, %v8124_v40 }
0x13bb   :  { %v6079_v12 = vpop.eup %6078  ;;  %6092 = vpow2.f32 %v4351_v19 }
0x13bc   :  { %v4308_v4 = vmul.f32 %v6075_v24, %v4303_v49  ;;  %v4299_v5 = vmul.f32 %v6077_v36, %v4294_v46  ;;  %v4290_v3 = vmul.f32 1.0614054, %v6079_v12 }
0x13be   :  { %v4313_v56 = vadd.f32 -0.28449672, %v4308_v4  ;;  %v4304_v42 = vadd.f32 1.4214138, %v4299_v5  ;;  %v4295_v51 = vadd.f32 -1.4531521, %v4290_v3 }
0x13bf   :  { %v6081_v18 = vpop.eup %6080  ;;  %v4253_v5 = vmul.f32 0.5, %v8118_v2 }
0x13c0   :  { %v4318_v57 = vmul.f32 %v6075_v24, %v4313_v56  ;;  %v4309_v17 = vmul.f32 %v6077_v36, %v4304_v42  ;;  %v4291_v20 = vmul.f32 1.0614054, %v6081_v18  ;;  %v4300_v55 = vmul.f32 %v6079_v12, %v4295_v51  ;;  %v6083_v54 = vpop.eup %6082 }
0x13c2   :  { %v4323_v61 = vadd.f32 0.2548296, %v4318_v57  ;;  %v4314_v14 = vadd.f32 -0.28449672, %v4309_v17  ;;  %v4296_v43 = vadd.f32 -1.4531521, %v4291_v20 }
0x13c3   :  { %v4305_v11 = vadd.f32 1.4214138, %v4300_v55 }
0x13c4   :  { %v6085_v45 = vpop.eup %6084  ;;  %v4328_v60 = vmul.f32 %v6075_v24, %v4323_v61  ;;  %v4319_v38 = vmul.f32 %v6077_v36, %v4314_v14  ;;  %v4301_v8 = vmul.f32 %v6081_v18, %v4296_v43 }
0x13c5   :  { %v4310_v9 = vmul.f32 %v6079_v12, %v4305_v11  ;;  %v4292_v34 = vmul.f32 1.0614054, %v6085_v45  ;;  %v6087_v35 = vpop.eup %6086  ;;  %v4255_v11 = vmul.f32 0.5, %v8130_v26 }
0x13c6   :  { %v4353_v37 = vmul.f32 %v6083_v54, %v4328_v60  ;;  %v4324_v63 = vadd.f32 0.2548296, %v4319_v38  ;;  %v4306_v41 = vadd.f32 1.4214138, %v4301_v8  ;;  %v6089_v29 = vpop.eup %6088 }
0x13c7   :  { %v4315_v52 = vadd.f32 -0.28449672, %v4310_v9  ;;  %v4297_v15 = vadd.f32 -1.4531521, %v4292_v34  ;;  %v6091_v20 = vpop.eup %6090 }
0x13c8   :  { %v4358_v28 = vsub.f32 1.0, %v4353_v37  ;;  %v4329_v44 = vmul.f32 %v6077_v36, %v4324_v63  ;;  %v4311_v21 = vmul.f32 %v6081_v18, %v4306_v41  ;;  %v6093_v40 = vpop.eup %6092  ;;  %v4257_v41 = vmul.f32 0.5, %v8142_v1 }
0x13c9   :  { %v4320_v48 = vmul.f32 %v6079_v12, %v4315_v52  ;;  %v4302_v58 = vmul.f32 %v6085_v45, %v4297_v15  ;;  %v4936_v52 = vld [vmem:[%s8274_s17 + $0x1] ss:$0 sm:$0xff] }
0x13ca   :  { %v4368_v25 = vsub.f32 0.0, %v4358_v28  ;;  %v4354_v24 = vmul.f32 %v6087_v35, %v4329_v44  ;;  %v4316_v47 = vadd.f32 -0.28449672, %v4311_v21 }
0x13cb   :  { %v4325_v22 = vadd.f32 0.2548296, %v4320_v48  ;;  %v4307_v6 = vadd.f32 1.4214138, %v4302_v58 }
0x13cc   :  { %v4373_v49 = vsel %vm4363_vm0, %v4358_v28, %v4368_v25  ;;  %v4359_v46 = vsub.f32 1.0, %v4354_v24  ;;  %v4321_v4 = vmul.f32 %v6081_v18, %v4316_v47 }
0x13cd   :  { %v4378_v16 = vadd.f32 1.0, %v4373_v49  ;;  %v4330_v3 = vmul.f32 %v6079_v12, %v4325_v22  ;;  %v4312_v36 = vmul.f32 %v6085_v45, %v4307_v6 }
0x13ce   :  { %v4369_v30 = vsub.f32 0.0, %v4359_v46  ;;  %v4326_v56 = vadd.f32 0.2548296, %v4321_v4 }
0x13cf   :  { %v4383_v42 = vmul.f32 %v4378_v16, %v4253_v5  ;;  %v4355_v51 = vmul.f32 %v6089_v29, %v4330_v3  ;;  %v4317_v57 = vadd.f32 -0.28449672, %v4312_v36 }
0x13d0   :  { %v4374_v17 = vsel %vm4364_vm5, %v4359_v46, %v4369_v30  ;;  %v4331_v33 = vmul.f32 %v6081_v18, %v4326_v56 }
0x13d1   :  { %v4379_v55 = vadd.f32 1.0, %v4374_v17  ;;  %v4360_v31 = vsub.f32 1.0, %v4355_v51  ;;  %v4322_v61 = vmul.f32 %v6085_v45, %v4317_v57  ;;  %5801 = vmatmul.mubr.msk.f32.vlgmr.msra.gmra.mxu0 %vm2277_vm15, %v4383_v42 }
0x13d2   :  { %v4356_v2 = vmul.f32 %v6091_v20, %v4331_v33  ;;  %5803 = vmatprep.mubr.msk.f32.mxu0 %vm6110_vm4, %v6109_v59 }
0x13d3   :  { %v4384_v12 = vmul.f32 %v4379_v55, %v4254_v10  ;;  %v4370_v14 = vsub.f32 0.0, %v4360_v31  ;;  %v4327_v43 = vadd.f32 0.2548296, %v4322_v61 }
0x13d4   :  { %v4361_v0 = vsub.f32 1.0, %v4356_v2 }
0x13d5   :  { %v4375_v54 = vsel %vm4365_vm6, %v4360_v31, %v4370_v14  ;;  %v4332_v18 = vmul.f32 %v6085_v45, %v4327_v43  ;;  %5804 = vmatmul.mubr.msk.f32.gmra.mxu0 %vm2277_vm15, %v4384_v12 }
0x13d6   :  { %v4380_v60 = vadd.f32 1.0, %v4375_v54  ;;  %v4371_v38 = vsub.f32 0.0, %v4361_v0  ;;  %5806 = vmatprep.mubr.msk.f32.mxu0 %vm6110_vm4, %v6109_v59 }
0x13d7   :  { %v4357_v8 = vmul.f32 %v6093_v40, %v4332_v18 }
0x13d8   :  { %v4385_v9 = vmul.f32 %v4380_v60, %v4255_v11  ;;  %v4376_v34 = vsel %vm4366_vm9, %v4361_v0, %v4371_v38 }
0x13d9   :  { %v4381_v19 = vadd.f32 1.0, %v4376_v34  ;;  %v4362_v37 = vsub.f32 1.0, %v4357_v8  ;;  %v4607_v8 = vld [vmem:[%s8275_s20 + $0x18] sm:$0xff]  ;;  %v4605_v34 = vld [vmem:[%s8275_s20 + $0x8] sm:$0xff] }
0x13da   :  { %5807 = vmatmul.mubr.msk.f32.gmra.mxu0 %vm2277_vm15, %v4385_v9  ;;  %5816 = vmatpush3.msra.mxu1 %v4607_v8  ;;  %v4606_v9 = vld [vmem:[%s8275_s20 + $0x10] sm:$0xff] }
0x13db   :  { %v4386_v45 = vmul.f32 %v4381_v19, %v4256_v53  ;;  %v4372_v63 = vsub.f32 0.0, %v4362_v37  ;;  %5809 = vmatprep.mubr.msk.f32.mxu0 %vm6110_vm4, %v6109_v59  ;;  %5817 = vmatprep.subr.mxu1 %v6109_v59  ;;  %v4604_v53 = vld [vmem:[%s8275_s20] sm:$0xff]  ;;  %v27_v19 = vstv %s8276_s21 }
0x13dc   :  { %5818 = vmatpush3.msra.mxu1 %v4606_v9  ;;  %28 = vst [vmem:[#allocation3] sm:$0x1] %v27_v19 }
0x13dd   :  { %v4377_v26 = vsel %vm4367_vm10, %v4362_v37, %v4372_v63  ;;  %5819 = vmatprep.subr.mxu1 %v6109_v59 }
0x13de   :  { %v4382_v39 = vadd.f32 1.0, %v4377_v26  ;;  %5810 = vmatmul.mubr.msk.f32.gmra.mxu0 %vm2277_vm15, %v4386_v45  ;;  %5820 = vmatpush3.msra.mxu1 %v4605_v34 }
0x13df   :  { %5812 = vmatprep.mubr.msk.f32.mxu0 %vm6110_vm4, %v6109_v59  ;;  %5821 = vmatprep.subr.mxu1 %v6109_v59 }
0x13e0   :  { %v4387_v27 = vmul.f32 %v4382_v39, %v4257_v41  ;;  %5822 = vmatpush3.msra.mxu1 %v4604_v53 }
0x13e2   :  { %5813 = vmatmul.mubr.msk.f32.gmra.mxu0 %vm2277_vm15, %v4387_v27 }
0x1491   :  { %v4486_v15 = vpop.f32.mrf.mxu0 }
0x1492   :  { %v4487_v28 = vadd.f32 %v4936_v52, %v4486_v15 }
0x1493   :  { %v5802_v44 = vpop.f32.mrf.mxu0 }
0x1494   :  { %v4510_v13 = vadd.f32 %v4487_v28, %v8013_v32 }
0x1495   :  { %v4491_v21 = vpop.f32.mrf.mxu0 }
0x1496   :  { %v4492_v1 = vadd.f32 %v4936_v52, %v4491_v21  ;;  %v4517_v35 = vsel %vm193_vm2, %v4510_v13, 0.0 }
0x1497   :  { %4518 = vadd.xlane.f32.xlu0 %v4517_v35  ;;  %v5805_v48 = vpop.f32.mrf.mxu0  ;;  %v4942_v35 = vld [vmem:[%s8277_s18] ss:$0 sm:$0xff] }
0x1498   :  { %v4511_v58 = vadd.f32 %v4492_v1, %v8018_v62 }
0x149a   :  { %v4496_v25 = vpop.f32.mrf.mxu0  ;;  %v4520_v24 = vsel %vm193_vm2, %v4511_v58, 0.0 }
0x149b   :  { %v4497_v47 = vadd.f32 %v4936_v52, %v4496_v25  ;;  %4521 = vadd.xlane.f32.xlu1 %v4520_v24  ;;  %v4943_v25 = vld [vmem:[%s8278_s19] ss:$0 sm:$0xff] }
0x149c   :  { %v5808_v22 = vpop.f32.mrf.mxu0 }
0x149d   :  { %v4512_v6 = vadd.f32 %v4497_v47, %v8023_v50 }
0x149e   :  { %v4501_v49 = vpop.f32.mrf.mxu0 }
0x149f   :  { %v4502_v46 = vadd.f32 %v4936_v52, %v4501_v49  ;;  %v4523_v32 = vsel %vm193_vm2, %v4512_v6, 0.0 }
0x14a0   :  { %4524 = vadd.xlane.f32.xlu0 %v4523_v32  ;;  %v5811_v4 = vpop.f32.mrf.mxu0 }
0x14a1   :  { %v4513_v5 = vadd.f32 %v4502_v46, %v8028_v7 }
0x14a2   :  { %v4506_v16 = vpop.f32.mrf.mxu0 }
0x14a3   :  { %v4507_v3 = vadd.f32 %v4936_v52, %v4506_v16  ;;  %v4526_v62 = vsel %vm193_vm2, %v4513_v5, 0.0 }
0x14a4   :  { %4527 = vadd.xlane.f32.xlu1 %v4526_v62  ;;  %v5814_v36 = vpop.f32.mrf.mxu0 }
0x14a5   :  { %v4514_v29 = vadd.f32 %v4507_v3, %v8033_v23 }
0x14a7   :  { %v4529_v30 = vsel %vm279_vm3, %v4514_v29, 0.0 }
0x14a8   :  { %4530 = vadd.xlane.f32.xlu0 %v4529_v30 }
0x1520   :  { %v4519_v50 = vpop.xlane.xlu0 %4518 }
0x1521   :  { %v4532_v56 = vmul.f32 0.03125, %v4519_v50 }
0x1523   :  { %v8184_v42 = vsub.f32 %v4510_v13, %v4532_v56 }
0x1524   :  { %v4522_v51 = vpop.xlane.xlu1 %4521 }
0x1525   :  { %v4533_v57 = vmul.f32 0.03125, %v4522_v51  ;;  %v4542_v7 = vmul.f32 %v8184_v42, %v8184_v42 }
0x1527   :  { %v8188_v17 = vsub.f32 %v4511_v58, %v4533_v57  ;;  %v4547_v33 = vsel %vm193_vm2, %v4542_v7, 0.0  ;;  %v4944_v57 = vld [vmem:[#allocation3] ss:$0 sm:$0xff] }
0x1528   :  { %4548 = vadd.xlane.f32.xlu1 %v4547_v33 }
0x1529   :  { %v4525_v20 = vpop.xlane.xlu0 %4524  ;;  %v4543_v23 = vmul.f32 %v8188_v17, %v8188_v17 }
0x152a   :  { %v4534_v10 = vmul.f32 0.03125, %v4525_v20 }
0x152b   :  { %v4550_v55 = vsel %vm193_vm2, %v4543_v23, 0.0 }
0x152c   :  { %v8194_v31 = vsub.f32 %v4512_v6, %v4534_v10  ;;  %4551 = vadd.xlane.f32.xlu0 %v4550_v55 }
0x152d   :  { %v4528_v61 = vpop.xlane.xlu1 %4527 }
0x152e   :  { %v4535_v2 = vmul.f32 0.03125, %v4528_v61  ;;  %v4544_v12 = vmul.f32 %v8194_v31, %v8194_v31 }
0x1530   :  { %v8198_v14 = vsub.f32 %v4513_v5, %v4535_v2  ;;  %v4553_v43 = vsel %vm193_vm2, %v4544_v12, 0.0 }
0x1531   :  { %4554 = vadd.xlane.f32.xlu1 %v4553_v43  ;;  %v4531_v0 = vpop.xlane.xlu0 %4530 }
0x1532   :  { %v4536_v54 = vmul.f32 0.03125, %v4531_v0  ;;  %v4545_v18 = vmul.f32 %v8198_v14, %v8198_v14 }
0x1534   :  { %v8203_v40 = vsub.f32 %v4514_v29, %v4536_v54  ;;  %v4556_v11 = vsel %vm193_vm2, %v4545_v18, 0.0 }
0x1535   :  { %4557 = vadd.xlane.f32.xlu0 %v4556_v11 }
0x1536   :  { %v4546_v60 = vmul.f32 %v8203_v40, %v8203_v40 }
0x1538   :  { %v4559_v38 = vsel %vm279_vm3, %v4546_v60, 0.0  ;;  %vm4717_vm3 = vcmask 0  }
0x1539   :  { %4560 = vadd.xlane.f32.xlu1 %v4559_v38 }
0x15b1   :  { %v4549_v37 = vpop.xlane.xlu1 %4548 }
0x15b2   :  { %v4562_v45 = vmul.f32 0.03125, %v4549_v37 }
0x15b4   :  { %v4567_v63 = vadd.f32 1e-06, %v4562_v45 }
0x15b5   :  { %v4552_v26 = vpop.xlane.xlu0 %4551 }
0x15b6   :  { %6094 = vrsqrt.f32 %v4567_v63  ;;  %v4563_v41 = vmul.f32 0.03125, %v4552_v26 }
0x15b8   :  { %v4568_v39 = vadd.f32 1e-06, %v4563_v41 }
0x15ba   :  { %6096 = vrsqrt.f32 %v4568_v39  ;;  %v4555_v27 = vpop.xlane.xlu1 %4554 }
0x15bb   :  { %v4564_v52 = vmul.f32 0.03125, %v4555_v27 }
0x15bd   :  { %v4569_v15 = vadd.f32 1e-06, %v4564_v52 }
0x15be   :  { %v4558_v28 = vpop.xlane.xlu0 %4557 }
0x15bf   :  { %6098 = vrsqrt.f32 %v4569_v15  ;;  %v4565_v44 = vmul.f32 0.03125, %v4558_v28 }
0x15c1   :  { %v4570_v13 = vadd.f32 1e-06, %v4565_v44 }
0x15c2   :  { %v4561_v21 = vpop.xlane.xlu1 %4560 }
0x15c3   :  { %v6095_v1 = vpop.eup %6094  ;;  %6100 = vrsqrt.f32 %v4570_v13  ;;  %v4566_v48 = vmul.f32 0.03125, %v4561_v21 }
0x15c4   :  { %v4577_v58 = vmul.f32 %v6095_v1, %v8184_v42 }
0x15c5   :  { %v4571_v24 = vadd.f32 1e-06, %v4566_v48 }
0x15c6   :  { %v4588_v47 = vmul.f32 %v4942_v35, %v4577_v58 }
0x15c7   :  { %v6097_v22 = vpop.eup %6096  ;;  %6102 = vrsqrt.f32 %v4571_v24 }
0x15c8   :  { %v4599_v6 = vadd.f32 %v4943_v25, %v4588_v47  ;;  %v4578_v49 = vmul.f32 %v6097_v22, %v8188_v17 }
0x15ca   :  { %5824 = vmatmul.mubr.msk.f32.vlgmr.msra.gmra.mxu1 %vm193_vm2, %v4599_v6  ;;  %v4589_v46 = vmul.f32 %v4942_v35, %v4578_v49 }
0x15cb   :  { %5826 = vmatprep.mubr.msk.f32.mxu1 %vm6110_vm4, %v6109_v59 }
0x15cc   :  { %v6099_v32 = vpop.eup %6098  ;;  %v4600_v4 = vadd.f32 %v4943_v25, %v4589_v46 }
0x15cd   :  { %v4579_v5 = vmul.f32 %v6099_v32, %v8194_v31 }
0x15ce   :  { %5827 = vmatmul.mubr.msk.f32.gmra.mxu1 %vm193_vm2, %v4600_v4 }
0x15cf   :  { %5829 = vmatprep.mubr.msk.f32.mxu1 %vm6110_vm4, %v6109_v59  ;;  %v4590_v16 = vmul.f32 %v4942_v35, %v4579_v5 }
0x15d0   :  { %v6101_v3 = vpop.eup %6100 }
0x15d1   :  { %v4580_v62 = vmul.f32 %v6101_v3, %v8198_v14  ;;  %v4601_v36 = vadd.f32 %v4943_v25, %v4590_v16 }
0x15d3   :  { %5830 = vmatmul.mubr.msk.f32.gmra.mxu1 %vm193_vm2, %v4601_v36  ;;  %v4591_v29 = vmul.f32 %v4942_v35, %v4580_v62 }
0x15d4   :  { %v6103_v30 = vpop.eup %6102  ;;  %5832 = vmatprep.mubr.msk.f32.mxu1 %vm6110_vm4, %v6109_v59 }
0x15d5   :  { %v4581_v50 = vmul.f32 %v6103_v30, %v8203_v40  ;;  %v4602_v56 = vadd.f32 %v4943_v25, %v4591_v29 }
0x15d7   :  { %5833 = vmatmul.mubr.msk.f32.gmra.mxu1 %vm193_vm2, %v4602_v56  ;;  %v4592_v42 = vmul.f32 %v4942_v35, %v4581_v50 }
0x15d8   :  { %5835 = vmatprep.mubr.msk.f32.mxu1 %vm6110_vm4, %v6109_v59 }
0x15d9   :  { %v4603_v51 = vadd.f32 %v4943_v25, %v4592_v42 }
0x15db   :  { %5836 = vmatmul.mubr.msk.f32.gmra.mxu1 %vm193_vm2, %v4603_v51 }
0x168a   :  { %v4696_v7 = vpop.f32.mrf.mxu1 }
0x168b   :  { %v4697_v17 = vadd.f32 %v4944_v57, %v4696_v7 }
0x168c   :  { %v5825_v33 = vpop.f32.mrf.mxu1 }
0x168d   :  { %4718 = vst.msk [vmem:[%s8279_s22] sm:$0x1] %vm4717_vm3, %v4697_v17 }
0x168e   :  { %v4701_v20 = vpop.f32.mrf.mxu1 }
0x1690   :  { %v5828_v23 = vpop.f32.mrf.mxu1 }
0x1693   :  { %v4705_v10 = vpop.f32.mrf.mxu1 }
0x1694   :  { %v4706_v55 = vadd.f32 %v4944_v57, %v4705_v10 }
0x1695   :  { %v5831_v31 = vpop.f32.mrf.mxu1 }
0x1696   :  { %4720 = vst.msk [vmem:[%s8279_s22] sm:$0x2] %vm4719_vm13, %v4706_v55 }
0x1697   :  { %v4710_v59 = vpop.f32.mrf.mxu1 }
0x1699   :  { %v5834_v61 = vpop.f32.mrf.mxu1 }
0x169b   :  { %v4714_v2 = vpop.f32.mrf.mxu1 }
0x169d   :  { %v5837_v12 = vpop.f32.mrf.mxu1 }

</bundles_post_ra>
